<compile_context>
chip_gen: v6e
topology: v6e:2x2x1
jax: 0.10.0
libtpu: 0.0.40
codegen_flags: <defaults>
</compile_context>

<pallas_src>
import functools

import jax
import jax.numpy as jnp
from jax.experimental import pallas as pl
from jax.experimental.pallas import tpu as pltpu


_VMEM_LIMIT_BYTES = 48 * 1024 * 1024   # < 64 MiB (v7x physical), roomy on v5e/v6e
_BLOCK_BUDGET_BYTES = 4 * 1024 * 1024  # per-step block budget (Pallas double-buffers)


def _pick_row_tile(n_rows, bytes_per_row, budget=_BLOCK_BUDGET_BYTES):
    """Largest divisor of n_rows (multiple of 8, or n_rows itself) fitting budget."""
    candidates = [t for t in range(n_rows, 0, -1)
                  if n_rows % t == 0 and (t == n_rows or t % 8 == 0)]
    for t in candidates:
        if t * bytes_per_row <= budget:
            return t
    return candidates[-1]


# --------------------------------------------------------------------------------------
# Conv (Conv2d stride=1 / groups=1 / dilation=1, bias=False) + eval BatchNorm + SiLU
# --------------------------------------------------------------------------------------
def _matmul_bn_act_kernel(x_ref, w_ref, scale_ref, bias_ref, o_ref, *, apply_act):
    # x_ref:     (1, TM, Kc)  bf16  im2col patches (Kc = K*K*C1), spatial flattened
    # w_ref:     (Kc, C2)     bf16  conv weights, grid-invariant (stays resident)
    # scale_ref: (1, C2)      f32   folded BN scale
    # bias_ref:  (1, C2)      f32   folded BN bias
    # o_ref:     (1, TM, C2)  f32
    acc = jnp.dot(x_ref[0], w_ref[...], preferred_element_type=jnp.float32)
    y = acc * scale_ref[...] + bias_ref[...]
    if apply_act:
        y = y * jax.nn.sigmoid(y)                            # SiLU
    o_ref[0] = y.astype(o_ref.dtype)


def conv_bn_silu_nhwc(x_nhwc, weight_oihw, gamma, beta, running_mean, running_var,
                      *, k=3, eps=1e-5, act=True):
    """ultralytics Conv forward (eval-mode BN), NHWC in / NHWC out."""
    N, H, W, C1 = x_nhwc.shape
    C2, C1w, kh, kw = weight_oihw.shape
    assert (kh, kw) == (k, k) and C1w == C1 and k % 2 == 1, \
        "only odd k, stride=1, groups=1, dilation=1 is implemented"
    p = k // 2
    Kc = k * k * C1
    HW = H * W

    # im2col in NHWC, spatial flattened (bf16 MXU feed); contraction dim = K*K*C1.
    xp = jnp.pad(x_nhwc, ((0, 0), (p, p), (p, p), (0, 0)))
    patches = jnp.concatenate(
        [xp[:, i:i + H, j:j + W, :] for i in range(k) for j in range(k)],
        axis=-1).reshape(N, HW, Kc).astype(jnp.bfloat16)

    # Weights OIHW -> (K*K*C1, C2), matching the (kh, kw, c1) patch ordering.
    w = jnp.transpose(weight_oihw, (2, 3, 1, 0)).reshape(Kc, C2).astype(jnp.bfloat16)

    # Fold eval-mode BN into per-channel scale/bias (applied in-kernel, f32).
    inv = (gamma / jnp.sqrt(running_var + eps)).astype(jnp.float32)
    scale = inv.reshape(1, C2)
    bias = (beta.astype(jnp.float32)
            - running_mean.astype(jnp.float32) * inv).reshape(1, C2)

    bytes_per_row = Kc * 2 + C2 * 4
    TM = _pick_row_tile(HW, bytes_per_row)
    grid = (N, HW // TM)

    cost = pl.CostEstimate(
        flops=2 * N * HW * Kc * C2,
        transcendentals=(N * HW * C2) if act else 0,
        bytes_accessed=patches.size * 2 + w.size * 2 + N * HW * C2 * 4,
    )

    out = pl.pallas_call(
        functools.partial(_matmul_bn_act_kernel, apply_act=act),
        out_shape=jax.ShapeDtypeStruct((N, HW, C2), jnp.float32),
        grid=grid,
        in_specs=[
            pl.BlockSpec((1, TM, Kc), lambda n, i: (n, i, 0)),
            pl.BlockSpec((Kc, C2), lambda n, i: (0, 0)),
            pl.BlockSpec((1, C2), lambda n, i: (0, 0)),
            pl.BlockSpec((1, C2), lambda n, i: (0, 0)),
        ],
        out_specs=pl.BlockSpec((1, TM, C2), lambda n, i: (n, i, 0)),
        compiler_params=pltpu.CompilerParams(
            dimension_semantics=("parallel", "parallel"),
            vmem_limit_bytes=_VMEM_LIMIT_BYTES,
        ),
        cost_estimate=cost,
    )(patches, w, scale, bias)
    return out.reshape(N, H, W, C2)


# --------------------------------------------------------------------------------------
# Fused LSKA(k_size=7) attention + u*attn + optional residual add
# --------------------------------------------------------------------------------------
def _lska_bottleneck_kernel(y2_ref, x_ref,
                            w0h_ref, b0h_ref, w0v_ref, b0v_ref,
                            wsh_ref, bsh_ref, wsv_ref, bsv_ref,
                            w1_ref, b1_ref, o_ref, *, add, d_spatial):
    # y2_ref: (1, H, W, C) f32  LSKA input (u = cv2 output)
    # x_ref:  (1, H, W, C) f32  Bottleneck residual input
    # w*_ref: (3, C) f32 depthwise taps;  b*_ref: (1, C) f32 biases
    # w1_ref: (C, C)  bf16 1x1 conv weight laid out (C_in, C_out);  b1_ref: (1, C) f32
    # o_ref:  (1, H, W, C) f32
    _, H, W, C = y2_ref.shape
    u = y2_ref[0].astype(jnp.float32)                                   # (H, W, C)

    def dw_w(v, w_ref, b_ref, d):
        # depthwise 3-tap conv along W, dilation d, 'same' zero padding
        w = w_ref[...]
        z = jnp.zeros((H, d, C), jnp.float32)
        left = jnp.concatenate([z, v[:, :W - d, :]], axis=1)            # v[:, j-d]
        right = jnp.concatenate([v[:, d:, :], z], axis=1)               # v[:, j+d]
        return left * w[0] + v * w[1] + right * w[2] + b_ref[0]

    def dw_h(v, w_ref, b_ref, d):
        # depthwise 3-tap conv along H, dilation d, 'same' zero padding
        w = w_ref[...]
        z = jnp.zeros((d, W, C), jnp.float32)
        up = jnp.concatenate([z, v[:H - d, :, :]], axis=0)              # v[i-d]
        down = jnp.concatenate([v[d:, :, :], z], axis=0)                # v[i+d]
        return up * w[0] + v * w[1] + down * w[2] + b_ref[0]

    a = dw_w(u, w0h_ref, b0h_ref, 1)            # conv0h          (1x3, d=1)
    a = dw_h(a, w0v_ref, b0v_ref, 1)            # conv0v          (3x1, d=1)
    a = dw_w(a, wsh_ref, bsh_ref, d_spatial)    # conv_spatial_h  (1x3, d=2)
    a = dw_h(a, wsv_ref, bsv_ref, d_spatial)    # conv_spatial_v  (3x1, d=2)

    # conv1: 1x1 dense channel-mixing conv -> MXU (bf16 operands, f32 accumulate).
    attn = jnp.dot(a.reshape(H * W, C).astype(jnp.bfloat16), w1_ref[...],
                   preferred_element_type=jnp.float32) + b1_ref[...]

    out = u.reshape(H * W, C) * attn                                    # u * attn
    if add:
        out = out + x_ref[0].astype(jnp.float32).reshape(H * W, C)      # residual
    o_ref[...] = out.reshape(o_ref.shape).astype(o_ref.dtype)


def lska_bottleneck_nhwc(y2_nhwc, x_nhwc, lska_params, *, add):
    """Fused LSKA(k_size=7) + `u*attn` + optional residual add; NHWC in / NHWC out."""
    N, H, W, C = y2_nhwc.shape

    def dw_taps(w):  # (C,1,1,3) or (C,1,3,1) -> (3, C) f32
        return w.reshape(C, 3).T.astype(jnp.float32)

    lp = lska_params
    w0h = dw_taps(lp["w0h"]); b0h = lp["b0h"].reshape(1, C).astype(jnp.float32)
    w0v = dw_taps(lp["w0v"]); b0v = lp["b0v"].reshape(1, C).astype(jnp.float32)
    wsh = dw_taps(lp["wsh"]); bsh = lp["bsh"].reshape(1, C).astype(jnp.float32)
    wsv = dw_taps(lp["wsv"]); bsv = lp["bsv"].reshape(1, C).astype(jnp.float32)
    w1 = lp["w1"].reshape(C, C).T.astype(jnp.bfloat16)                  # (C_in, C_out)
    b1 = lp["b1"].reshape(1, C).astype(jnp.float32)

    img_spec = pl.BlockSpec((1, H, W, C), lambda n: (n, 0, 0, 0))
    tap_spec = pl.BlockSpec((3, C), lambda n: (0, 0))
    vec_spec = pl.BlockSpec((1, C), lambda n: (0, 0))
    mat_spec = pl.BlockSpec((C, C), lambda n: (0, 0))

    cost = pl.CostEstimate(
        flops=N * H * W * C * (4 * 6 + 2 * C + 3),
        transcendentals=0,
        bytes_accessed=3 * N * H * W * C * 4,
    )

    out = pl.pallas_call(
        functools.partial(_lska_bottleneck_kernel, add=add, d_spatial=2),
        out_shape=jax.ShapeDtypeStruct((N, H, W, C), jnp.float32),
        grid=(N,),
        in_specs=[img_spec, img_spec,
                  tap_spec, vec_spec, tap_spec, vec_spec,
                  tap_spec, vec_spec, tap_spec, vec_spec,
                  mat_spec, vec_spec],
        out_specs=img_spec,
        compiler_params=pltpu.CompilerParams(
            dimension_semantics=("parallel",),
            vmem_limit_bytes=_VMEM_LIMIT_BYTES,
        ),
        cost_estimate=cost,
    )(y2_nhwc, x_nhwc, w0h, b0h, w0v, b0v, wsh, bsh, wsv, bsv, w1, b1)
    return out


# --------------------------------------------------------------------------------------
# Bottleneck forward (PyTorch NCHW interface)
# --------------------------------------------------------------------------------------
def bottleneck_forward(x_nchw, params, *, shortcut=True):
    """Bottleneck.forward: x + LSKA(cv2(cv1(x))) if shortcut and c1 == c2."""
    N, C1, H, W = x_nchw.shape
    C2 = params["cv2_w"].shape[0]
    add = shortcut and (C1 == C2)

    # NCHW -> NHWC exactly once at the module boundary.
    x = jnp.transpose(x_nchw, (0, 2, 3, 1)).astype(jnp.float32)

    y = conv_bn_silu_nhwc(x, params["cv1_w"], params["cv1_bn_g"], params["cv1_bn_b"],
                          params["cv1_bn_m"], params["cv1_bn_v"], k=3)
    y = conv_bn_silu_nhwc(y, params["cv2_w"], params["cv2_bn_g"], params["cv2_bn_b"],
                          params["cv2_bn_m"], params["cv2_bn_v"], k=3)
    out = lska_bottleneck_nhwc(y, x, params["lska"], add=add)

    return jnp.transpose(out, (0, 3, 1, 2)).astype(x_nchw.dtype)


# --------------------------------------------------------------------------------------
# Plain-JAX reference (f32) for correctness checking
# --------------------------------------------------------------------------------------
def _conv2d_nchw_ref(x, w, *, padding, dilation=(1, 1), groups=1, bias=None):
    y = jax.lax.conv_general_dilated(
        x, w, window_strides=(1, 1), padding=padding, rhs_dilation=dilation,
        dimension_numbers=("NCHW", "OIHW", "NCHW"), feature_group_count=groups)
    if bias is not None:
        y = y + bias.reshape(1, -1, 1, 1)
    return y


def _reference_bottleneck(x, params, *, shortcut=True, eps=1e-5):
    def conv_bn_silu(v, w, g, b, m, var, k):
        p = k // 2
        y = _conv2d_nchw_ref(v, w, padding=((p, p), (p, p)))
        inv = g / jnp.sqrt(var + eps)
        y = y * inv.reshape(1, -1, 1, 1) + (b - m * inv).reshape(1, -1, 1, 1)
        return y * jax.nn.sigmoid(y)

    C1 = x.shape[1]
    C2 = params["cv2_w"].shape[0]
    lp = params["lska"]

    y = conv_bn_silu(x, params["cv1_w"], params["cv1_bn_g"], params["cv1_bn_b"],
                     params["cv1_bn_m"], params["cv1_bn_v"], 3)
    y = conv_bn_silu(y, params["cv2_w"], params["cv2_bn_g"], params["cv2_bn_b"],
                     params["cv2_bn_m"], params["cv2_bn_v"], 3)
    u = y
    a = _conv2d_nchw_ref(y, lp["w0h"], padding=((0, 0), (1, 1)), groups=C2, bias=lp["b0h"])
    a = _conv2d_nchw_ref(a, lp["w0v"], padding=((1, 1), (0, 0)), groups=C2, bias=lp["b0v"])
    a = _conv2d_nchw_ref(a, lp["wsh"], padding=((0, 0), (2, 2)), dilation=(2, 2),
                         groups=C2, bias=lp["bsh"])
    a = _conv2d_nchw_ref(a, lp["wsv"], padding=((2, 2), (0, 0)), dilation=(2, 2),
                         groups=C2, bias=lp["bsv"])
    a = _conv2d_nchw_ref(a, lp["w1"], padding=((0, 0), (0, 0)), bias=lp["b1"])
    attn = u * a
    return x + attn if (shortcut and C1 == C2) else attn


if __name__ == "__main__":
    # Bottleneck(c1=8, c2=8, shortcut=True) -> c_ = 4 ; LSKA(dim=8, k_size=7).
    N, C, H, W = 2, 8, 16, 16
    C_ = int(C * 0.5)

    keys = iter(jax.random.split(jax.random.PRNGKey(0), 24))

    def nrm(shape, scale=0.1):
        return scale * jax.random.normal(next(keys), shape, dtype=jnp.float32)

    params = {
        "cv1_w": nrm((C_, C, 3, 3)),
        "cv1_bn_g": 1.0 + nrm((C_,)),
        "cv1_bn_b": nrm((C_,)),
        "cv1_bn_m": nrm((C_,)),
        "cv1_bn_v": 1.0 + jnp.abs(nrm((C_,))),
        "cv2_w": nrm((C, C_, 3, 3)),
        "cv2_bn_g": 1.0 + nrm((C,)),
        "cv2_bn_b": nrm((C,)),
        "cv2_bn_m": nrm((C,)),
        "cv2_bn_v": 1.0 + jnp.abs(nrm((C,))),
        "lska": {
            "w0h": nrm((C, 1, 1, 3)), "b0h": nrm((C,)),
            "w0v": nrm((C, 1, 3, 1)), "b0v": nrm((C,)),
            "wsh": nrm((C, 1, 1, 3)), "bsh": nrm((C,)),
            "wsv": nrm((C, 1, 3, 1)), "bsv": nrm((C,)),
            "w1": nrm((C, C, 1, 1)), "b1": nrm((C,)),
        },
    }

    x = jax.random.normal(next(keys), (N, C, H, W), dtype=jnp.float32)

    fwd = jax.jit(functools.partial(bottleneck_forward, shortcut=True))
    out = jax.block_until_ready(fwd(x, params))

    ref = _reference_bottleneck(x, params, shortcut=True)
    assert out.shape == (N, C, H, W)
    assert jnp.allclose(out, ref, rtol=2e-2, atol=2e-2), (
        f"mismatch vs reference: max abs err {jnp.max(jnp.abs(out - ref))}")

    print("KERNEL_OK")
</pallas_src>

<mosaic_0001>
module attributes {stable_mosaic.version = 11 : i64} {
  func.func @_matmul_bn_act_kernel(%arg0: i32, %arg1: i32, %arg2: memref<1x256x72xbf16, #tpu.memory_space<vmem>>, %arg3: memref<72x4xbf16, #tpu.memory_space<vmem>>, %arg4: memref<1x4xf32, #tpu.memory_space<vmem>>, %arg5: memref<1x4xf32, #tpu.memory_space<vmem>>, %arg6: memref<1x256x4xf32, #tpu.memory_space<vmem>>) attributes {dimension_semantics = [#tpu.dimension_semantics<parallel>, #tpu.dimension_semantics<parallel>], iteration_bounds = array<i64: 2, 1>, scalar_prefetch = 0 : i64, scratch_operands = 0 : i64, tpu.core_type = #tpu.core_type<tc>, window_params = [{transform_indices = @transform_0, window_bounds = array<i64: 1, 256, 72>}, {pipeline_mode = #tpu.pipeline_mode<synchronous>, transform_indices = @transform_1, window_bounds = array<i64: 72, 4>}, {pipeline_mode = #tpu.pipeline_mode<synchronous>, transform_indices = @transform_2, window_bounds = array<i64: 1, 4>}, {pipeline_mode = #tpu.pipeline_mode<synchronous>, transform_indices = @transform_3, window_bounds = array<i64: 1, 4>}, {transform_indices = @transform_4, window_bounds = array<i64: 1, 256, 4>}]} {
    %c0 = arith.constant 0 : index
    %c0_0 = arith.constant 0 : index
    %c0_1 = arith.constant 0 : index
    %0 = vector.load %arg2[%c0, %c0_0, %c0_1] : memref<1x256x72xbf16, #tpu.memory_space<vmem>>, vector<1x256x72xbf16>
    %1 = vector.shape_cast %0 : vector<1x256x72xbf16> to vector<256x72xbf16>
    %c0_2 = arith.constant 0 : index
    %c0_3 = arith.constant 0 : index
    %2 = vector.load %arg3[%c0_2, %c0_3] : memref<72x4xbf16, #tpu.memory_space<vmem>>, vector<72x4xbf16>
    %cst = arith.constant dense<0.000000e+00> : vector<256x4xf32>
    %3 = tpu.matmul %1, %2, %cst {dimension_numbers = #tpu.dot_dimension_numbers<[1], [0], [0], [1], [0, 0, 1, 1], [], []>} : vector<256x72xbf16>, vector<72x4xbf16>, vector<256x4xf32> -> vector<256x4xf32>
    %c0_4 = arith.constant 0 : index
    %c0_5 = arith.constant 0 : index
    %4 = vector.load %arg4[%c0_4, %c0_5] : memref<1x4xf32, #tpu.memory_space<vmem>>, vector<1x4xf32>
    %5 = vector.broadcast %4 : vector<1x4xf32> to vector<256x4xf32>
    %6 = arith.mulf %3, %5 : vector<256x4xf32>
    %c0_6 = arith.constant 0 : index
    %c0_7 = arith.constant 0 : index
    %7 = vector.load %arg5[%c0_6, %c0_7] : memref<1x4xf32, #tpu.memory_space<vmem>>, vector<1x4xf32>
    %8 = vector.broadcast %7 : vector<1x4xf32> to vector<256x4xf32>
    %9 = arith.addf %6, %8 : vector<256x4xf32>
    %10 = arith.negf %9 : vector<256x4xf32>
    %11 = math.exp %10 : vector<256x4xf32>
    %cst_8 = arith.constant 1.000000e+00 : f32
    %12 = vector.broadcast %cst_8 : f32 to vector<256x4xf32>
    %13 = arith.addf %12, %11 : vector<256x4xf32>
    %14 = arith.divf %12, %13 : vector<256x4xf32>
    %15 = arith.mulf %9, %14 : vector<256x4xf32>
    %c0_9 = arith.constant 0 : index
    %c0_10 = arith.constant 0 : index
    %c0_11 = arith.constant 0 : index
    %16 = vector.load %arg6[%c0_9, %c0_10, %c0_11] : memref<1x256x4xf32, #tpu.memory_space<vmem>>, vector<1x256x4xf32>
    %17 = vector.shape_cast %16 : vector<1x256x4xf32> to vector<256x4xf32>
    %18 = vector.shape_cast %15 : vector<256x4xf32> to vector<1x256x4xf32>
    tpu.vector_store %arg6[%c0_9, %c0_10, %c0_11], %18 {strides = array<i32>} : memref<1x256x4xf32, #tpu.memory_space<vmem>>, vector<1x256x4xf32>,
    return
  }
  func.func @transform_0(%arg0: i32, %arg1: i32) -> (i32, i32, i32) {
    %c0_i32 = arith.constant 0 : i32
    %c0_i32_0 = arith.constant 0 : i32
    return %arg0, %arg1, %c0_i32 : i32, i32, i32
  }
  func.func @transform_1(%arg0: i32, %arg1: i32) -> (i32, i32) {
    %c0_i32 = arith.constant 0 : i32
    %c0_i32_0 = arith.constant 0 : i32
    %c0_i32_1 = arith.constant 0 : i32
    return %c0_i32, %c0_i32_0 : i32, i32
  }
  func.func @transform_2(%arg0: i32, %arg1: i32) -> (i32, i32) {
    %c0_i32 = arith.constant 0 : i32
    %c0_i32_0 = arith.constant 0 : i32
    %c0_i32_1 = arith.constant 0 : i32
    return %c0_i32, %c0_i32_0 : i32, i32
  }
  func.func @transform_3(%arg0: i32, %arg1: i32) -> (i32, i32) {
    %c0_i32 = arith.constant 0 : i32
    %c0_i32_0 = arith.constant 0 : i32
    %c0_i32_1 = arith.constant 0 : i32
    return %c0_i32, %c0_i32_0 : i32, i32
  }
  func.func @transform_4(%arg0: i32, %arg1: i32) -> (i32, i32, i32) {
    %c0_i32 = arith.constant 0 : i32
    %c0_i32_0 = arith.constant 0 : i32
    return %arg0, %arg1, %c0_i32 : i32, i32, i32
  }
}

module attributes {stable_mosaic.version = 11 : i64} {
  func.func @_matmul_bn_act_kernel(%arg0: i32, %arg1: i32, %arg2: memref<1x256x36xbf16, #tpu.memory_space<vmem>>, %arg3: memref<36x8xbf16, #tpu.memory_space<vmem>>, %arg4: memref<1x8xf32, #tpu.memory_space<vmem>>, %arg5: memref<1x8xf32, #tpu.memory_space<vmem>>, %arg6: memref<1x256x8xf32, #tpu.memory_space<vmem>>) attributes {dimension_semantics = [#tpu.dimension_semantics<parallel>, #tpu.dimension_semantics<parallel>], iteration_bounds = array<i64: 2, 1>, scalar_prefetch = 0 : i64, scratch_operands = 0 : i64, tpu.core_type = #tpu.core_type<tc>, window_params = [{transform_indices = @transform_0, window_bounds = array<i64: 1, 256, 36>}, {pipeline_mode = #tpu.pipeline_mode<synchronous>, transform_indices = @transform_1, window_bounds = array<i64: 36, 8>}, {pipeline_mode = #tpu.pipeline_mode<synchronous>, transform_indices = @transform_2, window_bounds = array<i64: 1, 8>}, {pipeline_mode = #tpu.pipeline_mode<synchronous>, transform_indices = @transform_3, window_bounds = array<i64: 1, 8>}, {transform_indices = @transform_4, window_bounds = array<i64: 1, 256, 8>}]} {
    %c0 = arith.constant 0 : index
    %c0_0 = arith.constant 0 : index
    %c0_1 = arith.constant 0 : index
    %0 = vector.load %arg2[%c0, %c0_0, %c0_1] : memref<1x256x36xbf16, #tpu.memory_space<vmem>>, vector<1x256x36xbf16>
    %1 = vector.shape_cast %0 : vector<1x256x36xbf16> to vector<256x36xbf16>
    %c0_2 = arith.constant 0 : index
    %c0_3 = arith.constant 0 : index
    %2 = vector.load %arg3[%c0_2, %c0_3] : memref<36x8xbf16, #tpu.memory_space<vmem>>, vector<36x8xbf16>
    %cst = arith.constant dense<0.000000e+00> : vector<256x8xf32>
    %3 = tpu.matmul %1, %2, %cst {dimension_numbers = #tpu.dot_dimension_numbers<[1], [0], [0], [1], [0, 0, 1, 1], [], []>} : vector<256x36xbf16>, vector<36x8xbf16>, vector<256x8xf32> -> vector<256x8xf32>
    %c0_4 = arith.constant 0 : index
    %c0_5 = arith.constant 0 : index
    %4 = vector.load %arg4[%c0_4, %c0_5] : memref<1x8xf32, #tpu.memory_space<vmem>>, vector<1x8xf32>
    %5 = vector.broadcast %4 : vector<1x8xf32> to vector<256x8xf32>
    %6 = arith.mulf %3, %5 : vector<256x8xf32>
    %c0_6 = arith.constant 0 : index
    %c0_7 = arith.constant 0 : index
    %7 = vector.load %arg5[%c0_6, %c0_7] : memref<1x8xf32, #tpu.memory_space<vmem>>, vector<1x8xf32>
    %8 = vector.broadcast %7 : vector<1x8xf32> to vector<256x8xf32>
    %9 = arith.addf %6, %8 : vector<256x8xf32>
    %10 = arith.negf %9 : vector<256x8xf32>
    %11 = math.exp %10 : vector<256x8xf32>
    %cst_8 = arith.constant 1.000000e+00 : f32
    %12 = vector.broadcast %cst_8 : f32 to vector<256x8xf32>
    %13 = arith.addf %12, %11 : vector<256x8xf32>
    %14 = arith.divf %12, %13 : vector<256x8xf32>
    %15 = arith.mulf %9, %14 : vector<256x8xf32>
    %c0_9 = arith.constant 0 : index
    %c0_10 = arith.constant 0 : index
    %c0_11 = arith.constant 0 : index
    %16 = vector.load %arg6[%c0_9, %c0_10, %c0_11] : memref<1x256x8xf32, #tpu.memory_space<vmem>>, vector<1x256x8xf32>
    %17 = vector.shape_cast %16 : vector<1x256x8xf32> to vector<256x8xf32>
    %18 = vector.shape_cast %15 : vector<256x8xf32> to vector<1x256x8xf32>
    tpu.vector_store %arg6[%c0_9, %c0_10, %c0_11], %18 {strides = array<i32>} : memref<1x256x8xf32, #tpu.memory_space<vmem>>, vector<1x256x8xf32>,
    return
  }
  func.func @transform_0(%arg0: i32, %arg1: i32) -> (i32, i32, i32) {
    %c0_i32 = arith.constant 0 : i32
    %c0_i32_0 = arith.constant 0 : i32
    return %arg0, %arg1, %c0_i32 : i32, i32, i32
  }
  func.func @transform_1(%arg0: i32, %arg1: i32) -> (i32, i32) {
    %c0_i32 = arith.constant 0 : i32
    %c0_i32_0 = arith.constant 0 : i32
    %c0_i32_1 = arith.constant 0 : i32
    return %c0_i32, %c0_i32_0 : i32, i32
  }
  func.func @transform_2(%arg0: i32, %arg1: i32) -> (i32, i32) {
    %c0_i32 = arith.constant 0 : i32
    %c0_i32_0 = arith.constant 0 : i32
    %c0_i32_1 = arith.constant 0 : i32
    return %c0_i32, %c0_i32_0 : i32, i32
  }
  func.func @transform_3(%arg0: i32, %arg1: i32) -> (i32, i32) {
    %c0_i32 = arith.constant 0 : i32
    %c0_i32_0 = arith.constant 0 : i32
    %c0_i32_1 = arith.constant 0 : i32
    return %c0_i32, %c0_i32_0 : i32, i32
  }
  func.func @transform_4(%arg0: i32, %arg1: i32) -> (i32, i32, i32) {
    %c0_i32 = arith.constant 0 : i32
    %c0_i32_0 = arith.constant 0 : i32
    return %arg0, %arg1, %c0_i32 : i32, i32, i32
  }
}

module attributes {stable_mosaic.version = 11 : i64} {
  func.func @_lska_bottleneck_kernel(%arg0: i32, %arg1: memref<1x16x16x8xf32, #tpu.memory_space<vmem>>, %arg2: memref<1x16x16x8xf32, #tpu.memory_space<vmem>>, %arg3: memref<3x8xf32, #tpu.memory_space<vmem>>, %arg4: memref<1x8xf32, #tpu.memory_space<vmem>>, %arg5: memref<3x8xf32, #tpu.memory_space<vmem>>, %arg6: memref<1x8xf32, #tpu.memory_space<vmem>>, %arg7: memref<3x8xf32, #tpu.memory_space<vmem>>, %arg8: memref<1x8xf32, #tpu.memory_space<vmem>>, %arg9: memref<3x8xf32, #tpu.memory_space<vmem>>, %arg10: memref<1x8xf32, #tpu.memory_space<vmem>>, %arg11: memref<8x8xbf16, #tpu.memory_space<vmem>>, %arg12: memref<1x8xf32, #tpu.memory_space<vmem>>, %arg13: memref<1x16x16x8xf32, #tpu.memory_space<vmem>>) attributes {dimension_semantics = [#tpu.dimension_semantics<parallel>], iteration_bounds = array<i64: 2>, scalar_prefetch = 0 : i64, scratch_operands = 0 : i64, tpu.core_type = #tpu.core_type<tc>, window_params = [{transform_indices = @transform_0, window_bounds = array<i64: 1, 16, 16, 8>}, {transform_indices = @transform_1, window_bounds = array<i64: 1, 16, 16, 8>}, {pipeline_mode = #tpu.pipeline_mode<synchronous>, transform_indices = @transform_2, window_bounds = array<i64: 3, 8>}, {pipeline_mode = #tpu.pipeline_mode<synchronous>, transform_indices = @transform_3, window_bounds = array<i64: 1, 8>}, {pipeline_mode = #tpu.pipeline_mode<synchronous>, transform_indices = @transform_4, window_bounds = array<i64: 3, 8>}, {pipeline_mode = #tpu.pipeline_mode<synchronous>, transform_indices = @transform_5, window_bounds = array<i64: 1, 8>}, {pipeline_mode = #tpu.pipeline_mode<synchronous>, transform_indices = @transform_6, window_bounds = array<i64: 3, 8>}, {pipeline_mode = #tpu.pipeline_mode<synchronous>, transform_indices = @transform_7, window_bounds = array<i64: 1, 8>}, {pipeline_mode = #tpu.pipeline_mode<synchronous>, transform_indices = @transform_8, window_bounds = array<i64: 3, 8>}, {pipeline_mode = #tpu.pipeline_mode<synchronous>, transform_indices = @transform_9, window_bounds = array<i64: 1, 8>}, {pipeline_mode = #tpu.pipeline_mode<synchronous>, transform_indices = @transform_10, window_bounds = array<i64: 8, 8>}, {pipeline_mode = #tpu.pipeline_mode<synchronous>, transform_indices = @transform_11, window_bounds = array<i64: 1, 8>}, {transform_indices = @transform_12, window_bounds = array<i64: 1, 16, 16, 8>}]} {
    %c0 = arith.constant 0 : index
    %c0_0 = arith.constant 0 : index
    %c0_1 = arith.constant 0 : index
    %c0_2 = arith.constant 0 : index
    %0 = vector.load %arg1[%c0, %c0_0, %c0_1, %c0_2] : memref<1x16x16x8xf32, #tpu.memory_space<vmem>>, vector<1x16x16x8xf32>
    %1 = vector.shape_cast %0 : vector<1x16x16x8xf32> to vector<16x16x8xf32>
    %c0_3 = arith.constant 0 : index
    %c0_4 = arith.constant 0 : index
    %2 = vector.load %arg3[%c0_3, %c0_4] : memref<3x8xf32, #tpu.memory_space<vmem>>, vector<3x8xf32>
    %cst = arith.constant 0.000000e+00 : f32
    %3 = vector.broadcast %cst : f32 to vector<16x1x8xf32>
    %4 = vector.extract_strided_slice %1 {offsets = [0, 0, 0], sizes = [16, 15, 8], strides = [1, 1, 1]} : vector<16x16x8xf32> to vector<16x15x8xf32>
    %5 = tpu.concatenate %3, %4 in 1 : vector<16x1x8xf32>, vector<16x15x8xf32> -> vector<16x16x8xf32>
    %6 = vector.extract_strided_slice %1 {offsets = [0, 1, 0], sizes = [16, 15, 8], strides = [1, 1, 1]} : vector<16x16x8xf32> to vector<16x15x8xf32>
    %7 = tpu.concatenate %6, %3 in 1 : vector<16x15x8xf32>, vector<16x1x8xf32> -> vector<16x16x8xf32>
    %8 = vector.extract_strided_slice %2 {offsets = [0, 0], sizes = [1, 8], strides = [1, 1]} : vector<3x8xf32> to vector<1x8xf32>
    %9 = vector.shape_cast %8 : vector<1x8xf32> to vector<8xf32>
    %10 = vector.shape_cast %9 : vector<8xf32> to vector<1x1x8xf32>
    %11 = vector.broadcast %10 : vector<1x1x8xf32> to vector<16x16x8xf32>
    %12 = arith.mulf %5, %11 : vector<16x16x8xf32>
    %13 = vector.extract_strided_slice %2 {offsets = [1, 0], sizes = [1, 8], strides = [1, 1]} : vector<3x8xf32> to vector<1x8xf32>
    %14 = vector.shape_cast %13 : vector<1x8xf32> to vector<8xf32>
    %15 = vector.shape_cast %14 : vector<8xf32> to vector<1x1x8xf32>
    %16 = vector.broadcast %15 : vector<1x1x8xf32> to vector<16x16x8xf32>
    %17 = arith.mulf %1, %16 : vector<16x16x8xf32>
    %18 = arith.addf %12, %17 : vector<16x16x8xf32>
    %19 = vector.extract_strided_slice %2 {offsets = [2, 0], sizes = [1, 8], strides = [1, 1]} : vector<3x8xf32> to vector<1x8xf32>
    %20 = vector.shape_cast %19 : vector<1x8xf32> to vector<8xf32>
    %21 = vector.shape_cast %20 : vector<8xf32> to vector<1x1x8xf32>
    %22 = vector.broadcast %21 : vector<1x1x8xf32> to vector<16x16x8xf32>
    %23 = arith.mulf %7, %22 : vector<16x16x8xf32>
    %24 = arith.addf %18, %23 : vector<16x16x8xf32>
    %c0_5 = arith.constant 0 : index
    %c0_6 = arith.constant 0 : index
    %25 = vector.load %arg4[%c0_5, %c0_6] : memref<1x8xf32, #tpu.memory_space<vmem>>, vector<1x8xf32>
    %26 = vector.shape_cast %25 : vector<1x8xf32> to vector<8xf32>
    %27 = vector.shape_cast %26 : vector<8xf32> to vector<1x1x8xf32>
    %28 = vector.broadcast %27 : vector<1x1x8xf32> to vector<16x16x8xf32>
    %29 = arith.addf %24, %28 : vector<16x16x8xf32>
    %c0_7 = arith.constant 0 : index
    %c0_8 = arith.constant 0 : index
    %30 = vector.load %arg5[%c0_7, %c0_8] : memref<3x8xf32, #tpu.memory_space<vmem>>, vector<3x8xf32>
    %cst_9 = arith.constant 0.000000e+00 : f32
    %31 = vector.broadcast %cst_9 : f32 to vector<1x16x8xf32>
    %32 = vector.extract_strided_slice %29 {offsets = [0, 0, 0], sizes = [15, 16, 8], strides = [1, 1, 1]} : vector<16x16x8xf32> to vector<15x16x8xf32>
    %33 = tpu.concatenate %31, %32 in 0 : vector<1x16x8xf32>, vector<15x16x8xf32> -> vector<16x16x8xf32>
    %34 = vector.extract_strided_slice %29 {offsets = [1, 0, 0], sizes = [15, 16, 8], strides = [1, 1, 1]} : vector<16x16x8xf32> to vector<15x16x8xf32>
    %35 = tpu.concatenate %34, %31 in 0 : vector<15x16x8xf32>, vector<1x16x8xf32> -> vector<16x16x8xf32>
    %36 = vector.extract_strided_slice %30 {offsets = [0, 0], sizes = [1, 8], strides = [1, 1]} : vector<3x8xf32> to vector<1x8xf32>
    %37 = vector.shape_cast %36 : vector<1x8xf32> to vector<8xf32>
    %38 = vector.shape_cast %37 : vector<8xf32> to vector<1x1x8xf32>
    %39 = vector.broadcast %38 : vector<1x1x8xf32> to vector<16x16x8xf32>
    %40 = arith.mulf %33, %39 : vector<16x16x8xf32>
    %41 = vector.extract_strided_slice %30 {offsets = [1, 0], sizes = [1, 8], strides = [1, 1]} : vector<3x8xf32> to vector<1x8xf32>
    %42 = vector.shape_cast %41 : vector<1x8xf32> to vector<8xf32>
    %43 = vector.shape_cast %42 : vector<8xf32> to vector<1x1x8xf32>
    %44 = vector.broadcast %43 : vector<1x1x8xf32> to vector<16x16x8xf32>
    %45 = arith.mulf %29, %44 : vector<16x16x8xf32>
    %46 = arith.addf %40, %45 : vector<16x16x8xf32>
    %47 = vector.extract_strided_slice %30 {offsets = [2, 0], sizes = [1, 8], strides = [1, 1]} : vector<3x8xf32> to vector<1x8xf32>
    %48 = vector.shape_cast %47 : vector<1x8xf32> to vector<8xf32>
    %49 = vector.shape_cast %48 : vector<8xf32> to vector<1x1x8xf32>
    %50 = vector.broadcast %49 : vector<1x1x8xf32> to vector<16x16x8xf32>
    %51 = arith.mulf %35, %50 : vector<16x16x8xf32>
    %52 = arith.addf %46, %51 : vector<16x16x8xf32>
    %c0_10 = arith.constant 0 : index
    %c0_11 = arith.constant 0 : index
    %53 = vector.load %arg6[%c0_10, %c0_11] : memref<1x8xf32, #tpu.memory_space<vmem>>, vector<1x8xf32>
    %54 = vector.shape_cast %53 : vector<1x8xf32> to vector<8xf32>
    %55 = vector.shape_cast %54 : vector<8xf32> to vector<1x1x8xf32>
    %56 = vector.broadcast %55 : vector<1x1x8xf32> to vector<16x16x8xf32>
    %57 = arith.addf %52, %56 : vector<16x16x8xf32>
    %c0_12 = arith.constant 0 : index
    %c0_13 = arith.constant 0 : index
    %58 = vector.load %arg7[%c0_12, %c0_13] : memref<3x8xf32, #tpu.memory_space<vmem>>, vector<3x8xf32>
    %cst_14 = arith.constant 0.000000e+00 : f32
    %59 = vector.broadcast %cst_14 : f32 to vector<16x2x8xf32>
    %60 = vector.extract_strided_slice %57 {offsets = [0, 0, 0], sizes = [16, 14, 8], strides = [1, 1, 1]} : vector<16x16x8xf32> to vector<16x14x8xf32>
    %61 = tpu.concatenate %59, %60 in 1 : vector<16x2x8xf32>, vector<16x14x8xf32> -> vector<16x16x8xf32>
    %62 = vector.extract_strided_slice %57 {offsets = [0, 2, 0], sizes = [16, 14, 8], strides = [1, 1, 1]} : vector<16x16x8xf32> to vector<16x14x8xf32>
    %63 = tpu.concatenate %62, %59 in 1 : vector<16x14x8xf32>, vector<16x2x8xf32> -> vector<16x16x8xf32>
    %64 = vector.extract_strided_slice %58 {offsets = [0, 0], sizes = [1, 8], strides = [1, 1]} : vector<3x8xf32> to vector<1x8xf32>
    %65 = vector.shape_cast %64 : vector<1x8xf32> to vector<8xf32>
    %66 = vector.shape_cast %65 : vector<8xf32> to vector<1x1x8xf32>
    %67 = vector.broadcast %66 : vector<1x1x8xf32> to vector<16x16x8xf32>
    %68 = arith.mulf %61, %67 : vector<16x16x8xf32>
    %69 = vector.extract_strided_slice %58 {offsets = [1, 0], sizes = [1, 8], strides = [1, 1]} : vector<3x8xf32> to vector<1x8xf32>
    %70 = vector.shape_cast %69 : vector<1x8xf32> to vector<8xf32>
    %71 = vector.shape_cast %70 : vector<8xf32> to vector<1x1x8xf32>
    %72 = vector.broadcast %71 : vector<1x1x8xf32> to vector<16x16x8xf32>
    %73 = arith.mulf %57, %72 : vector<16x16x8xf32>
    %74 = arith.addf %68, %73 : vector<16x16x8xf32>
    %75 = vector.extract_strided_slice %58 {offsets = [2, 0], sizes = [1, 8], strides = [1, 1]} : vector<3x8xf32> to vector<1x8xf32>
    %76 = vector.shape_cast %75 : vector<1x8xf32> to vector<8xf32>
    %77 = vector.shape_cast %76 : vector<8xf32> to vector<1x1x8xf32>
    %78 = vector.broadcast %77 : vector<1x1x8xf32> to vector<16x16x8xf32>
    %79 = arith.mulf %63, %78 : vector<16x16x8xf32>
    %80 = arith.addf %74, %79 : vector<16x16x8xf32>
    %c0_15 = arith.constant 0 : index
    %c0_16 = arith.constant 0 : index
    %81 = vector.load %arg8[%c0_15, %c0_16] : memref<1x8xf32, #tpu.memory_space<vmem>>, vector<1x8xf32>
    %82 = vector.shape_cast %81 : vector<1x8xf32> to vector<8xf32>
    %83 = vector.shape_cast %82 : vector<8xf32> to vector<1x1x8xf32>
    %84 = vector.broadcast %83 : vector<1x1x8xf32> to vector<16x16x8xf32>
    %85 = arith.addf %80, %84 : vector<16x16x8xf32>
    %c0_17 = arith.constant 0 : index
    %c0_18 = arith.constant 0 : index
    %86 = vector.load %arg9[%c0_17, %c0_18] : memref<3x8xf32, #tpu.memory_space<vmem>>, vector<3x8xf32>
    %cst_19 = arith.constant 0.000000e+00 : f32
    %87 = vector.broadcast %cst_19 : f32 to vector<2x16x8xf32>
    %88 = vector.extract_strided_slice %85 {offsets = [0, 0, 0], sizes = [14, 16, 8], strides = [1, 1, 1]} : vector<16x16x8xf32> to vector<14x16x8xf32>
    %89 = tpu.concatenate %87, %88 in 0 : vector<2x16x8xf32>, vector<14x16x8xf32> -> vector<16x16x8xf32>
    %90 = vector.extract_strided_slice %85 {offsets = [2, 0, 0], sizes = [14, 16, 8], strides = [1, 1, 1]} : vector<16x16x8xf32> to vector<14x16x8xf32>
    %91 = tpu.concatenate %90, %87 in 0 : vector<14x16x8xf32>, vector<2x16x8xf32> -> vector<16x16x8xf32>
    %92 = vector.extract_strided_slice %86 {offsets = [0, 0], sizes = [1, 8], strides = [1, 1]} : vector<3x8xf32> to vector<1x8xf32>
    %93 = vector.shape_cast %92 : vector<1x8xf32> to vector<8xf32>
    %94 = vector.shape_cast %93 : vector<8xf32> to vector<1x1x8xf32>
    %95 = vector.broadcast %94 : vector<1x1x8xf32> to vector<16x16x8xf32>
    %96 = arith.mulf %89, %95 : vector<16x16x8xf32>
    %97 = vector.extract_strided_slice %86 {offsets = [1, 0], sizes = [1, 8], strides = [1, 1]} : vector<3x8xf32> to vector<1x8xf32>
    %98 = vector.shape_cast %97 : vector<1x8xf32> to vector<8xf32>
    %99 = vector.shape_cast %98 : vector<8xf32> to vector<1x1x8xf32>
    %100 = vector.broadcast %99 : vector<1x1x8xf32> to vector<16x16x8xf32>
    %101 = arith.mulf %85, %100 : vector<16x16x8xf32>
    %102 = arith.addf %96, %101 : vector<16x16x8xf32>
    %103 = vector.extract_strided_slice %86 {offsets = [2, 0], sizes = [1, 8], strides = [1, 1]} : vector<3x8xf32> to vector<1x8xf32>
    %104 = vector.shape_cast %103 : vector<1x8xf32> to vector<8xf32>
    %105 = vector.shape_cast %104 : vector<8xf32> to vector<1x1x8xf32>
    %106 = vector.broadcast %105 : vector<1x1x8xf32> to vector<16x16x8xf32>
    %107 = arith.mulf %91, %106 : vector<16x16x8xf32>
    %108 = arith.addf %102, %107 : vector<16x16x8xf32>
    %c0_20 = arith.constant 0 : index
    %c0_21 = arith.constant 0 : index
    %109 = vector.load %arg10[%c0_20, %c0_21] : memref<1x8xf32, #tpu.memory_space<vmem>>, vector<1x8xf32>
    %110 = vector.shape_cast %109 : vector<1x8xf32> to vector<8xf32>
    %111 = vector.shape_cast %110 : vector<8xf32> to vector<1x1x8xf32>
    %112 = vector.broadcast %111 : vector<1x1x8xf32> to vector<16x16x8xf32>
    %113 = arith.addf %108, %112 : vector<16x16x8xf32>
    %114 = vector.shape_cast %113 : vector<16x16x8xf32> to vector<256x8xf32>
    %115 = arith.truncf %114 : vector<256x8xf32> to vector<256x8xbf16>
    %c0_22 = arith.constant 0 : index
    %c0_23 = arith.constant 0 : index
    %116 = vector.load %arg11[%c0_22, %c0_23] : memref<8x8xbf16, #tpu.memory_space<vmem>>, vector<8x8xbf16>
    %cst_24 = arith.constant dense<0.000000e+00> : vector<256x8xf32>
    %117 = tpu.matmul %115, %116, %cst_24 {dimension_numbers = #tpu.dot_dimension_numbers<[1], [0], [0], [1], [0, 0, 1, 1], [], []>} : vector<256x8xbf16>, vector<8x8xbf16>, vector<256x8xf32> -> vector<256x8xf32>
    %c0_25 = arith.constant 0 : index
    %c0_26 = arith.constant 0 : index
    %118 = vector.load %arg12[%c0_25, %c0_26] : memref<1x8xf32, #tpu.memory_space<vmem>>, vector<1x8xf32>
    %119 = vector.broadcast %118 : vector<1x8xf32> to vector<256x8xf32>
    %120 = arith.addf %117, %119 : vector<256x8xf32>
    %121 = vector.shape_cast %1 : vector<16x16x8xf32> to vector<256x8xf32>
    %122 = arith.mulf %121, %120 : vector<256x8xf32>
    %c0_27 = arith.constant 0 : index
    %c0_28 = arith.constant 0 : index
    %c0_29 = arith.constant 0 : index
    %c0_30 = arith.constant 0 : index
    %123 = vector.load %arg2[%c0_27, %c0_28, %c0_29, %c0_30] : memref<1x16x16x8xf32, #tpu.memory_space<vmem>>, vector<1x16x16x8xf32>
    %124 = vector.shape_cast %123 : vector<1x16x16x8xf32> to vector<16x16x8xf32>
    %125 = vector.shape_cast %124 : vector<16x16x8xf32> to vector<256x8xf32>
    %126 = arith.addf %122, %125 : vector<256x8xf32>
    %127 = vector.shape_cast %126 : vector<256x8xf32> to vector<1x16x16x8xf32>
    %c0_31 = arith.constant 0 : index
    %c0_32 = arith.constant 0 : index
    %c0_33 = arith.constant 0 : index
    %c0_34 = arith.constant 0 : index
    %128 = vector.load %arg13[%c0_31, %c0_32, %c0_33, %c0_34] : memref<1x16x16x8xf32, #tpu.memory_space<vmem>>, vector<1x16x16x8xf32>
    tpu.vector_store %arg13[%c0_31, %c0_32, %c0_33, %c0_34], %127 {strides = array<i32>} : memref<1x16x16x8xf32, #tpu.memory_space<vmem>>, vector<1x16x16x8xf32>,
    return
  }
  func.func @transform_0(%arg0: i32) -> (i32, i32, i32, i32) {
    %c0_i32 = arith.constant 0 : i32
    %c0_i32_0 = arith.constant 0 : i32
    %c0_i32_1 = arith.constant 0 : i32
    %c0_i32_2 = arith.constant 0 : i32
    return %arg0, %c0_i32, %c0_i32_0, %c0_i32_1 : i32, i32, i32, i32
  }
  func.func @transform_1(%arg0: i32) -> (i32, i32, i32, i32) {
    %c0_i32 = arith.constant 0 : i32
    %c0_i32_0 = arith.constant 0 : i32
    %c0_i32_1 = arith.constant 0 : i32
    %c0_i32_2 = arith.constant 0 : i32
    return %arg0, %c0_i32, %c0_i32_0, %c0_i32_1 : i32, i32, i32, i32
  }
  func.func @transform_2(%arg0: i32) -> (i32, i32) {
    %c0_i32 = arith.constant 0 : i32
    %c0_i32_0 = arith.constant 0 : i32
    %c0_i32_1 = arith.constant 0 : i32
    return %c0_i32, %c0_i32_0 : i32, i32
  }
  func.func @transform_3(%arg0: i32) -> (i32, i32) {
    %c0_i32 = arith.constant 0 : i32
    %c0_i32_0 = arith.constant 0 : i32
    %c0_i32_1 = arith.constant 0 : i32
    return %c0_i32, %c0_i32_0 : i32, i32
  }
  func.func @transform_4(%arg0: i32) -> (i32, i32) {
    %c0_i32 = arith.constant 0 : i32
    %c0_i32_0 = arith.constant 0 : i32
    %c0_i32_1 = arith.constant 0 : i32
    return %c0_i32, %c0_i32_0 : i32, i32
  }
  func.func @transform_5(%arg0: i32) -> (i32, i32) {
    %c0_i32 = arith.constant 0 : i32
    %c0_i32_0 = arith.constant 0 : i32
    %c0_i32_1 = arith.constant 0 : i32
    return %c0_i32, %c0_i32_0 : i32, i32
  }
  func.func @transform_6(%arg0: i32) -> (i32, i32) {
    %c0_i32 = arith.constant 0 : i32
    %c0_i32_0 = arith.constant 0 : i32
    %c0_i32_1 = arith.constant 0 : i32
    return %c0_i32, %c0_i32_0 : i32, i32
  }
  func.func @transform_7(%arg0: i32) -> (i32, i32) {
    %c0_i32 = arith.constant 0 : i32
    %c0_i32_0 = arith.constant 0 : i32
    %c0_i32_1 = arith.constant 0 : i32
    return %c0_i32, %c0_i32_0 : i32, i32
  }
  func.func @transform_8(%arg0: i32) -> (i32, i32) {
    %c0_i32 = arith.constant 0 : i32
    %c0_i32_0 = arith.constant 0 : i32
    %c0_i32_1 = arith.constant 0 : i32
    return %c0_i32, %c0_i32_0 : i32, i32
  }
  func.func @transform_9(%arg0: i32) -> (i32, i32) {
    %c0_i32 = arith.constant 0 : i32
    %c0_i32_0 = arith.constant 0 : i32
    %c0_i32_1 = arith.constant 0 : i32
    return %c0_i32, %c0_i32_0 : i32, i32
  }
  func.func @transform_10(%arg0: i32) -> (i32, i32) {
    %c0_i32 = arith.constant 0 : i32
    %c0_i32_0 = arith.constant 0 : i32
    %c0_i32_1 = arith.constant 0 : i32
    return %c0_i32, %c0_i32_0 : i32, i32
  }
  func.func @transform_11(%arg0: i32) -> (i32, i32) {
    %c0_i32 = arith.constant 0 : i32
    %c0_i32_0 = arith.constant 0 : i32
    %c0_i32_1 = arith.constant 0 : i32
    return %c0_i32, %c0_i32_0 : i32, i32
  }
  func.func @transform_12(%arg0: i32) -> (i32, i32, i32, i32) {
    %c0_i32 = arith.constant 0 : i32
    %c0_i32_0 = arith.constant 0 : i32
    %c0_i32_1 = arith.constant 0 : i32
    %c0_i32_2 = arith.constant 0 : i32
    return %arg0, %c0_i32, %c0_i32_0, %c0_i32_1 : i32, i32, i32, i32
  }
}

</mosaic_0001>

<bundles_post_ra>
// kernel: bottleneck_forward.3
= control target key start
LH: loop header
LB: loop body
LE: loop exit
PB: predicated region body
PF: predicated region fallthrough
CT: control target
= control target key end

     0   :  { %s1403_s15 = smov 0   ;;  %s1405_s16 = smov 0   ;;  %s1757_s0 = inlined_call_operand.vmem [shape: bf16[2,256,72], index: 0, kind: input, shape index: {}]   ;;  %s1758_s1 = inlined_call_operand.vmem [shape: bf16[72,4], index: 1, kind: input, shape index: {}]   ;;  %s1759_s2 = inlined_call_operand.vmem [shape: f32[1,4], index: 2, kind: input, shape index: {}]   ;;  %s1760_s3 = inlined_call_operand.vmem [shape: f32[1,4], index: 3, kind: input, shape index: {}]   ;;  %s1761_s4 = inlined_call_operand.vmem [shape: f32[2,256,4], index: 4, kind: output, shape index: {}]  }
   0x1   :  { %s1407_s17 = smov 0  }
   0x2 LB: > { %s26_s18 = sadd.s32 1, %s1372_s16  ;;  %p1026_p0 = scmp.ge.s32.totalorder %s1376_s17, 1  ;;  %s1376_s17 = sphi %s1407_s17, %s14_s17   ;;  %s1372_s16 = sphi %s1405_s16, %s1763_s16   ;;  %s1368_s15 = sphi %s1403_s15, %s1762_s15  }
   0x3   : > { %p28_p1 = scmp.ge.s32.totalorder %s26_s18, 2  ;;  %p183_p2 = scmp.lt.s32.totalorder %s1376_s17, 3 }
   0x5   : > { %s1765_s18 = smov (%p28_p1, %s26_s18), 0  ;;  %p184_p3 = pnand %p1026_p0, %p183_p2 }
   0x6   : > { %p218_p4 = scmp.lt.s32.totalorder (!%p184_p3), %s1368_s15, 1 }
   0x7   : > { %187 = sbr.rel (%p184_p3) target bundleno = 317 (0x13d), region = 36 }
   0xc   : > { %v1205_v0 = vld [vmem:[%s1758_s1 + $0x20] ss:$0 sps:$4 sm:$0xff]   ;;  %vm435_vm0 = vcmask 1043456   ;;  %v1206_v1 = vld [vmem:[%s1758_s1 + $0x18] sm:$0xff]   ;;  %v1207_v3 = vld [vmem:[%s1758_s1 + $0x10] sm:$0xff]   ;;  %s1767_s15 = smov (!%p218_p4, %s1368_s15), 1 }
   0xd   : > { %1179 = vmatprep.subr.msk.bf16.mxu0 %vm435_vm0, %v1205_v0  ;;  %1180 = vmatprep.subr.msk.bf16.mxu1 %vm435_vm0, %v1205_v0  ;;  %v437_v2 = vsel %vm435_vm0, %v1205_v0, 0  ;;  %s1104_s25 = sshll.u32 %s1767_s15, 7  ;;  %v1208_v4 = vld [vmem:[%s1758_s1 + $0x8] sm:$0xff]   ;;  %vm386_vm1 = vcmask 588800   ;;  %v1209_v7 = vld [vmem:[%s1758_s1] sm:$0xff]   ;;  %vm902_vm2 = vcmask 31744  }
   0xe   : > { %1128 = vmatpush3.bf16.msra.mxu0 %v437_v2  ;;  %1174 = vmatpush3.bf16.msra.mxu1 %v437_v2  ;;  %s1439_s30 = scalar_lea.vmem %s1757_s0, %s1104_s25  ;;  %v1479_v22 = vld [vmem:[%s1759_s2] ss:$0 sm:$0xff]  ;;  %s1105_s11 = sshll.u32 %s1767_s15, 8 }
   0xf   : > { %1129 = vmatprep.subr.bf16.mxu0 %v1206_v1  ;;  %1170 = vmatprep.subr.bf16.mxu1 %v1206_v1  ;;  %v1210_v5 = vld [vmem:[%s1439_s30] sm:$0xff]   ;;  %v1212_v8 = vld [vmem:[%s1439_s30 + $0x8] sm:$0xff]   ;;  %v1214_v10 = vld [vmem:[%s1439_s30 + $0x10] sm:$0xff]   ;;  %s1603_s14 = scalar_lea.vmem %s1761_s4, %s1105_s11 }
  0x10   : > { %v1211_v6 = vld [vmem:[%s1439_s30 + $0x40] sm:$0xff]   ;;  %1137 = vmatprep.mubr.msk.bf16.mxu0 %vm386_vm1, %v1210_v5  ;;  %v1213_v9 = vld [vmem:[%s1439_s30 + $0x48] sm:$0xff]   ;;  %v1215_v11 = vld [vmem:[%s1439_s30 + $0x50] sm:$0xff]  }
  0x11   : > { %1153 = vmatprep.mubr.msk.bf16.mxu1 %vm386_vm1, %v1211_v6  ;;  %v1216_v12 = vld [vmem:[%s1439_s30 + $0x18] sm:$0xff]   ;;  %v1218_v14 = vld [vmem:[%s1439_s30 + $0x20] sm:$0xff]   ;;  %v1220_v16 = vld [vmem:[%s1439_s30 + $0x28] sm:$0xff]  }
  0x12   : > { %1130 = vmatpush3.bf16.msra.mxu0 %v1206_v1  ;;  %1175 = vmatpush3.bf16.msra.mxu1 %v1206_v1  ;;  %v1217_v13 = vld [vmem:[%s1439_s30 + $0x58] sm:$0xff]   ;;  %v1219_v15 = vld [vmem:[%s1439_s30 + $0x60] sm:$0xff]   ;;  %v1221_v17 = vld [vmem:[%s1439_s30 + $0x68] sm:$0xff]  }
  0x13   : > { %1131 = vmatprep.subr.bf16.mxu0 %v1207_v3  ;;  %1171 = vmatprep.subr.bf16.mxu1 %v1207_v3  ;;  %v1222_v18 = vld [vmem:[%s1439_s30 + $0x30] sm:$0xff]   ;;  %v1224_v20 = vld [vmem:[%s1439_s30 + $0x38] sm:$0xff]   ;;  %v1484_v24 = vld [vmem:[%s1760_s3] ss:$0 sm:$0xff] }
  0x14   : > { %v1223_v19 = vld [vmem:[%s1439_s30 + $0x70] sm:$0xff]   ;;  %v1225_v21 = vld [vmem:[%s1439_s30 + $0x78] sm:$0xff]  }
  0x16   : > { %1132 = vmatpush3.bf16.msra.mxu0 %v1207_v3  ;;  %1176 = vmatpush3.bf16.msra.mxu1 %v1207_v3 }
  0x17   : > { %1133 = vmatprep.subr.bf16.mxu0 %v1208_v4  ;;  %1172 = vmatprep.subr.bf16.mxu1 %v1208_v4 }
  0x1a   : > { %1134 = vmatpush3.bf16.msra.mxu0 %v1208_v4  ;;  %1177 = vmatpush3.bf16.msra.mxu1 %v1208_v4 }
  0x1b   : > { %1135 = vmatprep.subr.bf16.mxu0 %v1209_v7  ;;  %1173 = vmatprep.subr.bf16.mxu1 %v1209_v7 }
  0x1e   : > { %1136 = vmatpush3.bf16.msra.mxu0 %v1209_v7  ;;  %1178 = vmatpush3.bf16.msra.mxu1 %v1209_v7 }
  0x21   : > { %1138 = vmatmul.mubr.msk.bf16.vlgmr.msra.gmra.mxu0 %vm386_vm1, %v1212_v8  ;;  %1154 = vmatmul.mubr.msk.bf16.vlgmr.msra.gmra.mxu1 %vm386_vm1, %v1213_v9 }
  0x22   : > { %1141 = vmatprep.mubr.msk.bf16.mxu0 %vm386_vm1, %v1214_v10  ;;  %1157 = vmatprep.mubr.msk.bf16.mxu1 %vm386_vm1, %v1215_v11 }
  0x29   : > { %1142 = vmatmul.mubr.msk.bf16.gmra.mxu0 %vm386_vm1, %v1216_v12  ;;  %1158 = vmatmul.mubr.msk.bf16.gmra.mxu1 %vm386_vm1, %v1217_v13 }
  0x2a   : > { %1145 = vmatprep.mubr.msk.bf16.mxu0 %vm386_vm1, %v1218_v14  ;;  %1161 = vmatprep.mubr.msk.bf16.mxu1 %vm386_vm1, %v1219_v15 }
  0x31   : > { %1146 = vmatmul.mubr.msk.bf16.gmra.mxu0 %vm386_vm1, %v1220_v16  ;;  %1162 = vmatmul.mubr.msk.bf16.gmra.mxu1 %vm386_vm1, %v1221_v17 }
  0x32   : > { %1149 = vmatprep.mubr.msk.bf16.mxu0 %vm386_vm1, %v1222_v18  ;;  %1165 = vmatprep.mubr.msk.bf16.mxu1 %vm386_vm1, %v1223_v19 }
  0x39   : > { %1150 = vmatmul.mubr.msk.bf16.gmra.mxu0 %vm386_vm1, %v1224_v20  ;;  %1166 = vmatmul.mubr.msk.bf16.gmra.mxu1 %vm386_vm1, %v1225_v21 }
  0xe1   : > { %v1139_v23 = vpop.f32.mrf.mxu0  ;;  %v1155_v25 = vpop.f32.mrf.mxu1 }
  0xe2   : > { %v609_v26 = vmul.f32 %v1139_v23, %v1479_v22  ;;  %v625_v27 = vmul.f32 %v1155_v25, %v1479_v22 }
  0xe3   : > { %v473_v28 = vpop.f32.mrf.mxu0  ;;  %v537_v29 = vpop.f32.mrf.mxu1 }
  0xe4   : > { %v1489_v30 = vadd.f32 %v1484_v24, %v609_v26  ;;  %v1492_v31 = vadd.f32 %v1484_v24, %v625_v27  ;;  %v607_v32 = vmul.f32 %v1479_v22, %v473_v28  ;;  %v623_v33 = vmul.f32 %v1479_v22, %v537_v29 }
  0xe5   : > { %v1140_v34 = vpop.f32.mrf.mxu0  ;;  %v1156_v35 = vpop.f32.mrf.mxu1 }
  0xe6   : > { %v1072_v36 = vmul.f32 -1.442695, %v1489_v30  ;;  %v1088_v37 = vmul.f32 -1.442695, %v1492_v31  ;;  %v1499_v38 = vadd.f32 %v1484_v24, %v607_v32  ;;  %v1502_v39 = vadd.f32 %v1484_v24, %v623_v33 }
  0xe7   : > { %v610_v40 = vmul.f32 %v1140_v34, %v1479_v22  ;;  %v626_v41 = vmul.f32 %v1156_v35, %v1479_v22  ;;  %v476_v42 = vpop.f32.mrf.mxu0  ;;  %v540_v43 = vpop.f32.mrf.mxu1 }
  0xe8   : > { %1226 = vpow2.f32 %v1072_v36  ;;  %v1070_v44 = vmul.f32 -1.442695, %v1499_v38  ;;  %v1086_v45 = vmul.f32 -1.442695, %v1502_v39  ;;  %v608_v46 = vmul.f32 %v1479_v22, %v476_v42 }
  0xe9   : > { %1228 = vpow2.f32 %v1088_v37  ;;  %v1510_v47 = vadd.f32 %v1484_v24, %v610_v40  ;;  %v1513_v48 = vadd.f32 %v1484_v24, %v626_v41  ;;  %v624_v49 = vmul.f32 %v1479_v22, %v540_v43  ;;  %v1143_v50 = vpop.f32.mrf.mxu0  ;;  %v1159_v51 = vpop.f32.mrf.mxu1 }
  0xea   : > { %1230 = vpow2.f32 %v1070_v44  ;;  %v1517_v52 = vadd.f32 %v1484_v24, %v608_v46  ;;  %v613_v53 = vmul.f32 %v1143_v50, %v1479_v22  ;;  %v629_v54 = vmul.f32 %v1159_v51, %v1479_v22 }
  0xeb   : > { %1232 = vpow2.f32 %v1086_v45  ;;  %v1073_v55 = vmul.f32 -1.442695, %v1510_v47  ;;  %v1089_v56 = vmul.f32 -1.442695, %v1513_v48  ;;  %v1524_v57 = vadd.f32 %v1484_v24, %v624_v49  ;;  %v489_v58 = vpop.f32.mrf.mxu0  ;;  %v553_v59 = vpop.f32.mrf.mxu1 }
  0xec   : > { %v1071_v60 = vmul.f32 -1.442695, %v1517_v52  ;;  %v1528_v61 = vadd.f32 %v1484_v24, %v613_v53  ;;  %v1531_v62 = vadd.f32 %v1484_v24, %v629_v54  ;;  %v611_v63 = vmul.f32 %v1479_v22, %v489_v58 }
  0xed   : > { %1234 = vpow2.f32 %v1073_v55  ;;  %v1087_v0 = vmul.f32 -1.442695, %v1524_v57  ;;  %v627_v1 = vmul.f32 %v1479_v22, %v553_v59  ;;  %v1144_v2 = vpop.f32.mrf.mxu0  ;;  %v1160_v3 = vpop.f32.mrf.mxu1 }
  0xee   : > { %1236 = vpow2.f32 %v1089_v56  ;;  %v1076_v4 = vmul.f32 -1.442695, %v1528_v61  ;;  %v1092_v5 = vmul.f32 -1.442695, %v1531_v62  ;;  %v1539_v6 = vadd.f32 %v1484_v24, %v611_v63 }
  0xef   : > { %1238 = vpow2.f32 %v1071_v60  ;;  %v1542_v7 = vadd.f32 %v1484_v24, %v627_v1  ;;  %v614_v8 = vmul.f32 %v1144_v2, %v1479_v22  ;;  %v630_v9 = vmul.f32 %v1160_v3, %v1479_v22  ;;  %v492_v10 = vpop.f32.mrf.mxu0  ;;  %v556_v11 = vpop.f32.mrf.mxu1 }
  0xf0   : > { %1240 = vpow2.f32 %v1087_v0  ;;  %v1074_v12 = vmul.f32 -1.442695, %v1539_v6  ;;  %v612_v13 = vmul.f32 %v1479_v22, %v492_v10  ;;  %v628_v14 = vmul.f32 %v1479_v22, %v556_v11 }
  0xf1   : > { %1242 = vpow2.f32 %v1076_v4  ;;  %v1090_v15 = vmul.f32 -1.442695, %v1542_v7  ;;  %v1551_v16 = vadd.f32 %v1484_v24, %v614_v8  ;;  %v1554_v17 = vadd.f32 %v1484_v24, %v630_v9  ;;  %v1147_v18 = vpop.f32.mrf.mxu0  ;;  %v1163_v19 = vpop.f32.mrf.mxu1 }
  0xf2   : > { %1244 = vpow2.f32 %v1092_v5  ;;  %v1557_v20 = vadd.f32 %v1484_v24, %v612_v13  ;;  %v1563_v28 = vadd.f32 %v1484_v24, %v628_v14  ;;  %v617_v45 = vmul.f32 %v1147_v18, %v1479_v22 }
  0xf3   : > { %1246 = vpow2.f32 %v1074_v12  ;;  %v1077_v21 = vmul.f32 -1.442695, %v1551_v16  ;;  %v1093_v23 = vmul.f32 -1.442695, %v1554_v17  ;;  %v505_v25 = vpop.f32.mrf.mxu0  ;;  %v569_v26 = vpop.f32.mrf.mxu1  ;;  %v633_v49 = vmul.f32 %v1163_v19, %v1479_v22 }
  0xf4   : > { %1248 = vpow2.f32 %v1090_v15  ;;  %v1075_v27 = vmul.f32 -1.442695, %v1557_v20  ;;  %v1091_v42 = vmul.f32 -1.442695, %v1563_v28  ;;  %v615_v53 = vmul.f32 %v1479_v22, %v505_v25 }
  0xf5   : > { %v1227_v29 = vpop.eup %1226  ;;  %1250 = vpow2.f32 %v1077_v21  ;;  %v1148_v32 = vpop.f32.mrf.mxu0  ;;  %v631_v58 = vmul.f32 %v1479_v22, %v569_v26  ;;  %v1571_v0 = vadd.f32 %v1484_v24, %v617_v45  ;;  %v1575_v4 = vadd.f32 %v1484_v24, %v633_v49 }
  0xf6   : > { %v1229_v33 = vpop.eup %1228  ;;  %v776_v34 = vadd.f32 1.0, %v1227_v29  ;;  %1252 = vpow2.f32 %v1093_v23  ;;  %v1164_v37 = vpop.f32.mrf.mxu1  ;;  %v618_v1 = vmul.f32 %v1148_v32, %v1479_v22  ;;  %v1579_v10 = vadd.f32 %v1484_v24, %v615_v53 }
  0xf7   : > { %v1231_v35 = vpop.eup %1230  ;;  %v792_v36 = vadd.f32 1.0, %v1229_v33  ;;  %1254 = vpow2.f32 %v1075_v27  ;;  %v508_v43 = vpop.f32.mrf.mxu0  ;;  %v634_v5 = vmul.f32 %v1164_v37, %v1479_v22  ;;  %v1582_v14 = vadd.f32 %v1484_v24, %v631_v58 }
  0xf8   : > { %v1233_v40 = vpop.eup %1232  ;;  %1256 = vrcp.f32 %v776_v34  ;;  %v774_v41 = vadd.f32 1.0, %v1231_v35  ;;  %v572_v54 = vpop.f32.mrf.mxu1  ;;  %v616_v15 = vmul.f32 %v1479_v22, %v508_v43  ;;  %v1080_v23 = vmul.f32 -1.442695, %v1571_v0 }
  0xf9   : > { %1258 = vrcp.f32 %v792_v36  ;;  %v790_v44 = vadd.f32 1.0, %v1233_v40  ;;  %v1151_v59 = vpop.f32.mrf.mxu0  ;;  %v1587_v25 = vadd.f32 %v1484_v24, %v618_v1  ;;  %v1096_v29 = vmul.f32 -1.442695, %v1575_v4 }
  0xfa   : > { %v1235_v46 = vpop.eup %1234  ;;  %1260 = vrcp.f32 %v774_v41  ;;  %v1167_v11 = vpop.f32.mrf.mxu1  ;;  %v1592_v32 = vadd.f32 %v1484_v24, %v634_v5  ;;  %v1078_v35 = vmul.f32 -1.442695, %v1579_v10  ;;  %v632_v36 = vmul.f32 %v1479_v22, %v572_v54 }
  0xfb   : > { %v1237_v50 = vpop.eup %1236  ;;  %1262 = vrcp.f32 %v790_v44  ;;  %v777_v51 = vadd.f32 1.0, %v1235_v46  ;;  %v521_v18 = vpop.f32.mrf.mxu0  ;;  %v1598_v43 = vadd.f32 %v1484_v24, %v616_v15  ;;  %v1081_v49 = vmul.f32 -1.442695, %v1587_v25 }
  0xfc   : > { %v1239_v55 = vpop.eup %1238  ;;  %v793_v56 = vadd.f32 1.0, %v1237_v50  ;;  %1264 = vpow2.f32 %v1091_v42  ;;  %v585_v37 = vpop.f32.mrf.mxu1  ;;  %v1094_v42 = vmul.f32 -1.442695, %v1582_v14  ;;  %v621_v50 = vmul.f32 %v1151_v59, %v1479_v22 }
  0xfd   : > { %v1241_v60 = vpop.eup %1240  ;;  %1266 = vrcp.f32 %v777_v51  ;;  %v775_v63 = vadd.f32 1.0, %v1239_v55  ;;  %v1152_v44 = vpop.f32.mrf.mxu0  ;;  %v1097_v54 = vmul.f32 -1.442695, %v1592_v32  ;;  %v637_v55 = vmul.f32 %v1167_v11, %v1479_v22 }
  0xfe   : > { %v1243_v2 = vpop.eup %1242  ;;  %1268 = vrcp.f32 %v793_v56  ;;  %v791_v3 = vadd.f32 1.0, %v1241_v60  ;;  %v1612_v60 = vadd.f32 %v1484_v24, %v632_v36  ;;  %v1168_v59 = vpop.f32.mrf.mxu1  ;;  %v622_v11 = vmul.f32 %v1152_v44, %v1479_v22 }
  0xff   : > { %v1245_v8 = vpop.eup %1244  ;;  %1270 = vrcp.f32 %v775_v63  ;;  %v780_v9 = vadd.f32 1.0, %v1243_v2  ;;  %v619_v63 = vmul.f32 %v1479_v22, %v521_v18  ;;  %v1079_v2 = vmul.f32 -1.442695, %v1598_v43 }
 0x100   : > { %v1247_v12 = vpop.eup %1246  ;;  %1272 = vrcp.f32 %v791_v3  ;;  %v796_v13 = vadd.f32 1.0, %v1245_v8  ;;  %v635_v3 = vmul.f32 %v1479_v22, %v585_v37  ;;  %v638_v15 = vmul.f32 %v1168_v59, %v1479_v22 }
 0x101   : > { %v1249_v19 = vpop.eup %1248  ;;  %1274 = vrcp.f32 %v780_v9  ;;  %v778_v21 = vadd.f32 1.0, %v1247_v12  ;;  %v1624_v9 = vadd.f32 %v1484_v24, %v621_v50 }
 0x102   : > { %v1251_v26 = vpop.eup %1250  ;;  %1276 = vrcp.f32 %v796_v13  ;;  %v794_v27 = vadd.f32 1.0, %v1249_v19  ;;  %v1630_v13 = vadd.f32 %v1484_v24, %v637_v55  ;;  %v1637_v19 = vadd.f32 %v1484_v24, %v619_v63 }
 0x103   : > { %v1253_v33 = vpop.eup %1252  ;;  %1278 = vrcp.f32 %v778_v21  ;;  %v781_v34 = vadd.f32 1.0, %v1251_v26 }
 0x104   : > { %v1255_v40 = vpop.eup %1254  ;;  %1280 = vrcp.f32 %v794_v27  ;;  %v797_v41 = vadd.f32 1.0, %v1253_v33  ;;  %v1095_v27 = vmul.f32 -1.442695, %v1612_v60  ;;  %v1082_v44 = vmul.f32 -1.442695, %v1637_v19 }
 0x105   : > { %v1257_v45 = vpop.eup %1256  ;;  %1282 = vrcp.f32 %v781_v34  ;;  %v779_v46 = vadd.f32 1.0, %v1255_v40  ;;  %v1084_v34 = vmul.f32 -1.442695, %v1624_v9  ;;  %v1100_v40 = vmul.f32 -1.442695, %v1630_v13 }
 0x106   : > { %v1259_v51 = vpop.eup %1258  ;;  %v872_v53 = vmul.f32 %v1257_v45, %v1489_v30  ;;  %1284 = vrcp.f32 %v797_v41  ;;  %v1657_v41 = vadd.f32 %v1484_v24, %v638_v15 }
 0x107   : > { %v1261_v56 = vpop.eup %1260  ;;  %v888_v58 = vmul.f32 %v1259_v51, %v1492_v31  ;;  %1286 = vrcp.f32 %v779_v46  ;;  %v524_v31 = vpop.f32.mrf.mxu0 }
 0x108   : > { %v1263_v1 = vpop.eup %1262  ;;  %905 = vst.msk [vmem:[%s1603_s14 + $0x10] sm:$0xff] %vm902_vm2, %v872_v53  ;;  %v870_v30 = vmul.f32 %v1261_v56, %v1499_v38  ;;  %1288 = vpow2.f32 %v1080_v23  ;;  %v620_v21 = vmul.f32 %v1479_v22, %v524_v31  ;;  %v1101_v55 = vmul.f32 -1.442695, %v1657_v41 }
 0x109   : > { %v1265_v5 = vpop.eup %1264  ;;  %921 = vst.msk [vmem:[%s1603_s14 + $0x90] sm:$0xff] %vm902_vm2, %v888_v58  ;;  %v886_v8 = vmul.f32 %v1263_v1, %v1502_v39  ;;  %1290 = vpow2.f32 %v1096_v29  ;;  %v1643_v29 = vadd.f32 %v1484_v24, %v635_v3 }
 0x10a   : > { %v1267_v12 = vpop.eup %1266  ;;  %903 = vst.msk [vmem:[%s1603_s14] sm:$0xff] %vm902_vm2, %v870_v30  ;;  %v795_v38 = vadd.f32 1.0, %v1265_v5  ;;  %1292 = vpow2.f32 %v1078_v35  ;;  %v1650_v35 = vadd.f32 %v1484_v24, %v622_v11  ;;  %v1664_v45 = vadd.f32 %v1484_v24, %v620_v21 }
 0x10b   : > { %v1269_v18 = vpop.eup %1268  ;;  %919 = vst.msk [vmem:[%s1603_s14 + $0x80] sm:$0xff] %vm902_vm2, %v886_v8  ;;  %v873_v39 = vmul.f32 %v1267_v12, %v1510_v47  ;;  %1294 = vpow2.f32 %v1094_v42 }
 0x10c   : > { %v1271_v23 = vpop.eup %1270  ;;  %v889_v26 = vmul.f32 %v1269_v18, %v1513_v48  ;;  %1296 = vrcp.f32 %v795_v38  ;;  %v588_v48 = vpop.f32.mrf.mxu1  ;;  %v1085_v53 = vmul.f32 -1.442695, %v1650_v35 }
 0x10d   : > { %v1273_v33 = vpop.eup %1272  ;;  %906 = vst.msk [vmem:[%s1603_s14 + $0x18] sm:$0xff] %vm902_vm2, %v873_v39  ;;  %v871_v47 = vmul.f32 %v1271_v23, %v1517_v52  ;;  %1298 = vpow2.f32 %v1081_v49  ;;  %v1098_v49 = vmul.f32 -1.442695, %v1643_v29  ;;  %v636_v50 = vmul.f32 %v1479_v22, %v588_v48 }
 0x10e   : > { %v1275_v36 = vpop.eup %1274  ;;  %922 = vst.msk [vmem:[%s1603_s14 + $0x98] sm:$0xff] %vm902_vm2, %v889_v26  ;;  %v887_v37 = vmul.f32 %v1273_v33, %v1524_v57  ;;  %1300 = vpow2.f32 %v1097_v54 }
 0x10f   : > { %v1277_v52 = vpop.eup %1276  ;;  %904 = vst.msk [vmem:[%s1603_s14 + $0x8] sm:$0xff] %vm902_vm2, %v871_v47  ;;  %v876_v42 = vmul.f32 %v1275_v36, %v1528_v61  ;;  %1302 = vpow2.f32 %v1079_v2 }
 0x110   : > { %v1279_v57 = vpop.eup %1278  ;;  %920 = vst.msk [vmem:[%s1603_s14 + $0x88] sm:$0xff] %vm902_vm2, %v887_v37  ;;  %v892_v46 = vmul.f32 %v1277_v52, %v1531_v62  ;;  %1304 = vpow2.f32 %v1095_v27 }
 0x111   : > { %v1281_v51 = vpop.eup %1280  ;;  %909 = vst.msk [vmem:[%s1603_s14 + $0x30] sm:$0xff] %vm902_vm2, %v876_v42  ;;  %v874_v61 = vmul.f32 %v1279_v57, %v1539_v6  ;;  %1306 = vpow2.f32 %v1084_v34  ;;  %v1083_v6 = vmul.f32 -1.442695, %v1664_v45 }
 0x112   : > { %v1283_v54 = vpop.eup %1282  ;;  %925 = vst.msk [vmem:[%s1603_s14 + $0xb0] sm:$0xff] %vm902_vm2, %v892_v46  ;;  %v890_v62 = vmul.f32 %v1281_v51, %v1542_v7  ;;  %1308 = vpow2.f32 %v1100_v40  ;;  %v1687_v7 = vadd.f32 %v1484_v24, %v636_v50 }
 0x113   : > { %v1285_v22 = vpop.eup %1284  ;;  %907 = vst.msk [vmem:[%s1603_s14 + $0x20] sm:$0xff] %vm902_vm2, %v874_v61  ;;  %v877_v56 = vmul.f32 %v1283_v54, %v1551_v16  ;;  %1310 = vpow2.f32 %v1082_v44 }
 0x114   : > { %v1287_v58 = vpop.eup %1286  ;;  %923 = vst.msk [vmem:[%s1603_s14 + $0xa0] sm:$0xff] %vm902_vm2, %v890_v62  ;;  %v893_v63 = vmul.f32 %v1285_v22, %v1554_v17  ;;  %1312 = vpow2.f32 %v1098_v49  ;;  %v1099_v31 = vmul.f32 -1.442695, %v1687_v7 }
 0x115   : > { %v1289_v59 = vpop.eup %1288  ;;  %910 = vst.msk [vmem:[%s1603_s14 + $0x38] sm:$0xff] %vm902_vm2, %v877_v56  ;;  %v875_v1 = vmul.f32 %v1287_v58, %v1557_v20  ;;  %1314 = vpow2.f32 %v1085_v53 }
 0x116   : > { %v1291_v16 = vpop.eup %1290  ;;  %926 = vst.msk [vmem:[%s1603_s14 + $0xb8] sm:$0xff] %vm902_vm2, %v893_v63  ;;  %v784_v30 = vadd.f32 1.0, %v1289_v59  ;;  %1316 = vpow2.f32 %v1101_v55 }
 0x117   : > { %v1293_v2 = vpop.eup %1292  ;;  %908 = vst.msk [vmem:[%s1603_s14 + $0x28] sm:$0xff] %vm902_vm2, %v875_v1  ;;  %v800_v3 = vadd.f32 1.0, %v1291_v16  ;;  %1318 = vpow2.f32 %v1083_v6 }
 0x118   : > { %v1295_v17 = vpop.eup %1294  ;;  %1320 = vrcp.f32 %v784_v30  ;;  %v782_v24 = vadd.f32 1.0, %v1293_v2 }
 0x119   : > { %v1297_v5 = vpop.eup %1296  ;;  %1322 = vrcp.f32 %v800_v3  ;;  %v798_v20 = vadd.f32 1.0, %v1295_v17 }
 0x11a   : > { %v1299_v8 = vpop.eup %1298  ;;  %v891_v11 = vmul.f32 %v1297_v5, %v1563_v28  ;;  %1324 = vrcp.f32 %v782_v24 }
 0x11b   : > { %v1301_v12 = vpop.eup %1300  ;;  %1326 = vrcp.f32 %v798_v20  ;;  %v785_v38 = vadd.f32 1.0, %v1299_v8 }
 0x11c   : > { %v1303_v15 = vpop.eup %1302  ;;  %924 = vst.msk [vmem:[%s1603_s14 + $0xa8] sm:$0xff] %vm902_vm2, %v891_v11  ;;  %v801_v18 = vadd.f32 1.0, %v1301_v12  ;;  %1328 = vpow2.f32 %v1099_v31 }
 0x11d   : > { %v1305_v39 = vpop.eup %1304  ;;  %1330 = vrcp.f32 %v785_v38  ;;  %v783_v21 = vadd.f32 1.0, %v1303_v15 }
 0x11e   : > { %v1307_v23 = vpop.eup %1306  ;;  %1332 = vrcp.f32 %v801_v18  ;;  %v799_v26 = vadd.f32 1.0, %v1305_v39 }
 0x11f   : > { %v1309_v27 = vpop.eup %1308  ;;  %1334 = vrcp.f32 %v783_v21  ;;  %v788_v33 = vadd.f32 1.0, %v1307_v23 }
 0x120   : > { %v1311_v47 = vpop.eup %1310  ;;  %1336 = vrcp.f32 %v799_v26  ;;  %v804_v28 = vadd.f32 1.0, %v1309_v27 }
 0x121   : > { %v1313_v34 = vpop.eup %1312  ;;  %1338 = vrcp.f32 %v788_v33  ;;  %v786_v48 = vadd.f32 1.0, %v1311_v47 }
 0x122   : > { %v1315_v36 = vpop.eup %1314  ;;  %1340 = vrcp.f32 %v804_v28  ;;  %v802_v37 = vadd.f32 1.0, %v1313_v34 }
 0x123   : > { %v1317_v40 = vpop.eup %1316  ;;  %1342 = vrcp.f32 %v786_v48  ;;  %v789_v52 = vadd.f32 1.0, %v1315_v36 }
 0x124   : > { %v1319_v42 = vpop.eup %1318  ;;  %1344 = vrcp.f32 %v802_v37  ;;  %v805_v44 = vadd.f32 1.0, %v1317_v40 }
 0x125   : > { %v1321_v57 = vpop.eup %1320  ;;  %1346 = vrcp.f32 %v789_v52  ;;  %v787_v46 = vadd.f32 1.0, %v1319_v42 }
 0x126   : > { %v1323_v49 = vpop.eup %1322  ;;  %v880_v50 = vmul.f32 %v1321_v57, %v1571_v0  ;;  %1348 = vrcp.f32 %v805_v44 }
 0x127   : > { %v1325_v51 = vpop.eup %1324  ;;  %v896_v61 = vmul.f32 %v1323_v49, %v1575_v4  ;;  %1350 = vrcp.f32 %v787_v46 }
 0x128   : > { %v1327_v53 = vpop.eup %1326  ;;  %913 = vst.msk [vmem:[%s1603_s14 + $0x50] sm:$0xff] %vm902_vm2, %v880_v50  ;;  %v878_v54 = vmul.f32 %v1325_v51, %v1579_v10 }
 0x129   : > { %v1329_v62 = vpop.eup %1328  ;;  %929 = vst.msk [vmem:[%s1603_s14 + $0xd0] sm:$0xff] %vm902_vm2, %v896_v61  ;;  %v894_v55 = vmul.f32 %v1327_v53, %v1582_v14 }
 0x12a   : > { %v1331_v22 = vpop.eup %1330  ;;  %911 = vst.msk [vmem:[%s1603_s14 + $0x40] sm:$0xff] %vm902_vm2, %v878_v54  ;;  %v803_v0 = vadd.f32 1.0, %v1329_v62 }
 0x12b   : > { %v1333_v56 = vpop.eup %1332  ;;  %927 = vst.msk [vmem:[%s1603_s14 + $0xc0] sm:$0xff] %vm902_vm2, %v894_v55  ;;  %v881_v4 = vmul.f32 %v1331_v22, %v1587_v25 }
 0x12c   : > { %v1335_v6 = vpop.eup %1334  ;;  %v897_v10 = vmul.f32 %v1333_v56, %v1592_v32  ;;  %1352 = vrcp.f32 %v803_v0 }
 0x12d   : > { %v1337_v58 = vpop.eup %1336  ;;  %914 = vst.msk [vmem:[%s1603_s14 + $0x58] sm:$0xff] %vm902_vm2, %v881_v4  ;;  %v879_v14 = vmul.f32 %v1335_v6, %v1598_v43 }
 0x12e   : > { %v1339_v63 = vpop.eup %1338  ;;  %930 = vst.msk [vmem:[%s1603_s14 + $0xd8] sm:$0xff] %vm902_vm2, %v897_v10  ;;  %v895_v59 = vmul.f32 %v1337_v58, %v1612_v60 }
 0x12f   : > { %v1341_v1 = vpop.eup %1340  ;;  %912 = vst.msk [vmem:[%s1603_s14 + $0x48] sm:$0xff] %vm902_vm2, %v879_v14  ;;  %v884_v25 = vmul.f32 %v1339_v63, %v1624_v9 }
 0x130   : > { %v1343_v32 = vpop.eup %1342  ;;  %928 = vst.msk [vmem:[%s1603_s14 + $0xc8] sm:$0xff] %vm902_vm2, %v895_v59  ;;  %v900_v16 = vmul.f32 %v1341_v1, %v1630_v13 }
 0x131   : > { %v1345_v43 = vpop.eup %1344  ;;  %917 = vst.msk [vmem:[%s1603_s14 + $0x70] sm:$0xff] %vm902_vm2, %v884_v25  ;;  %v882_v30 = vmul.f32 %v1343_v32, %v1637_v19 }
 0x132   : > { %v1347_v60 = vpop.eup %1346  ;;  %933 = vst.msk [vmem:[%s1603_s14 + $0xf0] sm:$0xff] %vm902_vm2, %v900_v16  ;;  %v898_v2 = vmul.f32 %v1345_v43, %v1643_v29 }
 0x133   : > { %v1349_v9 = vpop.eup %1348  ;;  %915 = vst.msk [vmem:[%s1603_s14 + $0x60] sm:$0xff] %vm902_vm2, %v882_v30  ;;  %v885_v3 = vmul.f32 %v1347_v60, %v1650_v35 }
 0x134   : > { %v1351_v17 = vpop.eup %1350  ;;  %931 = vst.msk [vmem:[%s1603_s14 + $0xe0] sm:$0xff] %vm902_vm2, %v898_v2  ;;  %v901_v13 = vmul.f32 %v1349_v9, %v1657_v41 }
 0x135   : > { %918 = vst.msk [vmem:[%s1603_s14 + $0x78] sm:$0xff] %vm902_vm2, %v885_v3  ;;  %v883_v19 = vmul.f32 %v1351_v17, %v1664_v45 }
 0x136   : > { %934 = vst.msk [vmem:[%s1603_s14 + $0xf8] sm:$0xff] %vm902_vm2, %v901_v13 }
 0x137   : > { %916 = vst.msk [vmem:[%s1603_s14 + $0x68] sm:$0xff] %vm902_vm2, %v883_v19 }
 0x139   : > { %v1353_v24 = vpop.eup %1352 }
 0x13a   : > { %v899_v29 = vmul.f32 %v1353_v24, %v1687_v7 }
 0x13c   : > { %932 = vst.msk [vmem:[%s1603_s14 + $0xe8] sm:$0xff] %vm902_vm2, %v899_v29 }
 0x13d PF: > { %s14_s17 = sadd.s32 1, %s1376_s17   ;;  %s1762_s15 = smov %s1372_s16 }
 0x13e   : > { %p11_p5 = scmp.ge.s32.totalorder %s14_s17, 4   ;;  %s1763_s16 = smov %s1765_s18 }
 0x140   :  { %13 = sbr.rel (!%p11_p5) target bundleno = 2 (0x2), region = 66 }

// kernel: bottleneck_forward.4
= control target key start
LH: loop header
LB: loop body
LE: loop exit
PB: predicated region body
PF: predicated region fallthrough
CT: control target
= control target key end

     0   :  { %s1373_s15 = smov 0   ;;  %s1375_s16 = smov 0   ;;  %s1721_s0 = inlined_call_operand.vmem [shape: bf16[2,256,36], index: 0, kind: input, shape index: {}]   ;;  %s1722_s1 = inlined_call_operand.vmem [shape: bf16[36,8], index: 1, kind: input, shape index: {}]   ;;  %s1723_s2 = inlined_call_operand.vmem [shape: f32[1,8], index: 2, kind: input, shape index: {}]   ;;  %s1724_s3 = inlined_call_operand.vmem [shape: f32[1,8], index: 3, kind: input, shape index: {}]   ;;  %s1725_s4 = inlined_call_operand.vmem [shape: f32[2,256,8], index: 4, kind: output, shape index: {}]  }
   0x1   :  { %s1377_s17 = smov 0  }
   0x2 LB: > { %s26_s18 = sadd.s32 1, %s1342_s16  ;;  %p1010_p0 = scmp.ge.s32.totalorder %s1346_s17, 1  ;;  %s1346_s17 = sphi %s1377_s17, %s14_s17   ;;  %s1342_s16 = sphi %s1375_s16, %s1727_s16   ;;  %s1338_s15 = sphi %s1373_s15, %s1726_s15  }
   0x3   : > { %p28_p1 = scmp.ge.s32.totalorder %s26_s18, 2  ;;  %p183_p2 = scmp.lt.s32.totalorder %s1346_s17, 3 }
   0x5   : > { %s1729_s18 = smov (%p28_p1, %s26_s18), 0  ;;  %p184_p3 = pnand %p1010_p0, %p183_p2 }
   0x6   : > { %p218_p4 = scmp.lt.s32.totalorder (!%p184_p3), %s1338_s15, 1 }
   0x7   : > { %187 = sbr.rel (%p184_p3) target bundleno = 309 (0x135), region = 36 }
   0xc   : > { %v1177_v0 = vld [vmem:[%s1722_s1 + $0x10] ss:$0 sps:$4 sm:$0x33]   ;;  %vm419_vm0 = vcmask 1041408   ;;  %v1178_v1 = vld [vmem:[%s1722_s1 + $0x8] sm:$0xff]   ;;  %s1731_s15 = smov (!%p218_p4, %s1338_s15), 1 }
   0xd   : > { %1151 = vmatprep.subr.msk.bf16.mxu0 %vm419_vm0, %v1177_v0  ;;  %1152 = vmatprep.subr.msk.bf16.mxu1 %vm419_vm0, %v1177_v0  ;;  %v421_v2 = vsel %vm419_vm0, %v1177_v0, 0  ;;  %v1179_v3 = vld [vmem:[%s1722_s1] sm:$0xff]   ;;  %s1086_s25 = sshll.u32 %s1731_s15, 7  ;;  %vm370_vm1 = vcmask 293888   ;;  %vm886_vm2 = vcmask 64512   ;;  %s1087_s7 = sshll.u32 %s1731_s15, 8 }
   0xe   : > { %1108 = vmatpush3.bf16.msra.mxu0 %v421_v2  ;;  %1148 = vmatpush3.bf16.msra.mxu1 %v421_v2  ;;  %s1406_s28 = scalar_lea.vmem %s1721_s0, %s1086_s25  ;;  %v1443_v20 = vld [vmem:[%s1723_s2] ss:$0 sm:$0xff]  ;;  %s1567_s10 = scalar_lea.vmem %s1725_s4, %s1087_s7 }
   0xf   : > { %1109 = vmatprep.subr.bf16.mxu0 %v1178_v1  ;;  %1146 = vmatprep.subr.bf16.mxu1 %v1178_v1  ;;  %v1180_v4 = vld [vmem:[%s1406_s28] sm:$0xff]   ;;  %v1182_v6 = vld [vmem:[%s1406_s28 + $0x8] sm:$0xff]   ;;  %v1184_v8 = vld [vmem:[%s1406_s28 + $0x10] sm:$0xff]  }
  0x10   : > { %v1181_v5 = vld [vmem:[%s1406_s28 + $0x40] sm:$0xff]   ;;  %1113 = vmatprep.mubr.msk.bf16.mxu0 %vm370_vm1, %v1180_v4  ;;  %v1183_v7 = vld [vmem:[%s1406_s28 + $0x48] sm:$0xff]   ;;  %v1185_v9 = vld [vmem:[%s1406_s28 + $0x50] sm:$0xff]  }
  0x11   : > { %1129 = vmatprep.mubr.msk.bf16.mxu1 %vm370_vm1, %v1181_v5  ;;  %v1186_v10 = vld [vmem:[%s1406_s28 + $0x18] sm:$0xff]   ;;  %v1188_v12 = vld [vmem:[%s1406_s28 + $0x20] sm:$0xff]   ;;  %v1190_v14 = vld [vmem:[%s1406_s28 + $0x28] sm:$0xff]  }
  0x12   : > { %1110 = vmatpush3.bf16.msra.mxu0 %v1178_v1  ;;  %1149 = vmatpush3.bf16.msra.mxu1 %v1178_v1  ;;  %v1187_v11 = vld [vmem:[%s1406_s28 + $0x58] sm:$0xff]   ;;  %v1189_v13 = vld [vmem:[%s1406_s28 + $0x60] sm:$0xff]   ;;  %v1191_v15 = vld [vmem:[%s1406_s28 + $0x68] sm:$0xff]  }
  0x13   : > { %1111 = vmatprep.subr.bf16.mxu0 %v1179_v3  ;;  %1147 = vmatprep.subr.bf16.mxu1 %v1179_v3  ;;  %v1192_v16 = vld [vmem:[%s1406_s28 + $0x30] sm:$0xff]   ;;  %v1194_v18 = vld [vmem:[%s1406_s28 + $0x38] sm:$0xff]   ;;  %v1448_v22 = vld [vmem:[%s1724_s3] ss:$0 sm:$0xff] }
  0x14   : > { %v1193_v17 = vld [vmem:[%s1406_s28 + $0x70] sm:$0xff]   ;;  %v1195_v19 = vld [vmem:[%s1406_s28 + $0x78] sm:$0xff]  }
  0x16   : > { %1112 = vmatpush3.bf16.msra.mxu0 %v1179_v3  ;;  %1150 = vmatpush3.bf16.msra.mxu1 %v1179_v3 }
  0x19   : > { %1114 = vmatmul.mubr.msk.bf16.vlgmr.msra.gmra.mxu0 %vm370_vm1, %v1182_v6  ;;  %1130 = vmatmul.mubr.msk.bf16.vlgmr.msra.gmra.mxu1 %vm370_vm1, %v1183_v7 }
  0x1a   : > { %1117 = vmatprep.mubr.msk.bf16.mxu0 %vm370_vm1, %v1184_v8  ;;  %1133 = vmatprep.mubr.msk.bf16.mxu1 %vm370_vm1, %v1185_v9 }
  0x21   : > { %1118 = vmatmul.mubr.msk.bf16.gmra.mxu0 %vm370_vm1, %v1186_v10  ;;  %1134 = vmatmul.mubr.msk.bf16.gmra.mxu1 %vm370_vm1, %v1187_v11 }
  0x22   : > { %1121 = vmatprep.mubr.msk.bf16.mxu0 %vm370_vm1, %v1188_v12  ;;  %1137 = vmatprep.mubr.msk.bf16.mxu1 %vm370_vm1, %v1189_v13 }
  0x29   : > { %1122 = vmatmul.mubr.msk.bf16.gmra.mxu0 %vm370_vm1, %v1190_v14  ;;  %1138 = vmatmul.mubr.msk.bf16.gmra.mxu1 %vm370_vm1, %v1191_v15 }
  0x2a   : > { %1125 = vmatprep.mubr.msk.bf16.mxu0 %vm370_vm1, %v1192_v16  ;;  %1141 = vmatprep.mubr.msk.bf16.mxu1 %vm370_vm1, %v1193_v17 }
  0x31   : > { %1126 = vmatmul.mubr.msk.bf16.gmra.mxu0 %vm370_vm1, %v1194_v18  ;;  %1142 = vmatmul.mubr.msk.bf16.gmra.mxu1 %vm370_vm1, %v1195_v19 }
  0xd9   : > { %v1115_v21 = vpop.f32.mrf.mxu0  ;;  %v1131_v23 = vpop.f32.mrf.mxu1 }
  0xda   : > { %v593_v24 = vmul.f32 %v1115_v21, %v1443_v20  ;;  %v609_v25 = vmul.f32 %v1131_v23, %v1443_v20 }
  0xdb   : > { %v457_v26 = vpop.f32.mrf.mxu0  ;;  %v521_v27 = vpop.f32.mrf.mxu1 }
  0xdc   : > { %v1453_v28 = vadd.f32 %v1448_v22, %v593_v24  ;;  %v1456_v29 = vadd.f32 %v1448_v22, %v609_v25  ;;  %v591_v30 = vmul.f32 %v1443_v20, %v457_v26  ;;  %v607_v31 = vmul.f32 %v1443_v20, %v521_v27 }
  0xdd   : > { %v1116_v32 = vpop.f32.mrf.mxu0  ;;  %v1132_v33 = vpop.f32.mrf.mxu1 }
  0xde   : > { %v1054_v34 = vmul.f32 -1.442695, %v1453_v28  ;;  %v1070_v35 = vmul.f32 -1.442695, %v1456_v29  ;;  %v1463_v36 = vadd.f32 %v1448_v22, %v591_v30  ;;  %v1466_v37 = vadd.f32 %v1448_v22, %v607_v31 }
  0xdf   : > { %v594_v38 = vmul.f32 %v1116_v32, %v1443_v20  ;;  %v610_v39 = vmul.f32 %v1132_v33, %v1443_v20  ;;  %v460_v40 = vpop.f32.mrf.mxu0  ;;  %v524_v41 = vpop.f32.mrf.mxu1 }
  0xe0   : > { %1196 = vpow2.f32 %v1054_v34  ;;  %v1052_v42 = vmul.f32 -1.442695, %v1463_v36  ;;  %v1068_v43 = vmul.f32 -1.442695, %v1466_v37  ;;  %v592_v44 = vmul.f32 %v1443_v20, %v460_v40 }
  0xe1   : > { %1198 = vpow2.f32 %v1070_v35  ;;  %v1474_v45 = vadd.f32 %v1448_v22, %v594_v38  ;;  %v1477_v46 = vadd.f32 %v1448_v22, %v610_v39  ;;  %v608_v47 = vmul.f32 %v1443_v20, %v524_v41  ;;  %v1119_v48 = vpop.f32.mrf.mxu0  ;;  %v1135_v49 = vpop.f32.mrf.mxu1 }
  0xe2   : > { %1200 = vpow2.f32 %v1052_v42  ;;  %v1481_v50 = vadd.f32 %v1448_v22, %v592_v44  ;;  %v597_v51 = vmul.f32 %v1119_v48, %v1443_v20  ;;  %v613_v52 = vmul.f32 %v1135_v49, %v1443_v20 }
  0xe3   : > { %1202 = vpow2.f32 %v1068_v43  ;;  %v1055_v53 = vmul.f32 -1.442695, %v1474_v45  ;;  %v1071_v54 = vmul.f32 -1.442695, %v1477_v46  ;;  %v1488_v55 = vadd.f32 %v1448_v22, %v608_v47  ;;  %v473_v56 = vpop.f32.mrf.mxu0  ;;  %v537_v57 = vpop.f32.mrf.mxu1 }
  0xe4   : > { %v1053_v58 = vmul.f32 -1.442695, %v1481_v50  ;;  %v1492_v59 = vadd.f32 %v1448_v22, %v597_v51  ;;  %v1495_v60 = vadd.f32 %v1448_v22, %v613_v52  ;;  %v595_v61 = vmul.f32 %v1443_v20, %v473_v56 }
  0xe5   : > { %1204 = vpow2.f32 %v1055_v53  ;;  %v1069_v62 = vmul.f32 -1.442695, %v1488_v55  ;;  %v611_v63 = vmul.f32 %v1443_v20, %v537_v57  ;;  %v1120_v0 = vpop.f32.mrf.mxu0  ;;  %v1136_v1 = vpop.f32.mrf.mxu1 }
  0xe6   : > { %1206 = vpow2.f32 %v1071_v54  ;;  %v1058_v2 = vmul.f32 -1.442695, %v1492_v59  ;;  %v1074_v3 = vmul.f32 -1.442695, %v1495_v60  ;;  %v1503_v4 = vadd.f32 %v1448_v22, %v595_v61 }
  0xe7   : > { %1208 = vpow2.f32 %v1053_v58  ;;  %v1506_v5 = vadd.f32 %v1448_v22, %v611_v63  ;;  %v598_v6 = vmul.f32 %v1120_v0, %v1443_v20  ;;  %v614_v7 = vmul.f32 %v1136_v1, %v1443_v20  ;;  %v476_v8 = vpop.f32.mrf.mxu0  ;;  %v540_v9 = vpop.f32.mrf.mxu1 }
  0xe8   : > { %1210 = vpow2.f32 %v1069_v62  ;;  %v1056_v10 = vmul.f32 -1.442695, %v1503_v4  ;;  %v596_v11 = vmul.f32 %v1443_v20, %v476_v8  ;;  %v612_v12 = vmul.f32 %v1443_v20, %v540_v9 }
  0xe9   : > { %1212 = vpow2.f32 %v1058_v2  ;;  %v1072_v13 = vmul.f32 -1.442695, %v1506_v5  ;;  %v1515_v14 = vadd.f32 %v1448_v22, %v598_v6  ;;  %v1518_v15 = vadd.f32 %v1448_v22, %v614_v7  ;;  %v1123_v16 = vpop.f32.mrf.mxu0  ;;  %v1139_v17 = vpop.f32.mrf.mxu1 }
  0xea   : > { %1214 = vpow2.f32 %v1074_v3  ;;  %v1521_v18 = vadd.f32 %v1448_v22, %v596_v11  ;;  %v1527_v26 = vadd.f32 %v1448_v22, %v612_v12  ;;  %v601_v43 = vmul.f32 %v1123_v16, %v1443_v20 }
  0xeb   : > { %1216 = vpow2.f32 %v1056_v10  ;;  %v1059_v19 = vmul.f32 -1.442695, %v1515_v14  ;;  %v1075_v21 = vmul.f32 -1.442695, %v1518_v15  ;;  %v489_v23 = vpop.f32.mrf.mxu0  ;;  %v553_v24 = vpop.f32.mrf.mxu1  ;;  %v617_v47 = vmul.f32 %v1139_v17, %v1443_v20 }
  0xec   : > { %1218 = vpow2.f32 %v1072_v13  ;;  %v1057_v25 = vmul.f32 -1.442695, %v1521_v18  ;;  %v1073_v40 = vmul.f32 -1.442695, %v1527_v26  ;;  %v599_v51 = vmul.f32 %v1443_v20, %v489_v23 }
  0xed   : > { %v1197_v27 = vpop.eup %1196  ;;  %1220 = vpow2.f32 %v1059_v19  ;;  %v1124_v30 = vpop.f32.mrf.mxu0  ;;  %v615_v56 = vmul.f32 %v1443_v20, %v553_v24  ;;  %v1535_v62 = vadd.f32 %v1448_v22, %v601_v43  ;;  %v1539_v2 = vadd.f32 %v1448_v22, %v617_v47 }
  0xee   : > { %v1199_v31 = vpop.eup %1198  ;;  %v760_v32 = vadd.f32 1.0, %v1197_v27  ;;  %1222 = vpow2.f32 %v1075_v21  ;;  %v1140_v35 = vpop.f32.mrf.mxu1  ;;  %v602_v63 = vmul.f32 %v1124_v30, %v1443_v20  ;;  %v1543_v8 = vadd.f32 %v1448_v22, %v599_v51 }
  0xef   : > { %v1201_v33 = vpop.eup %1200  ;;  %v776_v34 = vadd.f32 1.0, %v1199_v31  ;;  %1224 = vpow2.f32 %v1057_v25  ;;  %v492_v41 = vpop.f32.mrf.mxu0  ;;  %v618_v3 = vmul.f32 %v1140_v35, %v1443_v20  ;;  %v1546_v12 = vadd.f32 %v1448_v22, %v615_v56 }
  0xf0   : > { %v1203_v38 = vpop.eup %1202  ;;  %1226 = vrcp.f32 %v760_v32  ;;  %v758_v39 = vadd.f32 1.0, %v1201_v33  ;;  %v556_v52 = vpop.f32.mrf.mxu1  ;;  %v600_v13 = vmul.f32 %v1443_v20, %v492_v41  ;;  %v1062_v21 = vmul.f32 -1.442695, %v1535_v62 }
  0xf1   : > { %1228 = vrcp.f32 %v776_v34  ;;  %v774_v42 = vadd.f32 1.0, %v1203_v38  ;;  %v1127_v57 = vpop.f32.mrf.mxu0  ;;  %v1551_v23 = vadd.f32 %v1448_v22, %v602_v63  ;;  %v1078_v27 = vmul.f32 -1.442695, %v1539_v2 }
  0xf2   : > { %v1205_v44 = vpop.eup %1204  ;;  %1230 = vrcp.f32 %v758_v39  ;;  %v1143_v9 = vpop.f32.mrf.mxu1  ;;  %v1556_v30 = vadd.f32 %v1448_v22, %v618_v3  ;;  %v1060_v33 = vmul.f32 -1.442695, %v1543_v8  ;;  %v616_v34 = vmul.f32 %v1443_v20, %v556_v52 }
  0xf3   : > { %v1207_v48 = vpop.eup %1206  ;;  %1232 = vrcp.f32 %v774_v42  ;;  %v761_v49 = vadd.f32 1.0, %v1205_v44  ;;  %v505_v16 = vpop.f32.mrf.mxu0  ;;  %v1562_v41 = vadd.f32 %v1448_v22, %v600_v13  ;;  %v1063_v47 = vmul.f32 -1.442695, %v1551_v23 }
  0xf4   : > { %v1209_v53 = vpop.eup %1208  ;;  %v777_v54 = vadd.f32 1.0, %v1207_v48  ;;  %1234 = vpow2.f32 %v1073_v40  ;;  %v569_v35 = vpop.f32.mrf.mxu1  ;;  %v1076_v40 = vmul.f32 -1.442695, %v1546_v12  ;;  %v605_v48 = vmul.f32 %v1127_v57, %v1443_v20 }
  0xf5   : > { %v1211_v58 = vpop.eup %1210  ;;  %1236 = vrcp.f32 %v761_v49  ;;  %v759_v61 = vadd.f32 1.0, %v1209_v53  ;;  %v1128_v42 = vpop.f32.mrf.mxu0  ;;  %v1079_v52 = vmul.f32 -1.442695, %v1556_v30  ;;  %v621_v53 = vmul.f32 %v1143_v9, %v1443_v20 }
  0xf6   : > { %v1213_v0 = vpop.eup %1212  ;;  %1238 = vrcp.f32 %v777_v54  ;;  %v775_v1 = vadd.f32 1.0, %v1211_v58  ;;  %v1576_v58 = vadd.f32 %v1448_v22, %v616_v34  ;;  %v1144_v57 = vpop.f32.mrf.mxu1  ;;  %v606_v9 = vmul.f32 %v1128_v42, %v1443_v20 }
  0xf7   : > { %v1215_v6 = vpop.eup %1214  ;;  %1240 = vrcp.f32 %v759_v61  ;;  %v764_v7 = vadd.f32 1.0, %v1213_v0  ;;  %v603_v61 = vmul.f32 %v1443_v20, %v505_v16  ;;  %v1061_v0 = vmul.f32 -1.442695, %v1562_v41 }
  0xf8   : > { %v1217_v10 = vpop.eup %1216  ;;  %1242 = vrcp.f32 %v775_v1  ;;  %v780_v11 = vadd.f32 1.0, %v1215_v6  ;;  %v619_v1 = vmul.f32 %v1443_v20, %v569_v35  ;;  %v622_v13 = vmul.f32 %v1144_v57, %v1443_v20 }
  0xf9   : > { %v1219_v17 = vpop.eup %1218  ;;  %1244 = vrcp.f32 %v764_v7  ;;  %v762_v19 = vadd.f32 1.0, %v1217_v10  ;;  %v1588_v7 = vadd.f32 %v1448_v22, %v605_v48 }
  0xfa   : > { %v1221_v24 = vpop.eup %1220  ;;  %1246 = vrcp.f32 %v780_v11  ;;  %v778_v25 = vadd.f32 1.0, %v1219_v17  ;;  %v1594_v11 = vadd.f32 %v1448_v22, %v621_v53  ;;  %v1601_v17 = vadd.f32 %v1448_v22, %v603_v61 }
  0xfb   : > { %v1223_v31 = vpop.eup %1222  ;;  %1248 = vrcp.f32 %v762_v19  ;;  %v765_v32 = vadd.f32 1.0, %v1221_v24 }
  0xfc   : > { %v1225_v38 = vpop.eup %1224  ;;  %1250 = vrcp.f32 %v778_v25  ;;  %v781_v39 = vadd.f32 1.0, %v1223_v31  ;;  %v1077_v25 = vmul.f32 -1.442695, %v1576_v58  ;;  %v1064_v42 = vmul.f32 -1.442695, %v1601_v17 }
  0xfd   : > { %v1227_v43 = vpop.eup %1226  ;;  %1252 = vrcp.f32 %v765_v32  ;;  %v763_v44 = vadd.f32 1.0, %v1225_v38  ;;  %v1066_v32 = vmul.f32 -1.442695, %v1588_v7  ;;  %v1082_v38 = vmul.f32 -1.442695, %v1594_v11 }
  0xfe   : > { %v1229_v49 = vpop.eup %1228  ;;  %v856_v51 = vmul.f32 %v1227_v43, %v1453_v28  ;;  %1254 = vrcp.f32 %v781_v39  ;;  %v1621_v39 = vadd.f32 %v1448_v22, %v622_v13 }
  0xff   : > { %v1231_v54 = vpop.eup %1230  ;;  %v872_v56 = vmul.f32 %v1229_v49, %v1456_v29  ;;  %1256 = vrcp.f32 %v763_v44  ;;  %v508_v29 = vpop.f32.mrf.mxu0 }
 0x100   : > { %v1233_v63 = vpop.eup %1232  ;;  %889 = vst.msk [vmem:[%s1567_s10 + $0x10] sm:$0xff] %vm886_vm2, %v856_v51  ;;  %v854_v28 = vmul.f32 %v1231_v54, %v1463_v36  ;;  %1258 = vpow2.f32 %v1062_v21  ;;  %v604_v19 = vmul.f32 %v1443_v20, %v508_v29  ;;  %v1083_v53 = vmul.f32 -1.442695, %v1621_v39 }
 0x101   : > { %v1235_v3 = vpop.eup %1234  ;;  %905 = vst.msk [vmem:[%s1567_s10 + $0x90] sm:$0xff] %vm886_vm2, %v872_v56  ;;  %v870_v6 = vmul.f32 %v1233_v63, %v1466_v37  ;;  %1260 = vpow2.f32 %v1078_v27  ;;  %v1607_v27 = vadd.f32 %v1448_v22, %v619_v1 }
 0x102   : > { %v1237_v10 = vpop.eup %1236  ;;  %887 = vst.msk [vmem:[%s1567_s10] sm:$0xff] %vm886_vm2, %v854_v28  ;;  %v779_v36 = vadd.f32 1.0, %v1235_v3  ;;  %1262 = vpow2.f32 %v1060_v33  ;;  %v1614_v33 = vadd.f32 %v1448_v22, %v606_v9  ;;  %v1628_v43 = vadd.f32 %v1448_v22, %v604_v19 }
 0x103   : > { %v1239_v16 = vpop.eup %1238  ;;  %903 = vst.msk [vmem:[%s1567_s10 + $0x80] sm:$0xff] %vm886_vm2, %v870_v6  ;;  %v857_v37 = vmul.f32 %v1237_v10, %v1474_v45  ;;  %1264 = vpow2.f32 %v1076_v40 }
 0x104   : > { %v1241_v21 = vpop.eup %1240  ;;  %v873_v24 = vmul.f32 %v1239_v16, %v1477_v46  ;;  %1266 = vrcp.f32 %v779_v36  ;;  %v572_v46 = vpop.f32.mrf.mxu1  ;;  %v1067_v51 = vmul.f32 -1.442695, %v1614_v33 }
 0x105   : > { %v1243_v31 = vpop.eup %1242  ;;  %890 = vst.msk [vmem:[%s1567_s10 + $0x18] sm:$0xff] %vm886_vm2, %v857_v37  ;;  %v855_v45 = vmul.f32 %v1241_v21, %v1481_v50  ;;  %1268 = vpow2.f32 %v1063_v47  ;;  %v1080_v47 = vmul.f32 -1.442695, %v1607_v27  ;;  %v620_v48 = vmul.f32 %v1443_v20, %v572_v46 }
 0x106   : > { %v1245_v34 = vpop.eup %1244  ;;  %906 = vst.msk [vmem:[%s1567_s10 + $0x98] sm:$0xff] %vm886_vm2, %v873_v24  ;;  %v871_v35 = vmul.f32 %v1243_v31, %v1488_v55  ;;  %1270 = vpow2.f32 %v1079_v52 }
 0x107   : > { %v1247_v50 = vpop.eup %1246  ;;  %888 = vst.msk [vmem:[%s1567_s10 + $0x8] sm:$0xff] %vm886_vm2, %v855_v45  ;;  %v860_v40 = vmul.f32 %v1245_v34, %v1492_v59  ;;  %1272 = vpow2.f32 %v1061_v0 }
 0x108   : > { %v1249_v55 = vpop.eup %1248  ;;  %904 = vst.msk [vmem:[%s1567_s10 + $0x88] sm:$0xff] %vm886_vm2, %v871_v35  ;;  %v876_v44 = vmul.f32 %v1247_v50, %v1495_v60  ;;  %1274 = vpow2.f32 %v1077_v25 }
 0x109   : > { %v1251_v49 = vpop.eup %1250  ;;  %893 = vst.msk [vmem:[%s1567_s10 + $0x30] sm:$0xff] %vm886_vm2, %v860_v40  ;;  %v858_v59 = vmul.f32 %v1249_v55, %v1503_v4  ;;  %1276 = vpow2.f32 %v1066_v32  ;;  %v1065_v4 = vmul.f32 -1.442695, %v1628_v43 }
 0x10a   : > { %v1253_v52 = vpop.eup %1252  ;;  %909 = vst.msk [vmem:[%s1567_s10 + $0xb0] sm:$0xff] %vm886_vm2, %v876_v44  ;;  %v874_v60 = vmul.f32 %v1251_v49, %v1506_v5  ;;  %1278 = vpow2.f32 %v1082_v38  ;;  %v1651_v5 = vadd.f32 %v1448_v22, %v620_v48 }
 0x10b   : > { %v1255_v20 = vpop.eup %1254  ;;  %891 = vst.msk [vmem:[%s1567_s10 + $0x20] sm:$0xff] %vm886_vm2, %v858_v59  ;;  %v861_v54 = vmul.f32 %v1253_v52, %v1515_v14  ;;  %1280 = vpow2.f32 %v1064_v42 }
 0x10c   : > { %v1257_v56 = vpop.eup %1256  ;;  %907 = vst.msk [vmem:[%s1567_s10 + $0xa0] sm:$0xff] %vm886_vm2, %v874_v60  ;;  %v877_v61 = vmul.f32 %v1255_v20, %v1518_v15  ;;  %1282 = vpow2.f32 %v1080_v47  ;;  %v1081_v29 = vmul.f32 -1.442695, %v1651_v5 }
 0x10d   : > { %v1259_v57 = vpop.eup %1258  ;;  %894 = vst.msk [vmem:[%s1567_s10 + $0x38] sm:$0xff] %vm886_vm2, %v861_v54  ;;  %v859_v63 = vmul.f32 %v1257_v56, %v1521_v18  ;;  %1284 = vpow2.f32 %v1067_v51 }
 0x10e   : > { %v1261_v14 = vpop.eup %1260  ;;  %910 = vst.msk [vmem:[%s1567_s10 + $0xb8] sm:$0xff] %vm886_vm2, %v877_v61  ;;  %v768_v28 = vadd.f32 1.0, %v1259_v57  ;;  %1286 = vpow2.f32 %v1083_v53 }
 0x10f   : > { %v1263_v0 = vpop.eup %1262  ;;  %892 = vst.msk [vmem:[%s1567_s10 + $0x28] sm:$0xff] %vm886_vm2, %v859_v63  ;;  %v784_v1 = vadd.f32 1.0, %v1261_v14  ;;  %1288 = vpow2.f32 %v1065_v4 }
 0x110   : > { %v1265_v15 = vpop.eup %1264  ;;  %1290 = vrcp.f32 %v768_v28  ;;  %v766_v22 = vadd.f32 1.0, %v1263_v0 }
 0x111   : > { %v1267_v3 = vpop.eup %1266  ;;  %1292 = vrcp.f32 %v784_v1  ;;  %v782_v18 = vadd.f32 1.0, %v1265_v15 }
 0x112   : > { %v1269_v6 = vpop.eup %1268  ;;  %v875_v9 = vmul.f32 %v1267_v3, %v1527_v26  ;;  %1294 = vrcp.f32 %v766_v22 }
 0x113   : > { %v1271_v10 = vpop.eup %1270  ;;  %1296 = vrcp.f32 %v782_v18  ;;  %v769_v36 = vadd.f32 1.0, %v1269_v6 }
 0x114   : > { %v1273_v13 = vpop.eup %1272  ;;  %908 = vst.msk [vmem:[%s1567_s10 + $0xa8] sm:$0xff] %vm886_vm2, %v875_v9  ;;  %v785_v16 = vadd.f32 1.0, %v1271_v10  ;;  %1298 = vpow2.f32 %v1081_v29 }
 0x115   : > { %v1275_v37 = vpop.eup %1274  ;;  %1300 = vrcp.f32 %v769_v36  ;;  %v767_v19 = vadd.f32 1.0, %v1273_v13 }
 0x116   : > { %v1277_v21 = vpop.eup %1276  ;;  %1302 = vrcp.f32 %v785_v16  ;;  %v783_v24 = vadd.f32 1.0, %v1275_v37 }
 0x117   : > { %v1279_v25 = vpop.eup %1278  ;;  %1304 = vrcp.f32 %v767_v19  ;;  %v772_v31 = vadd.f32 1.0, %v1277_v21 }
 0x118   : > { %v1281_v45 = vpop.eup %1280  ;;  %1306 = vrcp.f32 %v783_v24  ;;  %v788_v26 = vadd.f32 1.0, %v1279_v25 }
 0x119   : > { %v1283_v32 = vpop.eup %1282  ;;  %1308 = vrcp.f32 %v772_v31  ;;  %v770_v46 = vadd.f32 1.0, %v1281_v45 }
 0x11a   : > { %v1285_v34 = vpop.eup %1284  ;;  %1310 = vrcp.f32 %v788_v26  ;;  %v786_v35 = vadd.f32 1.0, %v1283_v32 }
 0x11b   : > { %v1287_v38 = vpop.eup %1286  ;;  %1312 = vrcp.f32 %v770_v46  ;;  %v773_v50 = vadd.f32 1.0, %v1285_v34 }
 0x11c   : > { %v1289_v40 = vpop.eup %1288  ;;  %1314 = vrcp.f32 %v786_v35  ;;  %v789_v42 = vadd.f32 1.0, %v1287_v38 }
 0x11d   : > { %v1291_v55 = vpop.eup %1290  ;;  %1316 = vrcp.f32 %v773_v50  ;;  %v771_v44 = vadd.f32 1.0, %v1289_v40 }
 0x11e   : > { %v1293_v47 = vpop.eup %1292  ;;  %v864_v48 = vmul.f32 %v1291_v55, %v1535_v62  ;;  %1318 = vrcp.f32 %v789_v42 }
 0x11f   : > { %v1295_v49 = vpop.eup %1294  ;;  %v880_v59 = vmul.f32 %v1293_v47, %v1539_v2  ;;  %1320 = vrcp.f32 %v771_v44 }
 0x120   : > { %v1297_v51 = vpop.eup %1296  ;;  %897 = vst.msk [vmem:[%s1567_s10 + $0x50] sm:$0xff] %vm886_vm2, %v864_v48  ;;  %v862_v52 = vmul.f32 %v1295_v49, %v1543_v8 }
 0x121   : > { %v1299_v60 = vpop.eup %1298  ;;  %913 = vst.msk [vmem:[%s1567_s10 + $0xd0] sm:$0xff] %vm886_vm2, %v880_v59  ;;  %v878_v53 = vmul.f32 %v1297_v51, %v1546_v12 }
 0x122   : > { %v1301_v20 = vpop.eup %1300  ;;  %895 = vst.msk [vmem:[%s1567_s10 + $0x40] sm:$0xff] %vm886_vm2, %v862_v52  ;;  %v787_v62 = vadd.f32 1.0, %v1299_v60 }
 0x123   : > { %v1303_v54 = vpop.eup %1302  ;;  %911 = vst.msk [vmem:[%s1567_s10 + $0xc0] sm:$0xff] %vm886_vm2, %v878_v53  ;;  %v865_v2 = vmul.f32 %v1301_v20, %v1551_v23 }
 0x124   : > { %v1305_v4 = vpop.eup %1304  ;;  %v881_v8 = vmul.f32 %v1303_v54, %v1556_v30  ;;  %1322 = vrcp.f32 %v787_v62 }
 0x125   : > { %v1307_v56 = vpop.eup %1306  ;;  %898 = vst.msk [vmem:[%s1567_s10 + $0x58] sm:$0xff] %vm886_vm2, %v865_v2  ;;  %v863_v12 = vmul.f32 %v1305_v4, %v1562_v41 }
 0x126   : > { %v1309_v61 = vpop.eup %1308  ;;  %914 = vst.msk [vmem:[%s1567_s10 + $0xd8] sm:$0xff] %vm886_vm2, %v881_v8  ;;  %v879_v57 = vmul.f32 %v1307_v56, %v1576_v58 }
 0x127   : > { %v1311_v63 = vpop.eup %1310  ;;  %896 = vst.msk [vmem:[%s1567_s10 + $0x48] sm:$0xff] %vm886_vm2, %v863_v12  ;;  %v868_v23 = vmul.f32 %v1309_v61, %v1588_v7 }
 0x128   : > { %v1313_v30 = vpop.eup %1312  ;;  %912 = vst.msk [vmem:[%s1567_s10 + $0xc8] sm:$0xff] %vm886_vm2, %v879_v57  ;;  %v884_v14 = vmul.f32 %v1311_v63, %v1594_v11 }
 0x129   : > { %v1315_v41 = vpop.eup %1314  ;;  %901 = vst.msk [vmem:[%s1567_s10 + $0x70] sm:$0xff] %vm886_vm2, %v868_v23  ;;  %v866_v28 = vmul.f32 %v1313_v30, %v1601_v17 }
 0x12a   : > { %v1317_v58 = vpop.eup %1316  ;;  %917 = vst.msk [vmem:[%s1567_s10 + $0xf0] sm:$0xff] %vm886_vm2, %v884_v14  ;;  %v882_v0 = vmul.f32 %v1315_v41, %v1607_v27 }
 0x12b   : > { %v1319_v7 = vpop.eup %1318  ;;  %899 = vst.msk [vmem:[%s1567_s10 + $0x60] sm:$0xff] %vm886_vm2, %v866_v28  ;;  %v869_v1 = vmul.f32 %v1317_v58, %v1614_v33 }
 0x12c   : > { %v1321_v15 = vpop.eup %1320  ;;  %915 = vst.msk [vmem:[%s1567_s10 + $0xe0] sm:$0xff] %vm886_vm2, %v882_v0  ;;  %v885_v11 = vmul.f32 %v1319_v7, %v1621_v39 }
 0x12d   : > { %902 = vst.msk [vmem:[%s1567_s10 + $0x78] sm:$0xff] %vm886_vm2, %v869_v1  ;;  %v867_v17 = vmul.f32 %v1321_v15, %v1628_v43 }
 0x12e   : > { %918 = vst.msk [vmem:[%s1567_s10 + $0xf8] sm:$0xff] %vm886_vm2, %v885_v11 }
 0x12f   : > { %900 = vst.msk [vmem:[%s1567_s10 + $0x68] sm:$0xff] %vm886_vm2, %v867_v17 }
 0x131   : > { %v1323_v22 = vpop.eup %1322 }
 0x132   : > { %v883_v27 = vmul.f32 %v1323_v22, %v1651_v5 }
 0x134   : > { %916 = vst.msk [vmem:[%s1567_s10 + $0xe8] sm:$0xff] %vm886_vm2, %v883_v27 }
 0x135 PF: > { %s14_s17 = sadd.s32 1, %s1346_s17   ;;  %s1726_s15 = smov %s1342_s16 }
 0x136   : > { %p11_p5 = scmp.ge.s32.totalorder %s14_s17, 4   ;;  %s1727_s16 = smov %s1729_s18 }
 0x138   :  { %13 = sbr.rel (!%p11_p5) target bundleno = 2 (0x2), region = 66 }

// kernel: bottleneck_forward.5
= control target key start
LH: loop header
LB: loop body
LE: loop exit
PB: predicated region body
PF: predicated region fallthrough
CT: control target
= control target key end

     0   :  { %s2397_s21 = smov 0   ;;  %s3847_s0 = inlined_call_operand.vmem [shape: f32[2,16,16,8], index: 0, kind: input, shape index: {}]   ;;  %s3848_s1 = inlined_call_operand.vmem [shape: f32[2,16,16,8], index: 1, kind: input, shape index: {}]   ;;  %s3849_s2 = inlined_call_operand.vmem [shape: f32[3,8], index: 2, kind: input, shape index: {}]   ;;  %s3850_s3 = inlined_call_operand.vmem [shape: f32[1,8], index: 3, kind: input, shape index: {}]   ;;  %s3851_s4 = inlined_call_operand.vmem [shape: f32[3,8], index: 4, kind: input, shape index: {}]   ;;  %s3852_s5 = inlined_call_operand.vmem [shape: f32[1,8], index: 5, kind: input, shape index: {}]   ;;  %s3853_s6 = inlined_call_operand.vmem [shape: f32[3,8], index: 6, kind: input, shape index: {}]   ;;  %s3854_s7 = inlined_call_operand.vmem [shape: f32[1,8], index: 7, kind: input, shape index: {}]   ;;  %s3855_s8 = inlined_call_operand.vmem [shape: f32[3,8], index: 8, kind: input, shape index: {}]   ;;  %s3856_s9 = inlined_call_operand.vmem [shape: f32[1,8], index: 9, kind: input, shape index: {}]   ;;  %s3857_s10 = inlined_call_operand.vmem [shape: bf16[8,8], index: 10, kind: input, shape index: {}]   ;;  %s3858_s11 = inlined_call_operand.vmem [shape: f32[1,8], index: 11, kind: input, shape index: {}]   ;;  %s3859_s12 = inlined_call_operand.vmem [shape: f32[2,16,16,8], index: 12, kind: output, shape index: {}]  }
   0x1 LB: > { %s2192_s22 = sadd.s32 4294967295, %s2330_s21   ;;  %p2196_p0 = scmp.ge.s32.totalorder %s2330_s21, 1  ;;  %s2330_s21 = sphi %s2397_s21, %s22_s21  }
   0x2   : > { %p372_p1 = scmp.lt.s32.totalorder %s2330_s21, 3 }
   0x4   : > { %p373_p2 = pnand %p2196_p0, %p372_p1 }
   0x6   : > { %376 = sbr.rel (%p373_p2) target bundleno = 495 (0x1ef), region = 68 }
   0xb   : > { %v1775_v0 = vld [vmem:[%s3857_s10] sm:$0xf]  ;;  %vm1832_vm0 = vcmask 1043456   ;;  %p419_p3 = scmp.lt.s32.totalorder %s2192_s22, 1  ;;  %v694_v1 = vlaneseq  ;;  %vm500_vm1 = vcmask 1040384   ;;  %vm597_vm2 = vcmask 1046528  }
   0xc   : > { %2282 = vmatprep.subr.msk.bf16.mxu0 %vm1832_vm0, %v1775_v0  ;;  %2283 = vmatprep.subr.msk.bf16.mxu1 %vm1832_vm0, %v1775_v0  ;;  %v1834_v2 = vsel %vm1832_vm0, %v1775_v0, 0  ;;  %v467_v4 = vld [vmem:[%s3849_s2] sm:$0x7]  ;;  %vm1148_vm3 = vcmask 1041408   ;;  %vm1245_vm4 = vcmask 1045504   ;;  %vm1783_vm5 = vcmask 64512  }
   0xd   : > { %2247 = vmatpush3.bf16.msra.mxu0 %v1834_v2  ;;  %2281 = vmatpush3.bf16.msra.mxu1 %v1834_v2  ;;  %s3993_s22 = smov (!%p419_p3, %s2192_s22), 1  ;;  %v695_v3 = vshrl.u32 %v694_v1, 7  ;;  %v2414_v5 = vld [vmem:[%s3851_s4] sm:$0x7] }
   0xe   : > { %s2416_s29 = sshll.u32 %s3993_s22, 8 }
   0xf   : > { %v2418_v6 = vsub.s32 0, %v695_v3  ;;  %v2420_v7 = vsub.s32 1, %v695_v3  ;;  %v2422_v8 = vsub.s32 2, %v695_v3  ;;  %s2428_s14 = scalar_lea.vmem %s3847_s0, %s2416_s29  ;;  %s3676_s25 = scalar_lea.vmem %s3848_s1, %s2416_s29 }
  0x10   : > { %v435_v9 = vld [vmem:[%s2428_s14] sm:$0xff]  ;;  %v436_v10 = vld [vmem:[%s2428_s14 + $0x8] sm:$0xff]  ;;  %v437_v11 = vld [vmem:[%s2428_s14 + $0x10] sm:$0xff]  ;;  %s3686_s28 = scalar_lea.vmem %s3859_s12, %s2416_s29 }
  0x11   : > { %v2434_v12 = vrot.slane %v467_v4, %v2418_v6  ;;  %v2437_v13 = vrot.slane %v467_v4, %v2420_v7  ;;  %v2440_v14 = vrot.slane %v467_v4, %v2422_v8  ;;  %v2444_v15 = vrot.slane %v2414_v5, %v2418_v6  ;;  %v438_v16 = vld [vmem:[%s2428_s14 + $0x18] sm:$0xff]  ;;  %v439_v17 = vld [vmem:[%s2428_s14 + $0x20] sm:$0xff]  ;;  %v440_v18 = vld [vmem:[%s2428_s14 + $0x28] sm:$0xff] }
  0x12   : > { %v501_v19 = vrot.slane %v435_v9, 7  ;;  %v502_v20 = vrot.slane %v436_v10, 7  ;;  %v504_v21 = vrot.slane %v437_v11, 7  ;;  %v2451_v22 = vrot.slane %v2414_v5, %v2420_v7  ;;  %v441_v23 = vld [vmem:[%s2428_s14 + $0x30] sm:$0xff]  ;;  %v442_v24 = vld [vmem:[%s2428_s14 + $0x38] sm:$0xff] }
  0x13   : > { %3918 = vst [vmem:[#allocation2_spill] sm:$0xff] %v2434_v12  ;;  %v505_v25 = vrot.slane %v438_v16, 7  ;;  %v507_v26 = vrot.slane %v439_v17, 7  ;;  %v508_v27 = vrot.slane %v440_v18, 7  ;;  %v598_v28 = vrot.slane %v435_v9, 1 }
  0x14   : > { %v503_v29 = vsel %vm500_vm1, %v501_v19, %v502_v20  ;;  %v510_v30 = vrot.slane %v441_v23, 7  ;;  %v511_v31 = vrot.slane %v442_v24, 7  ;;  %v581_v32 = vsel %vm500_vm1, 0.0, %v501_v19 }
  0x15   : > { %v506_v33 = vsel %vm500_vm1, %v504_v21, %v505_v25  ;;  %v509_v34 = vsel %vm500_vm1, %v507_v26, %v508_v27  ;;  %v582_v35 = vsel %vm500_vm1, 0.0, %v504_v21  ;;  %v583_v36 = vsel %vm500_vm1, 0.0, %v507_v26 }
  0x16   : > { %v512_v37 = vsel %vm500_vm1, %v510_v30, %v511_v31  ;;  %v584_v38 = vsel %vm500_vm1, 0.0, %v510_v30  ;;  %v599_v39 = vrot.slane %v436_v10, 1  ;;  %v601_v40 = vrot.slane %v437_v11, 1  ;;  %v2497_v30 = vld [vmem:[%s3850_s3] ss:$0 sm:$0xff] }
  0x17   : > { %v602_v41 = vrot.slane %v438_v16, 1  ;;  %v604_v42 = vrot.slane %v439_v17, 1  ;;  %v605_v43 = vrot.slane %v440_v18, 1  ;;  %v607_v44 = vrot.slane %v441_v23, 1 }
  0x18   : > { %v600_v45 = vsel %vm597_vm2, %v598_v28, %v599_v39  ;;  %v608_v46 = vrot.slane %v442_v24, 1  ;;  %v678_v47 = vsel %vm597_vm2, %v599_v39, 0.0  ;;  %v698_v48 = vmul.f32 %v2434_v12, %v581_v32 }
  0x19   : > { %v603_v49 = vsel %vm597_vm2, %v601_v40, %v602_v41  ;;  %v606_v50 = vsel %vm597_vm2, %v604_v42, %v605_v43  ;;  %v679_v51 = vsel %vm597_vm2, %v602_v41, 0.0  ;;  %v680_v52 = vsel %vm597_vm2, %v605_v43, 0.0 }
  0x1a   : > { %v609_v53 = vsel %vm597_vm2, %v607_v44, %v608_v46  ;;  %v681_v54 = vsel %vm597_vm2, %v608_v46, 0.0  ;;  %v699_v55 = vmul.f32 %v2434_v12, %v503_v29  ;;  %v700_v56 = vmul.f32 %v2434_v12, %v582_v35 }
  0x1b   : > { %v701_v57 = vmul.f32 %v2434_v12, %v506_v33  ;;  %v702_v58 = vmul.f32 %v2434_v12, %v583_v36  ;;  %v703_v59 = vmul.f32 %v2434_v12, %v509_v34  ;;  %v704_v60 = vmul.f32 %v2434_v12, %v584_v38 }
  0x1c   : > { %v705_v61 = vmul.f32 %v2434_v12, %v512_v37  ;;  %v734_v62 = vmul.f32 %v2437_v13, %v435_v9  ;;  %v735_v63 = vmul.f32 %v2437_v13, %v436_v10  ;;  %v736_v0 = vmul.f32 %v2437_v13, %v437_v11 }
  0x1d   : > { %v737_v1 = vmul.f32 %v2437_v13, %v438_v16  ;;  %v738_v2 = vmul.f32 %v2437_v13, %v439_v17  ;;  %v739_v3 = vmul.f32 %v2437_v13, %v440_v18  ;;  %v740_v4 = vmul.f32 %v2437_v13, %v441_v23 }
  0x1e   : > { %v741_v19 = vmul.f32 %v2437_v13, %v442_v24  ;;  %v766_v20 = vadd.f32 %v734_v62, %v698_v48  ;;  %v767_v21 = vadd.f32 %v735_v63, %v699_v55  ;;  %v768_v25 = vadd.f32 %v736_v0, %v700_v56 }
  0x1f   : > { %v769_v26 = vadd.f32 %v737_v1, %v701_v57  ;;  %v770_v27 = vadd.f32 %v738_v2, %v702_v58  ;;  %v771_v9 = vadd.f32 %v739_v3, %v703_v59  ;;  %v772_v28 = vadd.f32 %v740_v4, %v704_v60  ;;  %v1553_v60 = vld [vmem:[%s3855_s8] sm:$0x7]  ;;  %v2557_v1 = vld [vmem:[%s2428_s14 + $0x50] sm:$0xff] }
  0x20   : > { %v773_v10 = vadd.f32 %v741_v19, %v705_v61  ;;  %v802_v11 = vmul.f32 %v2440_v14, %v600_v45  ;;  %v803_v16 = vmul.f32 %v2440_v14, %v678_v47  ;;  %v804_v17 = vmul.f32 %v2440_v14, %v603_v49  ;;  %v1115_v47 = vld [vmem:[%s3853_s6] sm:$0x7]  ;;  %v2564_v19 = vld [vmem:[%s2428_s14 + $0x58] sm:$0xff] }
  0x21   : > { %v805_v18 = vmul.f32 %v2440_v14, %v679_v51  ;;  %v806_v23 = vmul.f32 %v2440_v14, %v606_v50  ;;  %v807_v24 = vmul.f32 %v2440_v14, %v680_v52  ;;  %v808_v29 = vmul.f32 %v2440_v14, %v609_v53 }
  0x22   : > { %v809_v31 = vmul.f32 %v2440_v14, %v681_v54  ;;  %v834_v32 = vadd.f32 %v802_v11, %v766_v20  ;;  %v835_v33 = vadd.f32 %v803_v16, %v767_v21  ;;  %v836_v34 = vadd.f32 %v804_v17, %v768_v25  ;;  %v2573_v25 = vld [vmem:[%s3852_s5] ss:$0 sm:$0xff]  ;;  %v2591_v17 = vld [vmem:[%s2428_s14 + $0x70] sm:$0xff] }
  0x23   : > { %v837_v35 = vadd.f32 %v805_v18, %v769_v26  ;;  %v838_v36 = vadd.f32 %v806_v23, %v770_v27  ;;  %v839_v37 = vadd.f32 %v807_v24, %v771_v9  ;;  %v840_v38 = vadd.f32 %v808_v29, %v772_v28  ;;  %3931 = vst [vmem:[#allocation15_spill] sm:$0xff] %v2573_v25  ;;  %v2582_v9 = vld [vmem:[%s2428_s14 + $0x60] sm:$0xff]  ;;  %v2585_v28 = vld [vmem:[%s2428_s14 + $0x68] sm:$0xff] }
  0x24   : > { %v841_v39 = vadd.f32 %v809_v31, %v773_v10  ;;  %v873_v40 = vadd.f32 %v2497_v30, %v834_v32  ;;  %v874_v41 = vadd.f32 %v2497_v30, %v835_v33  ;;  %v2503_v42 = vadd.f32 %v2497_v30, %v836_v34 }
  0x25   : > { %v2506_v43 = vadd.f32 %v2497_v30, %v837_v35  ;;  %v2509_v44 = vadd.f32 %v2497_v30, %v838_v36  ;;  %v2512_v45 = vadd.f32 %v2497_v30, %v839_v37  ;;  %v2515_v46 = vadd.f32 %v2497_v30, %v840_v38 }
  0x26   : > { %3919 = vst [vmem:[#allocation3_spill] sm:$0xff] %v2503_v42  ;;  %v2521_v48 = vadd.f32 %v2497_v30, %v841_v39  ;;  %v910_v49 = vmul.f32 0.0, %v2444_v15  ;;  %v2525_v50 = vmul.f32 %v2444_v15, %v873_v40  ;;  %v2528_v51 = vmul.f32 %v2444_v15, %v874_v41 }
  0x27   : > { %3920 = vst [vmem:[#allocation4_spill] sm:$0xff] %v2506_v43  ;;  %3921 = vst [vmem:[#allocation5_spill] sm:$0xff] %v2509_v44  ;;  %v913_v52 = vmul.f32 %v2444_v15, %v2503_v42  ;;  %v914_v53 = vmul.f32 %v2444_v15, %v2506_v43  ;;  %v945_v54 = vmul.f32 %v2451_v22, %v873_v40  ;;  %v516_v18 = vrot.slane %v2557_v1, 7 }
  0x28   : > { %3922 = vst [vmem:[#allocation6_spill] sm:$0xff] %v2512_v45  ;;  %3923 = vst [vmem:[#allocation7_spill] sm:$0xff] %v2515_v46  ;;  %v946_v55 = vmul.f32 %v2451_v22, %v874_v41  ;;  %v949_v56 = vmul.f32 %v2451_v22, %v2509_v44  ;;  %v950_v57 = vmul.f32 %v2451_v22, %v2512_v45  ;;  %v519_v32 = vrot.slane %v2582_v9, 7 }
  0x29   : > { %3924 = vst [vmem:[#allocation8_spill] sm:$0xff] %v2521_v48  ;;  %3925 = vst [vmem:[#allocation9_spill] sm:$0xff] %v2525_v50  ;;  %v2542_v58 = vrot.slane %v2414_v5, %v2422_v8  ;;  %v2545_v59 = vrot.slane %v1115_v47, %v2418_v6  ;;  %v977_v61 = vadd.f32 %v945_v54, %v910_v49  ;;  %v3860_v36 = vrot.slane %v2591_v17, 7 }
  0x2a   : > { %3926 = vst [vmem:[#allocation10_spill] sm:$0xff] %v2528_v51  ;;  %v978_v62 = vadd.f32 %v946_v55, %v910_v49  ;;  %v2551_v63 = vrot.slane %v1115_v47, %v2420_v7  ;;  %v2554_v0 = vrot.slane %v1115_v47, %v2422_v8  ;;  %v981_v5 = vadd.f32 %v949_v56, %v913_v52 }
  0x2b   : > { %3927 = vst [vmem:[#allocation11_spill] sm:$0xff] %v2542_v58  ;;  %3928 = vst [vmem:[#allocation12_spill] sm:$0xff] %v2545_v59  ;;  %v982_v2 = vadd.f32 %v950_v57, %v914_v53  ;;  %v1013_v3 = vmul.f32 %v2542_v58, %v2503_v42  ;;  %v1014_v4 = vmul.f32 %v2542_v58, %v2506_v43  ;;  %v613_v51 = vrot.slane %v2557_v1, 1 }
  0x2c   : > { %3929 = vst [vmem:[#allocation13_spill] sm:$0xff] %v2551_v63  ;;  %3930 = vst [vmem:[#allocation14_spill] sm:$0xff] %v2554_v0  ;;  %v1017_v20 = vmul.f32 %v2542_v58, %v2515_v46  ;;  %v1018_v21 = vmul.f32 %v2542_v58, %v2521_v48  ;;  %v2576_v26 = vrot.slane %v1553_v60, %v2418_v6  ;;  %v614_v50 = vrot.slane %v2564_v19, 1 }
  0x2d   : > { %v2579_v27 = vrot.slane %v1553_v60, %v2420_v7  ;;  %v1044_v10 = vadd.f32 %v1013_v3, %v977_v61  ;;  %v1045_v11 = vadd.f32 %v1014_v4, %v978_v62  ;;  %v2588_v16 = vrot.slane %v1553_v60, %v2422_v8 }
  0x2e   : > { %3932 = vst [vmem:[#allocation16_spill] sm:$0xff] %v2576_v26  ;;  %v1048_v23 = vadd.f32 %v1017_v20, %v981_v5  ;;  %v1049_v24 = vadd.f32 %v1018_v21, %v982_v2  ;;  %v2595_v6 = vmul.f32 0.0, %v2576_v26  ;;  %v517_v7 = vrot.slane %v2564_v19, 7 }
  0x2f   : > { %3933 = vst [vmem:[#allocation17_spill] sm:$0xff] %v2579_v27  ;;  %3934 = vst [vmem:[#allocation18_spill] sm:$0xff] %v2588_v16  ;;  %v1083_v29 = vadd.f32 %v2573_v25, %v1044_v10  ;;  %v1084_v31 = vadd.f32 %v2573_v25, %v1045_v11  ;;  %v520_v8 = vrot.slane %v2585_v28, 7  ;;  %v617_v48 = vrot.slane %v2585_v28, 1 }
  0x30   : > { %3935 = vst [vmem:[#allocation19_spill] sm:$0xff] %v2595_v6  ;;  %v1087_v33 = vadd.f32 %v2573_v25, %v1048_v23  ;;  %v1088_v34 = vadd.f32 %v2573_v25, %v1049_v24  ;;  %v2607_v35 = vsel %vm500_vm1, %v516_v18, %v517_v7  ;;  %v2627_v23 = vld [vmem:[%s2428_s14 + $0x78] sm:$0xff]  ;;  %v2630_v24 = vld [vmem:[%s2428_s14 + $0x80] sm:$0xff]  ;;  %v2633_v7 = vld [vmem:[%s2428_s14 + $0x88] sm:$0xff] }
  0x31   : > { %v1149_v37 = vrot.slane %v1083_v29, 6  ;;  %v1150_v38 = vrot.slane %v1084_v31, 6  ;;  %v1246_v39 = vrot.slane %v1083_v29, 2  ;;  %v1247_v40 = vrot.slane %v1084_v31, 2 }
  0x32   : > { %v1155_v41 = vrot.slane %v1087_v33, 6  ;;  %v1156_v47 = vrot.slane %v1088_v34, 6  ;;  %v1252_v49 = vrot.slane %v1087_v33, 2  ;;  %v1253_v52 = vrot.slane %v1088_v34, 2 }
  0x33   : > { %v1151_v53 = vsel %vm1148_vm3, %v1149_v37, %v1150_v38  ;;  %v1229_v54 = vsel %vm1148_vm3, 0.0, %v1149_v37  ;;  %v1248_v55 = vsel %vm1245_vm4, %v1246_v39, %v1247_v40  ;;  %v1326_v56 = vsel %vm1245_vm4, %v1247_v40, 0.0 }
  0x34   : > { %v1157_v57 = vsel %vm1148_vm3, %v1155_v41, %v1156_v47  ;;  %v1231_v60 = vsel %vm1148_vm3, 0.0, %v1155_v41  ;;  %v1254_v61 = vsel %vm1245_vm4, %v1252_v49, %v1253_v52  ;;  %v1328_v62 = vsel %vm1245_vm4, %v1253_v52, 0.0  ;;  %v2640_v41 = vld [vmem:[%s2428_s14 + $0x90] sm:$0xff]  ;;  %v2643_v47 = vld [vmem:[%s2428_s14 + $0x98] sm:$0xff]  ;;  %v2648_v49 = vld [vmem:[%s3854_s7] ss:$0 sm:$0xff] }
  0x35   : > { %v1346_v5 = vmul.f32 %v2545_v59, %v1229_v54  ;;  %v1347_v2 = vmul.f32 %v2545_v59, %v1151_v53  ;;  %v1350_v3 = vmul.f32 %v2545_v59, %v1231_v60  ;;  %v1351_v4 = vmul.f32 %v2545_v59, %v1157_v57  ;;  %3936 = vst [vmem:[#allocation20_spill] sm:$0xff] %v2648_v49 }
  0x36   : > { %v1382_v20 = vmul.f32 %v2551_v63, %v1083_v29  ;;  %v1383_v21 = vmul.f32 %v2551_v63, %v1084_v31  ;;  %v1386_v10 = vmul.f32 %v2551_v63, %v1087_v33  ;;  %v1387_v11 = vmul.f32 %v2551_v63, %v1088_v34 }
  0x37   : > { %v1450_v37 = vmul.f32 %v2554_v0, %v1248_v55  ;;  %v1451_v38 = vmul.f32 %v2554_v0, %v1326_v56  ;;  %v1454_v39 = vmul.f32 %v2554_v0, %v1254_v61  ;;  %v1455_v29 = vmul.f32 %v2554_v0, %v1328_v62  ;;  %v2659_v62 = vld [vmem:[%s2428_s14 + $0xa0] sm:$0xff] }
  0x38   : > { %v1414_v31 = vadd.f32 %v1382_v20, %v1346_v5  ;;  %v1415_v33 = vadd.f32 %v1383_v21, %v1347_v2  ;;  %v1418_v34 = vadd.f32 %v1386_v10, %v1350_v3  ;;  %v1419_v40 = vadd.f32 %v1387_v11, %v1351_v4  ;;  %v2662_v5 = vld [vmem:[%s2428_s14 + $0xa8] sm:$0xff]  ;;  %v2665_v2 = vld [vmem:[%s2428_s14 + $0xb0] sm:$0xff] }
  0x39   : > { %v2653_v52 = vsel %vm500_vm1, %v519_v32, %v520_v8  ;;  %v523_v53 = vrot.slane %v2627_v23, 7  ;;  %v525_v54 = vrot.slane %v2630_v24, 7  ;;  %v526_v55 = vrot.slane %v2633_v7, 7 }
  0x3a   : > { %v1482_v56 = vadd.f32 %v1450_v37, %v1414_v31  ;;  %v1483_v57 = vadd.f32 %v1451_v38, %v1415_v33  ;;  %v1486_v60 = vadd.f32 %v1454_v39, %v1418_v34  ;;  %v1487_v61 = vadd.f32 %v1455_v29, %v1419_v40  ;;  %v2686_v38 = vld [vmem:[%s2428_s14 + $0xb8] sm:$0xff] }
  0x3b   : > { %v2670_v8 = vsel %vm500_vm1, %v3860_v36, %v523_v53  ;;  %v2673_v3 = vsel %vm500_vm1, %v525_v54, %v526_v55  ;;  %v528_v4 = vrot.slane %v2640_v41, 7  ;;  %v529_v20 = vrot.slane %v2643_v47, 7 }
  0x3c   : > { %v1521_v21 = vadd.f32 %v2648_v49, %v1482_v56  ;;  %v1522_v10 = vadd.f32 %v2648_v49, %v1483_v57  ;;  %v2680_v11 = vadd.f32 %v2648_v49, %v1486_v60  ;;  %v2683_v37 = vadd.f32 %v2648_v49, %v1487_v61 }
  0x3d   : > { %v2689_v39 = vsel %vm500_vm1, %v528_v4, %v529_v20  ;;  %v531_v29 = vrot.slane %v2659_v62, 7  ;;  %v532_v31 = vrot.slane %v2662_v5, 7  ;;  %v534_v33 = vrot.slane %v2665_v2, 7 }
  0x3e   : > { %3937 = vst [vmem:[#allocation21_spill] sm:$0xff] %v2680_v11  ;;  %3938 = vst [vmem:[#allocation22_spill] sm:$0xff] %v2683_v37  ;;  %v2695_v34 = vmul.f32 %v2576_v26, %v1521_v21  ;;  %v2698_v40 = vmul.f32 %v2576_v26, %v1522_v10  ;;  %v1591_v53 = vmul.f32 %v2579_v27, %v1521_v21  ;;  %v535_v61 = vrot.slane %v2686_v38, 7 }
  0x3f   : > { %v1592_v55 = vmul.f32 %v2579_v27, %v1522_v10  ;;  %v1659_v56 = vmul.f32 %v2588_v16, %v2680_v11  ;;  %v1660_v57 = vmul.f32 %v2588_v16, %v2683_v37  ;;  %v533_v60 = vsel %vm500_vm1, %v531_v29, %v532_v31 }
  0x40   : > { %3939 = vst [vmem:[#allocation23_spill] sm:$0xff] %v2695_v34  ;;  %3940 = vst [vmem:[#allocation24_spill] sm:$0xff] %v2698_v40  ;;  %v1623_v20 = vadd.f32 %v1591_v53, %v2595_v6  ;;  %v586_v21 = vsel %vm500_vm1, 0.0, %v516_v18  ;;  %v587_v10 = vsel %vm500_vm1, 0.0, %v519_v32  ;;  %v2719_v40 = vld [vmem:[%s3856_s9] ss:$0 sm:$0xff]  ;;  %v536_v31 = vsel %vm500_vm1, %v534_v33, %v535_v61 }
  0x41   : > { %v1624_v36 = vadd.f32 %v1592_v55, %v2595_v6  ;;  %3941 = vst [vmem:[#allocation25_spill] sm:$0xff] %v2719_v40  ;;  %v3942_v34 = vrot.slane %v2591_v17, 7  ;;  %v589_v55 = vsel %vm500_vm1, 0.0, %v525_v54  ;;  %v590_v37 = vsel %vm500_vm1, 0.0, %v528_v4 }
  0x42   : > { %v1688_v18 = vadd.f32 %v1659_v56, %v1623_v20  ;;  %v591_v6 = vsel %vm500_vm1, 0.0, %v531_v29  ;;  %v592_v32 = vsel %vm500_vm1, 0.0, %v534_v33  ;;  %v616_v61 = vrot.slane %v2582_v9, 1 }
  0x43   : > { %v588_v53 = vsel %vm500_vm1, 0.0, %v3942_v34  ;;  %v1689_v11 = vadd.f32 %v1660_v57, %v1624_v36  ;;  %v619_v4 = vrot.slane %v2591_v17, 1  ;;  %v620_v36 = vrot.slane %v2627_v23, 1 }
  0x44   : > { %v1727_v34 = vadd.f32 %v2719_v40, %v1688_v18  ;;  %v2738_v29 = vsel %vm597_vm2, %v613_v51, %v614_v50  ;;  %v2741_v33 = vsel %vm597_vm2, %v616_v61, %v617_v48  ;;  %v622_v56 = vrot.slane %v2630_v24, 1 }
  0x45   : > { %v1728_v54 = vadd.f32 %v2719_v40, %v1689_v11  ;;  %v623_v57 = vrot.slane %v2633_v7, 1  ;;  %v2746_v46 = vsel %vm597_vm2, %v619_v4, %v620_v36  ;;  %v625_v11 = vrot.slane %v2640_v41, 1 }
  0x46   : > { %v626_v18 = vrot.slane %v2643_v47, 1  ;;  %v628_v51 = vrot.slane %v2659_v62, 1  ;;  %v629_v61 = vrot.slane %v2662_v5, 1  ;;  %v631_v43 = vrot.slane %v2665_v2, 1 }
  0x47   : > { %v1759_v20 = vpack.c.bf16 %v1728_v54, %v1727_v34  ;;  %v2751_v40 = vsel %vm597_vm2, %v622_v56, %v623_v57  ;;  %v632_v54 = vrot.slane %v2686_v38, 1  ;;  %v683_v4 = vsel %vm597_vm2, %v614_v50, 0.0 }
  0x48   : > { %v627_v34 = vsel %vm597_vm2, %v625_v11, %v626_v18  ;;  %v684_v42 = vsel %vm597_vm2, %v617_v48, 0.0  ;;  %v630_v45 = vsel %vm597_vm2, %v628_v51, %v629_v61  ;;  %v685_v56 = vsel %vm597_vm2, %v620_v36, 0.0 }
  0x49   : > { %2248 = vmatprep.mubr.msk.bf16.mxu0 %vm1783_vm5, %v1759_v20  ;;  %v686_v44 = vsel %vm597_vm2, %v623_v57, 0.0  ;;  %v687_v16 = vsel %vm597_vm2, %v626_v18, 0.0  ;;  %v633_v27 = vsel %vm597_vm2, %v631_v43, %v632_v54  ;;  %v688_v20 = vsel %vm597_vm2, %v629_v61, 0.0 }
  0x4a   : > { %v689_v11 = vsel %vm597_vm2, %v632_v54, 0.0  ;;  %v708_v26 = vmul.f32 %v2434_v12, %v586_v21  ;;  %v709_v50 = vmul.f32 %v2434_v12, %v2607_v35  ;;  %v710_v48 = vmul.f32 %v2434_v12, %v587_v10 }
  0x4b   : > { %v711_v36 = vmul.f32 %v2434_v12, %v2653_v52  ;;  %v712_v57 = vmul.f32 %v2434_v12, %v588_v53  ;;  %v713_v18 = vmul.f32 %v2434_v12, %v2670_v8  ;;  %v714_v43 = vmul.f32 %v2434_v12, %v589_v55 }
  0x4c   : > { %v715_v51 = vmul.f32 %v2434_v12, %v2673_v3  ;;  %v716_v21 = vmul.f32 %v2434_v12, %v590_v37  ;;  %v717_v35 = vmul.f32 %v2434_v12, %v2689_v39  ;;  %v718_v10 = vmul.f32 %v2434_v12, %v591_v6 }
  0x4d   : > { %v719_v61 = vmul.f32 %v2434_v12, %v533_v60  ;;  %v720_v52 = vmul.f32 %v2434_v12, %v592_v32  ;;  %v721_v53 = vmul.f32 %v2434_v12, %v536_v31  ;;  %v744_v8 = vmul.f32 %v2437_v13, %v2557_v1 }
  0x4e   : > { %v745_v55 = vmul.f32 %v2437_v13, %v2564_v19  ;;  %v746_v3 = vmul.f32 %v2437_v13, %v2582_v9  ;;  %v747_v37 = vmul.f32 %v2437_v13, %v2585_v28  ;;  %v748_v6 = vmul.f32 %v2437_v13, %v2591_v17 }
  0x4f   : > { %v749_v39 = vmul.f32 %v2437_v13, %v2627_v23  ;;  %v750_v60 = vmul.f32 %v2437_v13, %v2630_v24  ;;  %v751_v1 = vmul.f32 %v2437_v13, %v2633_v7  ;;  %v752_v19 = vmul.f32 %v2437_v13, %v2640_v41 }
  0x50   : > { %v753_v9 = vmul.f32 %v2437_v13, %v2643_v47  ;;  %v754_v28 = vmul.f32 %v2437_v13, %v2659_v62  ;;  %v755_v17 = vmul.f32 %v2437_v13, %v2662_v5  ;;  %v756_v23 = vmul.f32 %v2437_v13, %v2665_v2 }
  0x51   : > { %v757_v24 = vmul.f32 %v2437_v13, %v2686_v38  ;;  %v776_v31 = vadd.f32 %v744_v8, %v708_v26  ;;  %v777_v7 = vadd.f32 %v745_v55, %v709_v50  ;;  %v778_v32 = vadd.f32 %v746_v3, %v710_v48 }
  0x52   : > { %v779_v54 = vadd.f32 %v747_v37, %v711_v36  ;;  %v780_v41 = vadd.f32 %v748_v6, %v712_v57  ;;  %v781_v12 = vadd.f32 %v749_v39, %v713_v18  ;;  %v782_v49 = vadd.f32 %v750_v60, %v714_v43 }
  0x53   : > { %v783_v47 = vadd.f32 %v751_v1, %v715_v51  ;;  %v784_v0 = vadd.f32 %v752_v19, %v716_v21  ;;  %v785_v63 = vadd.f32 %v753_v9, %v717_v35  ;;  %v786_v62 = vadd.f32 %v754_v28, %v718_v10 }
  0x54   : > { %v787_v59 = vadd.f32 %v755_v17, %v719_v61  ;;  %v788_v25 = vadd.f32 %v756_v23, %v720_v52  ;;  %v789_v5 = vadd.f32 %v757_v24, %v721_v53  ;;  %v812_v2 = vmul.f32 %v2440_v14, %v2738_v29 }
  0x55   : > { %v813_v58 = vmul.f32 %v2440_v14, %v683_v4  ;;  %v814_v26 = vmul.f32 %v2440_v14, %v2741_v33  ;;  %v815_v38 = vmul.f32 %v2440_v14, %v684_v42  ;;  %v816_v50 = vmul.f32 %v2440_v14, %v2746_v46 }
  0x56   : > { %v817_v48 = vmul.f32 %v2440_v14, %v685_v56  ;;  %v818_v36 = vmul.f32 %v2440_v14, %v2751_v40  ;;  %v819_v57 = vmul.f32 %v2440_v14, %v686_v44  ;;  %v820_v18 = vmul.f32 %v2440_v14, %v627_v34 }
  0x57   : > { %v821_v29 = vmul.f32 %v2440_v14, %v687_v16  ;;  %v822_v4 = vmul.f32 %v2440_v14, %v630_v45  ;;  %v823_v33 = vmul.f32 %v2440_v14, %v688_v20  ;;  %v824_v42 = vmul.f32 %v2440_v14, %v633_v27 }
  0x58   : > { %v825_v43 = vmul.f32 %v2440_v14, %v689_v11  ;;  %v844_v46 = vadd.f32 %v812_v2, %v776_v31  ;;  %v845_v51 = vadd.f32 %v813_v58, %v777_v7  ;;  %v846_v56 = vadd.f32 %v814_v26, %v778_v32  ;;  %v3944_v32 = vld [vmem:[#allocation11_spill] sm:$0xff]  ;;  %v2904_v2 = vld [vmem:[%s2428_s14 + $0x40] sm:$0xff] }
  0x59   : > { %v847_v21 = vadd.f32 %v815_v38, %v779_v54  ;;  %v848_v35 = vadd.f32 %v816_v50, %v780_v41  ;;  %v849_v40 = vadd.f32 %v817_v48, %v781_v12  ;;  %v850_v10 = vadd.f32 %v818_v36, %v782_v49  ;;  %v2907_v26 = vld [vmem:[%s2428_s14 + $0x48] sm:$0xff] }
  0x5a   : > { %v851_v44 = vadd.f32 %v819_v57, %v783_v47  ;;  %v852_v61 = vadd.f32 %v820_v18, %v784_v0  ;;  %v853_v34 = vadd.f32 %v821_v29, %v785_v63  ;;  %v854_v52 = vadd.f32 %v822_v4, %v786_v62 }
  0x5b   : > { %v855_v16 = vadd.f32 %v823_v33, %v787_v59  ;;  %v856_v53 = vadd.f32 %v824_v42, %v788_v25  ;;  %v857_v45 = vadd.f32 %v825_v43, %v789_v5  ;;  %v2834_v20 = vadd.f32 %v2497_v30, %v844_v46 }
  0x5c   : > { %v2837_v27 = vadd.f32 %v2497_v30, %v845_v51  ;;  %v2840_v58 = vadd.f32 %v2497_v30, %v846_v56  ;;  %v2843_v11 = vadd.f32 %v2497_v30, %v847_v21  ;;  %v2846_v12 = vadd.f32 %v2497_v30, %v848_v35  ;;  %v3945_v35 = vld [vmem:[#allocation15_spill] sm:$0xff] }
  0x5d   : > { %v2849_v63 = vadd.f32 %v2497_v30, %v849_v40  ;;  %v2852_v59 = vadd.f32 %v2497_v30, %v850_v10  ;;  %v2855_v0 = vadd.f32 %v2497_v30, %v851_v44  ;;  %v2858_v25 = vadd.f32 %v2497_v30, %v852_v61 }
  0x5e   : > { %3943 = vst [vmem:[#allocation26_spill] sm:$0xff] %v2837_v27  ;;  %v2861_v49 = vadd.f32 %v2497_v30, %v853_v34  ;;  %v2864_v8 = vadd.f32 %v2497_v30, %v854_v52  ;;  %v2867_v55 = vadd.f32 %v2497_v30, %v855_v16  ;;  %v2870_v3 = vadd.f32 %v2497_v30, %v856_v53 }
  0x5f   : > { %v2873_v37 = vadd.f32 %v2497_v30, %v857_v45  ;;  %v921_v6 = vmul.f32 %v2444_v15, %v2834_v20  ;;  %v922_v39 = vmul.f32 %v2444_v15, %v2837_v27  ;;  %v925_v60 = vmul.f32 %v2444_v15, %v2846_v12 }
  0x60   : > { %v926_v1 = vmul.f32 %v2444_v15, %v2849_v63  ;;  %v929_v19 = vmul.f32 %v2444_v15, %v2858_v25  ;;  %v930_v9 = vmul.f32 %v2444_v15, %v2861_v49  ;;  %v957_v28 = vmul.f32 %v2451_v22, %v2840_v58 }
  0x61   : > { %v958_v17 = vmul.f32 %v2451_v22, %v2843_v11  ;;  %v961_v23 = vmul.f32 %v2451_v22, %v2852_v59  ;;  %v962_v24 = vmul.f32 %v2451_v22, %v2855_v0  ;;  %v965_v31 = vmul.f32 %v2451_v22, %v2864_v8 }
  0x62   : > { %v966_v7 = vmul.f32 %v2451_v22, %v2867_v55  ;;  %v1025_v54 = vmul.f32 %v3944_v32, %v2846_v12  ;;  %v989_v41 = vadd.f32 %v957_v28, %v921_v6  ;;  %v1026_v5 = vmul.f32 %v3944_v32, %v2849_v63 }
  0x63   : > { %v990_v47 = vadd.f32 %v958_v17, %v922_v39  ;;  %v993_v62 = vadd.f32 %v961_v23, %v925_v60  ;;  %v994_v38 = vadd.f32 %v962_v24, %v926_v1  ;;  %v997_v50 = vadd.f32 %v965_v31, %v929_v19 }
  0x64   : > { %v998_v48 = vadd.f32 %v966_v7, %v930_v9  ;;  %v1029_v36 = vmul.f32 %v3944_v32, %v2858_v25  ;;  %v1030_v57 = vmul.f32 %v3944_v32, %v2861_v49  ;;  %v1033_v18 = vmul.f32 %v3944_v32, %v2870_v3 }
  0x65   : > { %v1034_v29 = vmul.f32 %v3944_v32, %v2873_v37  ;;  %v1056_v4 = vadd.f32 %v1025_v54, %v989_v41  ;;  %v1057_v33 = vadd.f32 %v1026_v5, %v990_v47  ;;  %v513_v43 = vrot.slane %v2904_v2, 7 }
  0x66   : > { %v1060_v42 = vadd.f32 %v1029_v36, %v993_v62  ;;  %v514_v46 = vrot.slane %v2907_v26, 7  ;;  %v1061_v51 = vadd.f32 %v1030_v57, %v994_v38  ;;  %v1064_v56 = vadd.f32 %v1033_v18, %v997_v50 }
  0x67   : > { %v1065_v21 = vadd.f32 %v1034_v29, %v998_v48  ;;  %v1095_v40 = vadd.f32 %v3945_v35, %v1056_v4  ;;  %v1096_v10 = vadd.f32 %v3945_v35, %v1057_v33  ;;  %v2926_v34 = vsel %vm500_vm1, 0.0, %v513_v43  ;;  %v3946_v48 = vld [vmem:[#allocation12_spill] sm:$0xff] }
  0x68   : > { %v1099_v44 = vadd.f32 %v3945_v35, %v1060_v42  ;;  %v2923_v61 = vsel %vm500_vm1, %v513_v43, %v514_v46  ;;  %v1100_v52 = vadd.f32 %v3945_v35, %v1061_v51  ;;  %v1103_v16 = vadd.f32 %v3945_v35, %v1064_v56  ;;  %v3947_v56 = vld [vmem:[#allocation13_spill] sm:$0xff] }
  0x69   : > { %v1104_v53 = vadd.f32 %v3945_v35, %v1065_v21  ;;  %v1167_v45 = vrot.slane %v1095_v40, 6  ;;  %v1168_v6 = vrot.slane %v1096_v10, 6  ;;  %v1264_v60 = vrot.slane %v1095_v40, 2 }
  0x6a   : > { %v1173_v39 = vrot.slane %v1099_v44, 6  ;;  %v1265_v1 = vrot.slane %v1096_v10, 2  ;;  %v1174_v19 = vrot.slane %v1100_v52, 6  ;;  %v1179_v9 = vrot.slane %v1103_v16, 6 }
  0x6b   : > { %v1180_v28 = vrot.slane %v1104_v53, 6  ;;  %v1235_v17 = vsel %vm1148_vm3, 0.0, %v1167_v45  ;;  %v1169_v23 = vsel %vm1148_vm3, %v1167_v45, %v1168_v6  ;;  %v1270_v7 = vrot.slane %v1099_v44, 2 }
  0x6c   : > { %v1237_v24 = vsel %vm1148_vm3, 0.0, %v1173_v39  ;;  %v1266_v31 = vsel %vm1245_vm4, %v1264_v60, %v1265_v1  ;;  %v1175_v54 = vsel %vm1148_vm3, %v1173_v39, %v1174_v19  ;;  %v1239_v47 = vsel %vm1148_vm3, 0.0, %v1179_v9  ;;  %v3948_v19 = vld [vmem:[#allocation14_spill] sm:$0xff] }
  0x6d   : > { %v1181_v41 = vsel %vm1148_vm3, %v1179_v9, %v1180_v28  ;;  %v1271_v62 = vrot.slane %v1100_v52, 2  ;;  %v1276_v5 = vrot.slane %v1103_v16, 2  ;;  %v1277_v38 = vrot.slane %v1104_v53, 2 }
  0x6e   : > { %v1332_v50 = vsel %vm1245_vm4, %v1265_v1, 0.0  ;;  %v1358_v36 = vmul.f32 %v3946_v48, %v1235_v17  ;;  %v1359_v29 = vmul.f32 %v3946_v48, %v1169_v23  ;;  %v1362_v4 = vmul.f32 %v3946_v48, %v1237_v24 }
  0x6f   : > { %v1272_v57 = vsel %vm1245_vm4, %v1270_v7, %v1271_v62  ;;  %v1334_v18 = vsel %vm1245_vm4, %v1271_v62, 0.0  ;;  %v1278_v33 = vsel %vm1245_vm4, %v1276_v5, %v1277_v38  ;;  %v1336_v42 = vsel %vm1245_vm4, %v1277_v38, 0.0 }
  0x70   : > { %v1363_v43 = vmul.f32 %v3946_v48, %v1175_v54  ;;  %v1366_v46 = vmul.f32 %v3946_v48, %v1239_v47  ;;  %v1367_v51 = vmul.f32 %v3946_v48, %v1181_v41  ;;  %v1394_v21 = vmul.f32 %v3947_v56, %v1095_v40 }
  0x71   : > { %v1395_v45 = vmul.f32 %v3947_v56, %v1096_v10  ;;  %v1398_v6 = vmul.f32 %v3947_v56, %v1099_v44  ;;  %v1399_v39 = vmul.f32 %v3947_v56, %v1100_v52  ;;  %v1402_v60 = vmul.f32 %v3947_v56, %v1103_v16 }
  0x72   : > { %v1403_v1 = vmul.f32 %v3947_v56, %v1104_v53  ;;  %v1462_v9 = vmul.f32 %v3948_v19, %v1266_v31  ;;  %v1426_v28 = vadd.f32 %v1394_v21, %v1358_v36  ;;  %v1463_v24 = vmul.f32 %v3948_v19, %v1332_v50  ;;  %v3949_v36 = vld [vmem:[#allocation20_spill] sm:$0xff] }
  0x73   : > { %v1427_v17 = vadd.f32 %v1395_v45, %v1359_v29  ;;  %v1430_v23 = vadd.f32 %v1398_v6, %v1362_v4  ;;  %v1431_v7 = vadd.f32 %v1399_v39, %v1363_v43  ;;  %v1434_v54 = vadd.f32 %v1402_v60, %v1366_v46  ;;  %v3957_v6 = vld [vmem:[#allocation17_spill] sm:$0xff]  ;;  %v3958_v60 = vld [vmem:[#allocation2_spill] sm:$0xff] }
  0x74   : > { %v1435_v40 = vadd.f32 %v1403_v1, %v1367_v51  ;;  %v1466_v10 = vmul.f32 %v3948_v19, %v1272_v57  ;;  %v1467_v44 = vmul.f32 %v3948_v19, %v1334_v18  ;;  %v1470_v52 = vmul.f32 %v3948_v19, %v1278_v33  ;;  %v3956_v51 = vld [vmem:[#allocation16_spill] sm:$0xff] }
  0x75   : > { %v1471_v16 = vmul.f32 %v3948_v19, %v1336_v42  ;;  %v1494_v41 = vadd.f32 %v1462_v9, %v1426_v28  ;;  %v1495_v53 = vadd.f32 %v1463_v24, %v1427_v17  ;;  %v610_v31 = vrot.slane %v2904_v2, 1  ;;  %v3959_v17 = vld [vmem:[#allocation18_spill] sm:$0xff] }
  0x76   : > { %v1498_v47 = vadd.f32 %v1466_v10, %v1430_v23  ;;  %v611_v62 = vrot.slane %v2907_v26, 1  ;;  %v1499_v5 = vadd.f32 %v1467_v44, %v1431_v7  ;;  %v1502_v38 = vadd.f32 %v1470_v52, %v1434_v54  ;;  %v3960_v52 = vld [vmem:[#allocation5_spill] sm:$0xff] }
  0x77   : > { %v1503_v50 = vadd.f32 %v1471_v16, %v1435_v40  ;;  %v2964_v29 = vadd.f32 %v3949_v36, %v1494_v41  ;;  %v2967_v57 = vadd.f32 %v3949_v36, %v1495_v53  ;;  %v706_v1 = vmul.f32 %v3958_v60, %v2926_v34  ;;  %v3961_v41 = vld [vmem:[#allocation6_spill] sm:$0xff] }
  0x78   : > { %v2970_v18 = vadd.f32 %v3949_v36, %v1498_v47  ;;  %v612_v4 = vsel %vm597_vm2, %v610_v31, %v611_v62  ;;  %v682_v33 = vsel %vm597_vm2, %v611_v62, 0.0  ;;  %v2975_v42 = vadd.f32 %v3949_v36, %v1499_v5  ;;  %v3962_v31 = vld [vmem:[#allocation3_spill] sm:$0xff]  ;;  %v3963_v5 = vld [vmem:[#allocation4_spill] sm:$0xff] }
  0x79   : > { %3950 = vst [vmem:[#allocation11_spill] sm:$0xff] %v2964_v29  ;;  %3951 = vst [vmem:[#allocation15_spill] sm:$0xff] %v2967_v57  ;;  %v2978_v43 = vadd.f32 %v3949_v36, %v1502_v38  ;;  %v2981_v46 = vadd.f32 %v3949_v36, %v1503_v50  ;;  %v1571_v21 = vmul.f32 %v3956_v51, %v2964_v29 }
  0x7a   : > { %3952 = vst [vmem:[#allocation12_spill] sm:$0xff] %v2970_v18  ;;  %3953 = vst [vmem:[#allocation13_spill] sm:$0xff] %v2975_v42  ;;  %v1572_v45 = vmul.f32 %v3956_v51, %v2967_v57  ;;  %v1607_v39 = vmul.f32 %v3957_v6, %v2970_v18  ;;  %v707_v9 = vmul.f32 %v3958_v60, %v2923_v61 }
  0x7b   : > { %3954 = vst [vmem:[#allocation14_spill] sm:$0xff] %v2978_v43  ;;  %3955 = vst [vmem:[#allocation20_spill] sm:$0xff] %v2981_v46  ;;  %v1608_v28 = vmul.f32 %v3957_v6, %v2975_v42  ;;  %v1675_v23 = vmul.f32 %v3959_v17, %v2978_v43  ;;  %v1676_v24 = vmul.f32 %v3959_v17, %v2981_v46 }
  0x7c   : > { %v742_v7 = vmul.f32 %v2437_v13, %v2904_v2  ;;  %v1639_v54 = vadd.f32 %v1607_v39, %v1571_v21  ;;  %v743_v34 = vmul.f32 %v2437_v13, %v2907_v26  ;;  %v810_v40 = vmul.f32 %v2440_v14, %v612_v4  ;;  %v3964_v4 = vld [vmem:[#allocation7_spill] sm:$0xff]  ;;  %v3965_v21 = vld [vmem:[#allocation8_spill] sm:$0xff]  ;;  %v459_v39 = vld [vmem:[%s2428_s14 + $0xc0] sm:$0xff] }
  0x7d   : > { %v811_v61 = vmul.f32 %v2440_v14, %v682_v33  ;;  %v1640_v10 = vadd.f32 %v1608_v28, %v1572_v45  ;;  %v915_v16 = vmul.f32 %v2444_v15, %v3960_v52  ;;  %v916_v53 = vmul.f32 %v2444_v15, %v3961_v41 }
  0x7e   : > { %v774_v44 = vadd.f32 %v742_v7, %v706_v1  ;;  %v1704_v47 = vadd.f32 %v1675_v23, %v1639_v54  ;;  %v775_v2 = vadd.f32 %v743_v34, %v707_v9  ;;  %v947_v62 = vmul.f32 %v2451_v22, %v3962_v31  ;;  %v3966_v1 = vld [vmem:[#allocation25_spill] sm:$0xff]  ;;  %v3968_v54 = vld [vmem:[#allocation10_spill] sm:$0xff]  ;;  %v3022_v31 = vld [vmem:[%s2428_s14 + $0xc8] sm:$0xff] }
  0x7f   : > { %v948_v26 = vmul.f32 %v2451_v22, %v3963_v5  ;;  %v1705_v38 = vadd.f32 %v1676_v24, %v1640_v10  ;;  %v951_v33 = vmul.f32 %v2451_v22, %v3964_v4  ;;  %v952_v45 = vmul.f32 %v2451_v22, %v3965_v21  ;;  %v3967_v23 = vld [vmem:[#allocation9_spill] sm:$0xff] }
  0x80   : > { %v842_v50 = vadd.f32 %v810_v40, %v774_v44  ;;  %v1743_v28 = vadd.f32 %v3966_v1, %v1704_v47  ;;  %v843_v7 = vadd.f32 %v811_v61, %v775_v2  ;;  %v979_v9 = vadd.f32 %v947_v62, %v3967_v23 }
  0x81   : > { %v980_v34 = vadd.f32 %v948_v26, %v3968_v54  ;;  %v1744_v5 = vadd.f32 %v3966_v1, %v1705_v38  ;;  %v983_v40 = vadd.f32 %v951_v33, %v915_v16  ;;  %v984_v10 = vadd.f32 %v952_v45, %v916_v53 }
  0x82   : > { %v3026_v24 = vadd.f32 %v2497_v30, %v842_v50  ;;  %v3029_v44 = vadd.f32 %v2497_v30, %v843_v7  ;;  %v1015_v47 = vmul.f32 %v3944_v32, %v3960_v52  ;;  %v1016_v61 = vmul.f32 %v3944_v32, %v3961_v41 }
  0x83   : > { %v537_v2 = vrot.slane %v459_v39, 7  ;;  %v1767_v62 = vpack.c.bf16 %v1744_v5, %v1743_v28  ;;  %v538_v38 = vrot.slane %v3022_v31, 7  ;;  %v634_v50 = vrot.slane %v459_v39, 1 }
  0x84   : > { %v1019_v26 = vmul.f32 %v3944_v32, %v3026_v24  ;;  %v1020_v16 = vmul.f32 %v3944_v32, %v3029_v44  ;;  %v1046_v53 = vadd.f32 %v1015_v47, %v979_v9  ;;  %v1047_v33 = vadd.f32 %v1016_v61, %v980_v34 }
  0x85   : > { %v593_v45 = vsel %vm500_vm1, 0.0, %v537_v2  ;;  %2264 = vmatprep.mubr.msk.bf16.mxu1 %vm1783_vm5, %v1767_v62  ;;  %v539_v41 = vsel %vm500_vm1, %v537_v2, %v538_v38  ;;  %v635_v28 = vrot.slane %v3022_v31, 1 }
  0x86   : > { %v1050_v52 = vadd.f32 %v1019_v26, %v983_v40  ;;  %v722_v7 = vmul.f32 %v3958_v60, %v593_v45  ;;  %v1051_v23 = vadd.f32 %v1020_v16, %v984_v10  ;;  %v1085_v54 = vadd.f32 %v3945_v35, %v1046_v53 }
  0x87   : > { %v1086_v5 = vadd.f32 %v3945_v35, %v1047_v33  ;;  %v723_v57 = vmul.f32 %v3958_v60, %v539_v41  ;;  %v636_v34 = vsel %vm597_vm2, %v634_v50, %v635_v28  ;;  %v690_v47 = vsel %vm597_vm2, %v635_v28, 0.0 }
  0x88   : > { %v1089_v9 = vadd.f32 %v3945_v35, %v1050_v52  ;;  %v758_v40 = vmul.f32 %v2437_v13, %v459_v39  ;;  %v1090_v61 = vadd.f32 %v3945_v35, %v1051_v23  ;;  %v1152_v2 = vrot.slane %v1085_v54, 6 }
  0x89   : > { %v1153_v62 = vrot.slane %v1086_v5, 6  ;;  %v1249_v26 = vrot.slane %v1085_v54, 2  ;;  %v1250_v38 = vrot.slane %v1086_v5, 2  ;;  %v1384_v53 = vmul.f32 %v3947_v56, %v1085_v54 }
  0x8a   : > { %v1158_v10 = vrot.slane %v1089_v9, 6  ;;  %v1255_v16 = vrot.slane %v1089_v9, 2  ;;  %v1159_v45 = vrot.slane %v1090_v61, 6  ;;  %v1230_v52 = vsel %vm1148_vm3, 0.0, %v1152_v2 }
  0x8b   : > { %v1154_v33 = vsel %vm1148_vm3, %v1152_v2, %v1153_v62  ;;  %v1256_v50 = vrot.slane %v1090_v61, 2  ;;  %v1251_v39 = vsel %vm1245_vm4, %v1249_v26, %v1250_v38  ;;  %v1327_v28 = vsel %vm1245_vm4, %v1250_v38, 0.0 }
  0x8c   : > { %v1232_v41 = vsel %vm1148_vm3, 0.0, %v1158_v10  ;;  %v1348_v23 = vmul.f32 %v3946_v48, %v1230_v52  ;;  %v1160_v29 = vsel %vm1148_vm3, %v1158_v10, %v1159_v45  ;;  %v1349_v62 = vmul.f32 %v3946_v48, %v1154_v33 }
  0x8d   : > { %v1257_v46 = vsel %vm1245_vm4, %v1255_v16, %v1256_v50  ;;  %v1329_v54 = vsel %vm1245_vm4, %v1256_v50, 0.0  ;;  %v1352_v43 = vmul.f32 %v3946_v48, %v1232_v41  ;;  %v1353_v2 = vmul.f32 %v3946_v48, %v1160_v29 }
  0x8e   : > { %v1385_v42 = vmul.f32 %v3947_v56, %v1086_v5  ;;  %v1388_v26 = vmul.f32 %v3947_v56, %v1089_v9  ;;  %v1389_v38 = vmul.f32 %v3947_v56, %v1090_v61  ;;  %v1416_v18 = vadd.f32 %v1384_v53, %v1348_v23 }
  0x8f   : > { %v1452_v52 = vmul.f32 %v3948_v19, %v1251_v39  ;;  %v1453_v10 = vmul.f32 %v3948_v19, %v1327_v28  ;;  %v1456_v50 = vmul.f32 %v3948_v19, %v1257_v46  ;;  %v1457_v33 = vmul.f32 %v3948_v19, %v1329_v54 }
  0x90   : > { %v1417_v16 = vadd.f32 %v1385_v42, %v1349_v62  ;;  %v1420_v45 = vadd.f32 %v1388_v26, %v1352_v43  ;;  %v1421_v41 = vadd.f32 %v1389_v38, %v1353_v2  ;;  %v759_v29 = vmul.f32 %v2437_v13, %v3022_v31  ;;  %v3969_v62 = vld [vmem:[#allocation19_spill] sm:$0xff] }
  0x91   : > { %v1484_v60 = vadd.f32 %v1452_v52, %v1416_v18  ;;  %v790_v5 = vadd.f32 %v758_v40, %v722_v7  ;;  %v826_v61 = vmul.f32 %v2440_v14, %v636_v34  ;;  %v827_v53 = vmul.f32 %v2440_v14, %v690_v47 }
  0x92   : > { %v1485_v9 = vadd.f32 %v1453_v10, %v1417_v16  ;;  %v1488_v27 = vadd.f32 %v1456_v50, %v1420_v45  ;;  %v1489_v39 = vadd.f32 %v1457_v33, %v1421_v41  ;;  %v791_v43 = vadd.f32 %v759_v29, %v723_v57 }
  0x93   : > { %v3078_v42 = vadd.f32 %v3949_v36, %v1484_v60  ;;  %v923_v46 = vmul.f32 %v2444_v15, %v2840_v58  ;;  %v858_v7 = vadd.f32 %v826_v61, %v790_v5  ;;  %v924_v34 = vmul.f32 %v2444_v15, %v2843_v11 }
  0x94   : > { %v3083_v18 = vadd.f32 %v3949_v36, %v1485_v9  ;;  %v3086_v31 = vadd.f32 %v3949_v36, %v1488_v27  ;;  %v3091_v47 = vadd.f32 %v3949_v36, %v1489_v39  ;;  %v859_v57 = vadd.f32 %v827_v53, %v791_v43 }
  0x95   : > { %v1593_v60 = vmul.f32 %v3957_v6, %v3078_v42  ;;  %v927_v40 = vmul.f32 %v2444_v15, %v2852_v59  ;;  %v3102_v23 = vadd.f32 %v2497_v30, %v858_v7  ;;  %v928_v54 = vmul.f32 %v2444_v15, %v2855_v0 }
  0x96   : > { %v1594_v28 = vmul.f32 %v3957_v6, %v3083_v18  ;;  %v1661_v27 = vmul.f32 %v3959_v17, %v3086_v31  ;;  %v1662_v26 = vmul.f32 %v3959_v17, %v3091_v47  ;;  %v3110_v38 = vadd.f32 %v2497_v30, %v859_v57 }
  0x97   : > { %v1625_v2 = vadd.f32 %v1593_v60, %v3969_v62  ;;  %v931_v52 = vmul.f32 %v2444_v15, %v2864_v8  ;;  %v932_v16 = vmul.f32 %v2444_v15, %v2867_v55  ;;  %v959_v45 = vmul.f32 %v2451_v22, %v2846_v12 }
  0x98   : > { %v1626_v10 = vadd.f32 %v1594_v28, %v3969_v62  ;;  %v960_v50 = vmul.f32 %v2451_v22, %v2849_v63  ;;  %v963_v41 = vmul.f32 %v2451_v22, %v2858_v25  ;;  %v964_v30 = vmul.f32 %v2451_v22, %v2861_v49 }
  0x99   : > { %v1690_v33 = vadd.f32 %v1661_v27, %v1625_v2  ;;  %v967_v29 = vmul.f32 %v2451_v22, %v2870_v3  ;;  %v968_v9 = vmul.f32 %v2451_v22, %v2873_v37  ;;  %v991_v61 = vadd.f32 %v959_v45, %v923_v46 }
  0x9a   : > { %v1691_v5 = vadd.f32 %v1662_v26, %v1626_v10  ;;  %v992_v53 = vadd.f32 %v960_v50, %v924_v34  ;;  %v995_v39 = vadd.f32 %v963_v41, %v927_v40  ;;  %v996_v63 = vadd.f32 %v964_v30, %v928_v54 }
  0x9b   : > { %v1729_v12 = vadd.f32 %v3966_v1, %v1690_v33  ;;  %v999_v43 = vadd.f32 %v967_v29, %v931_v52  ;;  %v1000_v25 = vadd.f32 %v968_v9, %v932_v16  ;;  %v1027_v49 = vmul.f32 %v3944_v32, %v2852_v59 }
  0x9c   : > { %v1730_v7 = vadd.f32 %v3966_v1, %v1691_v5  ;;  %v1028_v60 = vmul.f32 %v3944_v32, %v2855_v0  ;;  %v1031_v57 = vmul.f32 %v3944_v32, %v2864_v8  ;;  %v1032_v46 = vmul.f32 %v3944_v32, %v2867_v55 }
  0x9d   : > { %v1035_v34 = vmul.f32 %v3944_v32, %v3102_v23  ;;  %v1036_v40 = vmul.f32 %v3944_v32, %v3110_v38  ;;  %v1058_v27 = vadd.f32 %v1027_v49, %v991_v61  ;;  %v3145_v59 = vmul.f32 %v2444_v15, %v3964_v4 }
  0x9e   : > { %v1760_v28 = vpack.c.bf16 %v1730_v7, %v1729_v12  ;;  %v1059_v54 = vadd.f32 %v1028_v60, %v992_v53  ;;  %v1062_v0 = vadd.f32 %v1031_v57, %v995_v39  ;;  %v1063_v62 = vadd.f32 %v1032_v46, %v996_v63 }
  0x9f   : > { %v1066_v2 = vadd.f32 %v1035_v34, %v999_v43  ;;  %v1067_v8 = vadd.f32 %v1036_v40, %v1000_v25  ;;  %v1097_v55 = vadd.f32 %v3945_v35, %v1058_v27  ;;  %v3152_v52 = vmul.f32 %v2444_v15, %v3965_v21 }
  0xa0   : > { %2249 = vmatmul.mubr.msk.bf16.vlgmr.msra.gmra.mxu0 %vm1783_vm5, %v1760_v28  ;;  %v1098_v26 = vadd.f32 %v3945_v35, %v1059_v54  ;;  %v953_v10 = vmul.f32 %v2451_v22, %v3026_v24  ;;  %v1101_v4 = vadd.f32 %v3945_v35, %v1062_v0  ;;  %v1102_v16 = vadd.f32 %v3945_v35, %v1063_v62 }
  0xa1   : > { %v1105_v45 = vadd.f32 %v3945_v35, %v1066_v2  ;;  %v1106_v50 = vadd.f32 %v3945_v35, %v1067_v8  ;;  %v1170_v33 = vrot.slane %v1097_v55, 6  ;;  %v1267_v30 = vrot.slane %v1097_v55, 2 }
  0xa2   : > { %v1171_v41 = vrot.slane %v1098_v26, 6  ;;  %v1268_v29 = vrot.slane %v1098_v26, 2  ;;  %v1176_v5 = vrot.slane %v1101_v4, 6  ;;  %v1177_v9 = vrot.slane %v1102_v16, 6 }
  0xa3   : > { %v1182_v61 = vrot.slane %v1105_v45, 6  ;;  %v1183_v21 = vrot.slane %v1106_v50, 6  ;;  %v1236_v12 = vsel %vm1148_vm3, 0.0, %v1170_v33  ;;  %v1273_v63 = vrot.slane %v1101_v4, 2 }
  0xa4   : > { %v1172_v53 = vsel %vm1148_vm3, %v1170_v33, %v1171_v41  ;;  %v1269_v39 = vsel %vm1245_vm4, %v1267_v30, %v1268_v29  ;;  %v1178_v43 = vsel %vm1148_vm3, %v1176_v5, %v1177_v9  ;;  %v1238_v35 = vsel %vm1148_vm3, 0.0, %v1176_v5 }
  0xa5   : > { %v1184_v7 = vsel %vm1148_vm3, %v1182_v61, %v1183_v21  ;;  %v1240_v25 = vsel %vm1148_vm3, 0.0, %v1182_v61  ;;  %v1274_v49 = vrot.slane %v1102_v16, 2  ;;  %v1279_v60 = vrot.slane %v1105_v45, 2 }
  0xa6   : > { %v1280_v57 = vrot.slane %v1106_v50, 2  ;;  %v1333_v46 = vsel %vm1245_vm4, %v1268_v29, 0.0  ;;  %v1360_v34 = vmul.f32 %v3946_v48, %v1236_v12  ;;  %v1361_v40 = vmul.f32 %v3946_v48, %v1172_v53 }
  0xa7   : > { %v1364_v28 = vmul.f32 %v3946_v48, %v1238_v35  ;;  %v1365_v27 = vmul.f32 %v3946_v48, %v1178_v43  ;;  %v1275_v54 = vsel %vm1245_vm4, %v1273_v63, %v1274_v49  ;;  %v1335_v62 = vsel %vm1245_vm4, %v1274_v49, 0.0 }
  0xa8   : > { %v1281_v0 = vsel %vm1245_vm4, %v1279_v60, %v1280_v57  ;;  %v1337_v2 = vsel %vm1245_vm4, %v1280_v57, 0.0  ;;  %v1368_v8 = vmul.f32 %v3946_v48, %v1240_v25  ;;  %v1369_v33 = vmul.f32 %v3946_v48, %v1184_v7 }
  0xa9   : > { %v1396_v41 = vmul.f32 %v3947_v56, %v1097_v55  ;;  %v1397_v30 = vmul.f32 %v3947_v56, %v1098_v26  ;;  %v1400_v29 = vmul.f32 %v3947_v56, %v1101_v4  ;;  %v1401_v5 = vmul.f32 %v3947_v56, %v1102_v16 }
  0xaa   : > { %v1404_v9 = vmul.f32 %v3947_v56, %v1105_v45  ;;  %v1405_v61 = vmul.f32 %v3947_v56, %v1106_v50  ;;  %v1464_v12 = vmul.f32 %v3948_v19, %v1269_v39  ;;  %v1465_v63 = vmul.f32 %v3948_v19, %v1333_v46 }
  0xab   : > { %v1428_v21 = vadd.f32 %v1396_v41, %v1360_v34  ;;  %v1429_v53 = vadd.f32 %v1397_v30, %v1361_v40  ;;  %v1432_v43 = vadd.f32 %v1400_v29, %v1364_v28  ;;  %v1433_v7 = vadd.f32 %v1401_v5, %v1365_v27  ;;  %v461_v30 = vld [vmem:[%s2428_s14 + $0xd0] sm:$0xff]  ;;  %v462_v29 = vld [vmem:[%s2428_s14 + $0xd8] sm:$0xff] }
  0xac   : > { %v1436_v35 = vadd.f32 %v1404_v9, %v1368_v8  ;;  %v1437_v55 = vadd.f32 %v1405_v61, %v1369_v33  ;;  %v1468_v26 = vmul.f32 %v3948_v19, %v1275_v54  ;;  %v1469_v4 = vmul.f32 %v3948_v19, %v1335_v62  ;;  %v3972_v8 = vld [vmem:[#allocation26_spill] sm:$0xff] }
  0xad   : > { %v1472_v16 = vmul.f32 %v3948_v19, %v1281_v0  ;;  %v1473_v45 = vmul.f32 %v3948_v19, %v1337_v2  ;;  %v1496_v25 = vadd.f32 %v1464_v12, %v1428_v21  ;;  %v1497_v50 = vadd.f32 %v1465_v63, %v1429_v53  ;;  %v3233_v53 = vld [vmem:[%s3852_s5] ss:$0 sm:$0xff]  ;;  %v3973_v63 = vld [vmem:[#allocation21_spill] sm:$0xff] }
  0xae   : > { %v954_v49 = vmul.f32 %v2451_v22, %v3029_v44  ;;  %v985_v39 = vadd.f32 %v953_v10, %v3145_v59  ;;  %v1500_v60 = vadd.f32 %v1468_v26, %v1432_v43  ;;  %v1501_v57 = vadd.f32 %v1469_v4, %v1433_v7  ;;  %v3974_v7 = vld [vmem:[#allocation22_spill] sm:$0xff] }
  0xaf   : > { %v1504_v46 = vadd.f32 %v1472_v16, %v1436_v35  ;;  %v1505_v34 = vadd.f32 %v1473_v45, %v1437_v55  ;;  %v3194_v40 = vadd.f32 %v3949_v36, %v1496_v25  ;;  %v3197_v28 = vadd.f32 %v3949_v36, %v1497_v50 }
  0xb0   : > { %v986_v27 = vadd.f32 %v954_v49, %v3152_v52  ;;  %v1021_v54 = vmul.f32 %v3944_v32, %v2834_v20  ;;  %v3203_v0 = vadd.f32 %v3949_v36, %v1500_v60  ;;  %v3206_v59 = vadd.f32 %v3949_v36, %v1501_v57  ;;  %v3975_v57 = vld [vmem:[#allocation23_spill] sm:$0xff] }
  0xb1   : > { %v3209_v10 = vadd.f32 %v3949_v36, %v1504_v46  ;;  %v3212_v62 = vadd.f32 %v3949_v36, %v1505_v34  ;;  %v1573_v2 = vmul.f32 %v3956_v51, %v3194_v40  ;;  %v1574_v52 = vmul.f32 %v3956_v51, %v3197_v28  ;;  %v3976_v34 = vld [vmem:[#allocation24_spill] sm:$0xff] }
  0xb2   : > { %3970 = vst [vmem:[#allocation16_spill] sm:$0xff] %v3203_v0  ;;  %3971 = vst [vmem:[#allocation17_spill] sm:$0xff] %v3206_v59  ;;  %v1022_v33 = vmul.f32 %v3944_v32, %v3972_v8  ;;  %v1052_v41 = vadd.f32 %v1021_v54, %v985_v39  ;;  %v1609_v5 = vmul.f32 %v3957_v6, %v3203_v0  ;;  %v540_v4 = vrot.slane %v461_v30, 7 }
  0xb3   : > { %v1610_v9 = vmul.f32 %v3957_v6, %v3206_v59  ;;  %v1677_v36 = vmul.f32 %v3959_v17, %v3209_v10  ;;  %v1678_v61 = vmul.f32 %v3959_v17, %v3212_v62  ;;  %v1595_v43 = vmul.f32 %v3957_v6, %v3973_v63 }
  0xb4   : > { %v1053_v21 = vadd.f32 %v1022_v33, %v986_v27  ;;  %v1091_v12 = vadd.f32 %v3233_v53, %v1052_v41  ;;  %v1596_v35 = vmul.f32 %v3957_v6, %v3974_v7  ;;  %v1641_v55 = vadd.f32 %v1609_v5, %v1573_v2 }
  0xb5   : > { %v1642_v26 = vadd.f32 %v1610_v9, %v1574_v52  ;;  %v541_v16 = vrot.slane %v462_v29, 7  ;;  %v1627_v46 = vadd.f32 %v1595_v43, %v3975_v57  ;;  %v594_v43 = vsel %vm500_vm1, 0.0, %v540_v4  ;;  %v3977_v57 = vld [vmem:[#allocation2_spill] sm:$0xff] }
  0xb6   : > { %v1092_v45 = vadd.f32 %v3233_v53, %v1053_v21  ;;  %v1161_v25 = vrot.slane %v1091_v12, 6  ;;  %v1258_v50 = vrot.slane %v1091_v12, 2  ;;  %v1390_v49 = vmul.f32 %v3947_v56, %v1091_v12 }
  0xb7   : > { %v1706_v39 = vadd.f32 %v1677_v36, %v1641_v55  ;;  %v1707_v60 = vadd.f32 %v1678_v61, %v1642_v26  ;;  %v1628_v27 = vadd.f32 %v1596_v35, %v3976_v34  ;;  %v542_v21 = vsel %vm500_vm1, %v540_v4, %v541_v16 }
  0xb8   : > { %v1162_v54 = vrot.slane %v1092_v45, 6  ;;  %v1233_v33 = vsel %vm1148_vm3, 0.0, %v1161_v25  ;;  %v1259_v41 = vrot.slane %v1092_v45, 2  ;;  %v1391_v2 = vmul.f32 %v3947_v56, %v1092_v45 }
  0xb9   : > { %v1745_v52 = vadd.f32 %v3966_v1, %v1706_v39  ;;  %v1746_v5 = vadd.f32 %v3966_v1, %v1707_v60  ;;  %v1354_v9 = vmul.f32 %v3946_v48, %v1233_v33  ;;  %v637_v39 = vrot.slane %v461_v30, 1 }
  0xba   : > { %v1163_v36 = vsel %vm1148_vm3, %v1161_v25, %v1162_v54  ;;  %v1260_v61 = vsel %vm1245_vm4, %v1258_v50, %v1259_v41  ;;  %v1330_v12 = vsel %vm1245_vm4, %v1259_v41, 0.0  ;;  %v638_v60 = vrot.slane %v462_v29, 1 }
  0xbb   : > { %v1768_v35 = vpack.c.bf16 %v1746_v5, %v1745_v52  ;;  %v1355_v55 = vmul.f32 %v3946_v48, %v1163_v36  ;;  %v1422_v26 = vadd.f32 %v1390_v49, %v1354_v9  ;;  %v1458_v45 = vmul.f32 %v3948_v19, %v1260_v61  ;;  %v3269_v5 = vld [vmem:[%s3854_s7] ss:$0 sm:$0xff] }
  0xbc   : > { %v1459_v1 = vmul.f32 %v3948_v19, %v1330_v12  ;;  %v724_v16 = vmul.f32 %v3977_v57, %v594_v43  ;;  %v725_v34 = vmul.f32 %v3977_v57, %v542_v21  ;;  %v760_v4 = vmul.f32 %v2437_v13, %v461_v30 }
  0xbd   : > { %2265 = vmatmul.mubr.msk.bf16.vlgmr.msra.gmra.mxu1 %vm1783_vm5, %v1768_v35  ;;  %v1423_v25 = vadd.f32 %v1391_v2, %v1355_v55  ;;  %v1490_v50 = vadd.f32 %v1458_v45, %v1422_v26  ;;  %v639_v54 = vsel %vm597_vm2, %v637_v39, %v638_v60  ;;  %v691_v49 = vsel %vm597_vm2, %v638_v60, 0.0  ;;  %v3978_v45 = vld [vmem:[#allocation12_spill] sm:$0xff]  ;;  %v3979_v39 = vld [vmem:[#allocation13_spill] sm:$0xff] }
  0xbe   : > { %v761_v33 = vmul.f32 %v2437_v13, %v462_v29  ;;  %v933_v41 = vmul.f32 %v2444_v15, %v2870_v3  ;;  %v792_v9 = vadd.f32 %v760_v4, %v724_v16  ;;  %v828_v30 = vmul.f32 %v2440_v14, %v639_v54  ;;  %v3980_v54 = vld [vmem:[#allocation14_spill] sm:$0xff] }
  0xbf   : > { %v1491_v52 = vadd.f32 %v1459_v1, %v1423_v25  ;;  %v3272_v2 = vadd.f32 %v3269_v5, %v1490_v50  ;;  %v829_v36 = vmul.f32 %v2440_v14, %v691_v49  ;;  %v934_v29 = vmul.f32 %v2444_v15, %v2873_v37  ;;  %v3296_v25 = vld [vmem:[%s3850_s3] ss:$0 sm:$0xff] }
  0xc0   : > { %v793_v21 = vadd.f32 %v761_v33, %v725_v34  ;;  %v969_v3 = vmul.f32 %v2451_v22, %v3102_v23  ;;  %v860_v43 = vadd.f32 %v828_v30, %v792_v9  ;;  %v970_v35 = vmul.f32 %v2451_v22, %v3110_v38  ;;  %v3981_v33 = vld [vmem:[#allocation20_spill] sm:$0xff]  ;;  %v3313_v9 = vld [vmem:[%s3856_s9] ss:$0 sm:$0xff] }
  0xc1   : > { %v3281_v61 = vadd.f32 %v3269_v5, %v1491_v52  ;;  %v1663_v12 = vmul.f32 %v3959_v17, %v3272_v2  ;;  %v1575_v1 = vmul.f32 %v3956_v51, %v3978_v45  ;;  %v1576_v37 = vmul.f32 %v3956_v51, %v3979_v39 }
  0xc2   : > { %v861_v55 = vadd.f32 %v829_v36, %v793_v21  ;;  %v1001_v26 = vadd.f32 %v969_v3, %v933_v41  ;;  %v3299_v50 = vadd.f32 %v3296_v25, %v860_v43  ;;  %v1002_v34 = vadd.f32 %v970_v35, %v934_v29 }
  0xc3   : > { %v1664_v60 = vmul.f32 %v3959_v17, %v3281_v61  ;;  %v1692_v16 = vadd.f32 %v1663_v12, %v1627_v46  ;;  %v1611_v49 = vmul.f32 %v3957_v6, %v3980_v54  ;;  %v1612_v41 = vmul.f32 %v3957_v6, %v3981_v33 }
  0xc4   : > { %v3302_v4 = vadd.f32 %v3296_v25, %v861_v55  ;;  %v919_v46 = vmul.f32 %v2444_v15, %v3026_v24  ;;  %v1037_v21 = vmul.f32 %v3944_v32, %v3299_v50  ;;  %v920_v36 = vmul.f32 %v2444_v15, %v3029_v44 }
  0xc5   : > { %v1693_v52 = vadd.f32 %v1664_v60, %v1628_v27  ;;  %v1731_v30 = vadd.f32 %v3313_v9, %v1692_v16  ;;  %v3322_v3 = vadd.f32 %v1611_v49, %v1575_v1  ;;  %v3324_v24 = vadd.f32 %v1612_v41, %v1576_v37 }
  0xc6   : > { %v1038_v29 = vmul.f32 %v3944_v32, %v3302_v4  ;;  %v955_v27 = vmul.f32 %v2451_v22, %v2834_v20  ;;  %v1068_v43 = vadd.f32 %v1037_v21, %v1001_v26  ;;  %v956_v35 = vmul.f32 %v2451_v22, %v3972_v8 }
  0xc7   : > { %v1732_v12 = vadd.f32 %v3313_v9, %v1693_v52  ;;  %v1023_v55 = vmul.f32 %v3944_v32, %v2840_v58  ;;  %v1024_v1 = vmul.f32 %v3944_v32, %v2843_v11  ;;  %v1561_v37 = vmul.f32 %v3956_v51, %v3078_v42 }
  0xc8   : > { %v1069_v44 = vadd.f32 %v1038_v29, %v1002_v34  ;;  %v987_v60 = vadd.f32 %v955_v27, %v919_v46  ;;  %v1107_v20 = vadd.f32 %v3233_v53, %v1068_v43  ;;  %v988_v49 = vadd.f32 %v956_v35, %v920_v36 }
  0xc9   : > { %v1761_v16 = vpack.c.bf16 %v1732_v12, %v1731_v30  ;;  %v1562_v26 = vmul.f32 %v3956_v51, %v3083_v18  ;;  %v1597_v58 = vmul.f32 %v3957_v6, %v3086_v31  ;;  %v1598_v34 = vmul.f32 %v3957_v6, %v3091_v47 }
  0xca   : > { %v1108_v8 = vadd.f32 %v3233_v53, %v1069_v44  ;;  %v1054_v41 = vadd.f32 %v1023_v55, %v987_v60  ;;  %v1185_v11 = vrot.slane %v1107_v20, 6  ;;  %v1282_v42 = vrot.slane %v1107_v20, 2 }
  0xcb   : > { %2252 = vmatprep.mubr.msk.bf16.mxu0 %vm1783_vm5, %v1761_v16  ;;  %v1406_v46 = vmul.f32 %v3947_v56, %v1107_v20  ;;  %v1055_v52 = vadd.f32 %v1024_v1, %v988_v49  ;;  %v3351_v12 = vadd.f32 %v1597_v58, %v1561_v37  ;;  %v3353_v43 = vadd.f32 %v1598_v34, %v1562_v26 }
  0xcc   : > { %v1186_v30 = vrot.slane %v1108_v8, 6  ;;  %v1283_v21 = vrot.slane %v1108_v8, 2  ;;  %v1407_v18 = vmul.f32 %v3947_v56, %v1108_v8  ;;  %v1093_v36 = vadd.f32 %v3233_v53, %v1054_v41 }
  0xcd   : > { %v1241_v29 = vsel %vm1148_vm3, 0.0, %v1185_v11  ;;  %v1094_v27 = vadd.f32 %v3233_v53, %v1055_v52  ;;  %v3366_v52 = vld [vmem:[%s2428_s14 + $0xe0] sm:$0xff] }
  0xce   : > { %v1187_v35 = vsel %vm1148_vm3, %v1185_v11, %v1186_v30  ;;  %v1284_v55 = vsel %vm1245_vm4, %v1282_v42, %v1283_v21  ;;  %v1338_v44 = vsel %vm1245_vm4, %v1283_v21, 0.0  ;;  %v1370_v60 = vmul.f32 %v3946_v48, %v1241_v29  ;;  %3982 = vst [vmem:[#allocation18_spill] sm:$0xff] %v3366_v52  ;;  %v3369_v30 = vld [vmem:[%s2428_s14 + $0xe8] sm:$0xff] }
  0xcf   : > { %v1371_v1 = vmul.f32 %v3946_v48, %v1187_v35  ;;  %v1474_v16 = vmul.f32 %v3948_v19, %v1284_v55  ;;  %v1475_v20 = vmul.f32 %v3948_v19, %v1338_v44  ;;  %v1164_v37 = vrot.slane %v1093_v36, 6  ;;  %3983 = vst [vmem:[#allocation5_spill] sm:$0xff] %v3369_v30 }
  0xd0   : > { %v1438_v49 = vadd.f32 %v1406_v46, %v1370_v60  ;;  %v1165_v26 = vrot.slane %v1094_v27, 6  ;;  %v1261_v8 = vrot.slane %v1093_v36, 2  ;;  %v1262_v41 = vrot.slane %v1094_v27, 2 }
  0xd1   : > { %v1439_v58 = vadd.f32 %v1407_v18, %v1371_v1  ;;  %v1234_v34 = vsel %vm1148_vm3, 0.0, %v1164_v37  ;;  %v1392_v11 = vmul.f32 %v3947_v56, %v1093_v36  ;;  %v1393_v42 = vmul.f32 %v3947_v56, %v1094_v27 }
  0xd2   : > { %v1506_v21 = vadd.f32 %v1474_v16, %v1438_v49  ;;  %v1166_v29 = vsel %vm1148_vm3, %v1164_v37, %v1165_v26  ;;  %v1263_v35 = vsel %vm1245_vm4, %v1261_v8, %v1262_v41  ;;  %v1331_v46 = vsel %vm1245_vm4, %v1262_v41, 0.0 }
  0xd3   : > { %v1507_v55 = vadd.f32 %v1475_v20, %v1439_v58  ;;  %v1356_v18 = vmul.f32 %v3946_v48, %v1234_v34  ;;  %v1357_v44 = vmul.f32 %v3946_v48, %v1166_v29  ;;  %v1460_v36 = vmul.f32 %v3948_v19, %v1263_v35 }
  0xd4   : > { %v3378_v27 = vadd.f32 %v3269_v5, %v1506_v21  ;;  %v1461_v60 = vmul.f32 %v3948_v19, %v1331_v46  ;;  %v543_v1 = vrot.slane %v3366_v52, 7  ;;  %v544_v16 = vrot.slane %v3369_v30, 7 }
  0xd5   : > { %v3384_v37 = vadd.f32 %v3269_v5, %v1507_v55  ;;  %v1424_v49 = vadd.f32 %v1392_v11, %v1356_v18  ;;  %v1425_v20 = vadd.f32 %v1393_v42, %v1357_v44  ;;  %v640_v26 = vrot.slane %v3366_v52, 1 }
  0xd6   : > { %v1679_v8 = vmul.f32 %v3959_v17, %v3378_v27  ;;  %v545_v41 = vsel %vm500_vm1, %v543_v1, %v544_v16  ;;  %v595_v58 = vsel %vm500_vm1, 0.0, %v543_v1  ;;  %v641_v34 = vrot.slane %v3369_v30, 1 }
  0xd7   : > { %v1680_v21 = vmul.f32 %v3959_v17, %v3384_v37  ;;  %v1492_v29 = vadd.f32 %v1460_v36, %v1424_v49  ;;  %v1493_v35 = vadd.f32 %v1461_v60, %v1425_v20  ;;  %v726_v46 = vmul.f32 %v3977_v57, %v595_v58 }
  0xd8   : > { %v1708_v11 = vadd.f32 %v1679_v8, %v3322_v3  ;;  %v642_v42 = vsel %vm597_vm2, %v640_v26, %v641_v34  ;;  %v692_v55 = vsel %vm597_vm2, %v641_v34, 0.0  ;;  %v727_v18 = vmul.f32 %v3977_v57, %v545_v41 }
  0xd9   : > { %v1709_v44 = vadd.f32 %v1680_v21, %v3324_v24  ;;  %v3401_v1 = vadd.f32 %v3269_v5, %v1492_v29  ;;  %v3404_v16 = vadd.f32 %v3269_v5, %v1493_v35  ;;  %v762_v36 = vmul.f32 %v2437_v13, %v3366_v52 }
  0xda   : > { %v1747_v60 = vadd.f32 %v3313_v9, %v1708_v11  ;;  %v763_v3 = vmul.f32 %v2437_v13, %v3369_v30  ;;  %v830_v49 = vmul.f32 %v2440_v14, %v642_v42  ;;  %v831_v20 = vmul.f32 %v2440_v14, %v692_v55 }
  0xdb   : > { %v1748_v24 = vadd.f32 %v3313_v9, %v1709_v44  ;;  %v1665_v26 = vmul.f32 %v3959_v17, %v3401_v1  ;;  %v1666_v8 = vmul.f32 %v3959_v17, %v3404_v16  ;;  %v794_v41 = vadd.f32 %v762_v36, %v726_v46 }
  0xdc   : > { %v795_v58 = vadd.f32 %v763_v3, %v727_v18  ;;  %v935_v34 = vmul.f32 %v2444_v15, %v3102_v23  ;;  %v936_v21 = vmul.f32 %v2444_v15, %v3110_v38  ;;  %v971_v29 = vmul.f32 %v2451_v22, %v3299_v50 }
  0xdd   : > { %v1769_v35 = vpack.c.bf16 %v1748_v24, %v1747_v60  ;;  %v1694_v11 = vadd.f32 %v1665_v26, %v3351_v12  ;;  %v1695_v42 = vadd.f32 %v1666_v8, %v3353_v43  ;;  %v862_v55 = vadd.f32 %v830_v49, %v794_v41 }
  0xde   : > { %v863_v44 = vadd.f32 %v831_v20, %v795_v58  ;;  %v972_v46 = vmul.f32 %v2451_v22, %v3302_v4  ;;  %v1003_v18 = vadd.f32 %v971_v29, %v935_v34  ;;  %v1577_v23 = vmul.f32 %v3956_v51, %v3203_v0  ;;  %v3452_v58 = vld [vmem:[%s2428_s14 + $0xf0] sm:$0xff]  ;;  %v3455_v34 = vld [vmem:[%s2428_s14 + $0xf8] sm:$0xff] }
  0xdf   : > { %2268 = vmatprep.mubr.msk.bf16.mxu1 %vm1783_vm5, %v1769_v35  ;;  %v1733_v38 = vadd.f32 %v3313_v9, %v1694_v11  ;;  %v1734_v36 = vadd.f32 %v3313_v9, %v1695_v42  ;;  %v3434_v12 = vadd.f32 %v3296_v25, %v862_v55  ;;  %v1578_v43 = vmul.f32 %v3956_v51, %v3206_v59  ;;  %v3984_v42 = vld [vmem:[#allocation11_spill] sm:$0xff] }
  0xe0   : > { %v3439_v60 = vadd.f32 %v3296_v25, %v863_v44  ;;  %v1004_v3 = vadd.f32 %v972_v46, %v936_v21  ;;  %v1613_v49 = vmul.f32 %v3957_v6, %v3209_v10  ;;  %v1614_v20 = vmul.f32 %v3957_v6, %v3212_v62  ;;  %v3985_v44 = vld [vmem:[#allocation15_spill] sm:$0xff] }
  0xe1   : > { %v1762_v24 = vpack.c.bf16 %v1734_v36, %v1733_v38  ;;  %v1039_v26 = vmul.f32 %v3944_v32, %v3434_v12  ;;  %v1563_v8 = vmul.f32 %v3956_v51, %v3973_v63  ;;  %v1564_v41 = vmul.f32 %v3956_v51, %v3974_v7 }
  0xe2   : > { %v1040_v21 = vmul.f32 %v3944_v32, %v3439_v60  ;;  %v3459_v29 = vadd.f32 %v1613_v49, %v1577_v23  ;;  %v3461_v35 = vadd.f32 %v1614_v20, %v1578_v43  ;;  %v1599_v11 = vmul.f32 %v3957_v6, %v3272_v2 }
  0xe3   : > { %2253 = vmatmul.mubr.msk.bf16.gmra.mxu0 %vm1783_vm5, %v1762_v24  ;;  %v1070_v63 = vadd.f32 %v1039_v26, %v1003_v18  ;;  %v1600_v7 = vmul.f32 %v3957_v6, %v3281_v61  ;;  %v1667_v55 = vmul.f32 %v3959_v17, %v3984_v42  ;;  %v1668_v46 = vmul.f32 %v3959_v17, %v3985_v44 }
  0xe4   : > { %v1071_v38 = vadd.f32 %v1040_v21, %v1004_v3  ;;  %v1631_v23 = vadd.f32 %v1599_v11, %v1563_v8  ;;  %v546_v36 = vrot.slane %v3452_v58, 7  ;;  %v547_v43 = vrot.slane %v3455_v34, 7 }
  0xe5   : > { %v1109_v49 = vadd.f32 %v3233_v53, %v1070_v63  ;;  %v1632_v20 = vadd.f32 %v1600_v7, %v1564_v41  ;;  %v643_v18 = vrot.slane %v3452_v58, 1  ;;  %v644_v24 = vrot.slane %v3455_v34, 1 }
  0xe6   : > { %v1110_v26 = vadd.f32 %v3233_v53, %v1071_v38  ;;  %v1696_v30 = vadd.f32 %v1667_v55, %v1631_v23  ;;  %v548_v52 = vsel %vm500_vm1, %v546_v36, %v547_v43  ;;  %v596_v59 = vsel %vm500_vm1, 0.0, %v546_v36 }
  0xe7   : > { %v1188_v3 = vrot.slane %v1109_v49, 6  ;;  %v1285_v8 = vrot.slane %v1109_v49, 2  ;;  %v1408_v21 = vmul.f32 %v3947_v56, %v1109_v49  ;;  %v1697_v11 = vadd.f32 %v1668_v46, %v1632_v20 }
  0xe8   : > { %v1189_v0 = vrot.slane %v1110_v26, 6  ;;  %v1286_v39 = vrot.slane %v1110_v26, 2  ;;  %v1409_v41 = vmul.f32 %v3947_v56, %v1110_v26  ;;  %v1735_v63 = vadd.f32 %v3313_v9, %v1696_v30 }
  0xe9   : > { %v1242_v7 = vsel %vm1148_vm3, 0.0, %v1188_v3  ;;  %v1736_v38 = vadd.f32 %v3313_v9, %v1697_v11  ;;  %v645_v55 = vsel %vm597_vm2, %v643_v18, %v644_v24  ;;  %v693_v23 = vsel %vm597_vm2, %v644_v24, 0.0 }
  0xea   : > { %v1190_v36 = vsel %vm1148_vm3, %v1188_v3, %v1189_v0  ;;  %v1287_v43 = vsel %vm1245_vm4, %v1285_v8, %v1286_v39  ;;  %v1339_v46 = vsel %vm1245_vm4, %v1286_v39, 0.0  ;;  %v1372_v49 = vmul.f32 %v3946_v48, %v1242_v7 }
  0xeb   : > { %v1373_v20 = vmul.f32 %v3946_v48, %v1190_v36  ;;  %v1476_v30 = vmul.f32 %v3948_v19, %v1287_v43  ;;  %v1477_v26 = vmul.f32 %v3948_v19, %v1339_v46  ;;  %v1763_v45 = vpack.c.bf16 %v1736_v38, %v1735_v63 }
  0xec   : > { %v1440_v11 = vadd.f32 %v1408_v21, %v1372_v49  ;;  %v728_v18 = vmul.f32 %v3977_v57, %v596_v59  ;;  %v729_v24 = vmul.f32 %v3977_v57, %v548_v52  ;;  %v764_v0 = vmul.f32 %v2437_v13, %v3452_v58 }
  0xed   : > { %v1441_v3 = vadd.f32 %v1409_v41, %v1373_v20  ;;  %2256 = vmatprep.mubr.msk.bf16.mxu0 %vm1783_vm5, %v1763_v45  ;;  %v765_v39 = vmul.f32 %v2437_v13, %v3455_v34  ;;  %v832_v8 = vmul.f32 %v2440_v14, %v645_v55  ;;  %v833_v7 = vmul.f32 %v2440_v14, %v693_v23 }
  0xee   : > { %v1508_v36 = vadd.f32 %v1476_v30, %v1440_v11  ;;  %v796_v63 = vadd.f32 %v764_v0, %v728_v18  ;;  %v937_v59 = vmul.f32 %v2444_v15, %v3299_v50  ;;  %v938_v57 = vmul.f32 %v2444_v15, %v3302_v4 }
  0xef   : > { %v1509_v52 = vadd.f32 %v1477_v26, %v1441_v3  ;;  %v797_v21 = vadd.f32 %v765_v39, %v729_v24  ;;  %v973_v45 = vmul.f32 %v2451_v22, %v3434_v12  ;;  %v974_v13 = vmul.f32 %v2451_v22, %v3439_v60 }
  0xf0   : > { %v3512_v41 = vadd.f32 %v3269_v5, %v1508_v36  ;;  %v864_v14 = vadd.f32 %v832_v8, %v796_v63  ;;  %v1579_v38 = vmul.f32 %v3956_v51, %v3980_v54  ;;  %v1580_v50 = vmul.f32 %v3956_v51, %v3981_v33 }
  0xf1   : > { %v3519_v4 = vadd.f32 %v3269_v5, %v1509_v52  ;;  %v865_v55 = vadd.f32 %v833_v7, %v797_v21  ;;  %v1005_v23 = vadd.f32 %v973_v45, %v937_v59  ;;  %v1006_v43 = vadd.f32 %v974_v13, %v938_v57 }
  0xf2   : > { %v1681_v46 = vmul.f32 %v3959_v17, %v3512_v41  ;;  %v903_v49 = vadd.f32 %v3296_v25, %v864_v14  ;;  %v1615_v20 = vmul.f32 %v3957_v6, %v3378_v27  ;;  %v1616_v54 = vmul.f32 %v3957_v6, %v3384_v37 }
  0xf3   : > { %v1682_v33 = vmul.f32 %v3959_v17, %v3519_v4  ;;  %v904_v30 = vadd.f32 %v3296_v25, %v865_v55  ;;  %v1565_v26 = vmul.f32 %v3956_v51, %v3086_v31  ;;  %v1566_v11 = vmul.f32 %v3956_v51, %v3091_v47 }
  0xf4   : > { %v1710_v18 = vadd.f32 %v1681_v46, %v3459_v29  ;;  %v1041_v24 = vmul.f32 %v3944_v32, %v903_v49  ;;  %v3537_v0 = vadd.f32 %v1615_v20, %v1579_v38  ;;  %v3539_v3 = vadd.f32 %v1616_v54, %v1580_v50 }
  0xf5   : > { %v1711_v39 = vadd.f32 %v1682_v33, %v3461_v35  ;;  %v1042_v8 = vmul.f32 %v3944_v32, %v904_v30  ;;  %v1601_v25 = vmul.f32 %v3957_v6, %v3401_v1  ;;  %v1602_v31 = vmul.f32 %v3957_v6, %v3404_v16 }
  0xf6   : > { %v1749_v47 = vadd.f32 %v3313_v9, %v1710_v18  ;;  %v1072_v7 = vadd.f32 %v1041_v24, %v1005_v23  ;;  %v1669_v29 = vmul.f32 %v3959_v17, %v3194_v40  ;;  %v1670_v36 = vmul.f32 %v3959_v17, %v3197_v28 }
  0xf7   : > { %v1750_v63 = vadd.f32 %v3313_v9, %v1711_v39  ;;  %v1073_v35 = vadd.f32 %v1042_v8, %v1006_v43  ;;  %v1633_v59 = vadd.f32 %v1601_v25, %v1565_v26  ;;  %v1634_v57 = vadd.f32 %v1602_v31, %v1566_v11 }
  0xf8   : > { %v1111_v52 = vadd.f32 %v3233_v53, %v1072_v7  ;;  %v939_v21 = vmul.f32 %v2444_v15, %v3434_v12  ;;  %v940_v45 = vmul.f32 %v2444_v15, %v3439_v60  ;;  %v975_v13 = vmul.f32 %v2451_v22, %v903_v49 }
  0xf9   : > { %v1770_v14 = vpack.c.bf16 %v1750_v63, %v1749_v47  ;;  %v1112_v38 = vadd.f32 %v3233_v53, %v1073_v35  ;;  %v1698_v50 = vadd.f32 %v1669_v29, %v1633_v59  ;;  %v1699_v55 = vadd.f32 %v1670_v36, %v1634_v57 }
  0xfa   : > { %v1191_v23 = vrot.slane %v1111_v52, 6  ;;  %v1288_v46 = vrot.slane %v1111_v52, 2  ;;  %v1410_v43 = vmul.f32 %v3947_v56, %v1111_v52  ;;  %v976_v20 = vmul.f32 %v2451_v22, %v904_v30 }
  0xfb   : > { %2269 = vmatmul.mubr.msk.bf16.gmra.mxu1 %vm1783_vm5, %v1770_v14  ;;  %v1192_v54 = vrot.slane %v1112_v38, 6  ;;  %v1289_v12 = vrot.slane %v1112_v38, 2  ;;  %v1411_v33 = vmul.f32 %v3947_v56, %v1112_v38  ;;  %v1737_v15 = vadd.f32 %v3313_v9, %v1698_v50 }
  0xfc   : > { %v1243_v60 = vsel %vm1148_vm3, 0.0, %v1191_v23  ;;  %v1738_v49 = vadd.f32 %v3313_v9, %v1699_v55  ;;  %v1007_v26 = vadd.f32 %v975_v13, %v939_v21  ;;  %v1008_v11 = vadd.f32 %v976_v20, %v940_v45  ;;  %v3987_v20 = vld [vmem:[#allocation13_spill] sm:$0xff] }
  0xfd   : > { %v1193_v18 = vsel %vm1148_vm3, %v1191_v23, %v1192_v54  ;;  %v1290_v24 = vsel %vm1245_vm4, %v1288_v46, %v1289_v12  ;;  %v1340_v22 = vsel %vm1245_vm4, %v1289_v12, 0.0  ;;  %v1374_v30 = vmul.f32 %v3946_v48, %v1243_v60  ;;  %v3986_v46 = vld [vmem:[#allocation12_spill] sm:$0xff] }
  0xfe   : > { %v1375_v39 = vmul.f32 %v3946_v48, %v1193_v18  ;;  %v1478_v8 = vmul.f32 %v3948_v19, %v1290_v24  ;;  %v1479_v25 = vmul.f32 %v3948_v19, %v1340_v22  ;;  %v1764_v31 = vpack.c.bf16 %v1738_v49, %v1737_v15 }
  0xff   : > { %v1442_v47 = vadd.f32 %v1410_v43, %v1374_v30  ;;  %v1043_v7 = vmul.f32 0.0, %v3944_v32  ;;  %v1581_v29 = vmul.f32 %v3956_v51, %v3209_v10  ;;  %v1582_v36 = vmul.f32 %v3956_v51, %v3212_v62 }
 0x100   : > { %v1443_v63 = vadd.f32 %v1411_v33, %v1375_v39  ;;  %2257 = vmatmul.mubr.msk.bf16.gmra.mxu0 %vm1783_vm5, %v1764_v31  ;;  %v1617_v35 = vmul.f32 %v3957_v6, %v3512_v41  ;;  %v1618_v59 = vmul.f32 %v3957_v6, %v3519_v4  ;;  %v1567_v57 = vmul.f32 %v3956_v51, %v3272_v2 }
 0x101   : > { %v1510_v52 = vadd.f32 %v1478_v8, %v1442_v47  ;;  %v1074_v32 = vadd.f32 %v1043_v7, %v1007_v26  ;;  %v1075_v21 = vadd.f32 %v1043_v7, %v1008_v11  ;;  %v1568_v10 = vmul.f32 %v3956_v51, %v3281_v61 }
 0x102   : > { %v1511_v45 = vadd.f32 %v1479_v25, %v1443_v63  ;;  %v3588_v62 = vadd.f32 %v1617_v35, %v1581_v29  ;;  %v3590_v13 = vadd.f32 %v1618_v59, %v1582_v36  ;;  %v1603_v14 = vmul.f32 %v3957_v6, %v3984_v42 }
 0x103   : > { %v1549_v38 = vadd.f32 %v3269_v5, %v1510_v52  ;;  %v1113_v50 = vadd.f32 %v3233_v53, %v1074_v32  ;;  %v1114_v2 = vadd.f32 %v3233_v53, %v1075_v21  ;;  %v1604_v55 = vmul.f32 %v3957_v6, %v3985_v44 }
 0x104   : > { %v1550_v23 = vadd.f32 %v3269_v5, %v1511_v45  ;;  %v1635_v61 = vadd.f32 %v1603_v14, %v1567_v57  ;;  %v1671_v43 = vmul.f32 %v3959_v17, %v3986_v46  ;;  %v1672_v54 = vmul.f32 %v3959_v17, %v3987_v20  ;;  %v3989_v20 = vld [vmem:[#allocation17_spill] sm:$0xff] }
 0x105   : > { %v1683_v42 = vmul.f32 %v3959_v17, %v1549_v38  ;;  %v1194_v12 = vrot.slane %v1113_v50, 6  ;;  %v1195_v33 = vrot.slane %v1114_v2, 6  ;;  %v1291_v15 = vrot.slane %v1113_v50, 2 }
 0x106   : > { %v1684_v60 = vmul.f32 %v3959_v17, %v1550_v23  ;;  %v1292_v53 = vrot.slane %v1114_v2, 2  ;;  %v1412_v49 = vmul.f32 %v3947_v56, %v1113_v50  ;;  %v1413_v44 = vmul.f32 %v3947_v56, %v1114_v2 }
 0x107   : > { %v1712_v26 = vadd.f32 %v1683_v42, %v3537_v0  ;;  %v1196_v11 = vsel %vm1148_vm3, %v1194_v12, %v1195_v33  ;;  %v1244_v18 = vsel %vm1148_vm3, 0.0, %v1194_v12  ;;  %v1636_v24 = vadd.f32 %v1604_v55, %v1568_v10 }
 0x108   : > { %v1713_v22 = vadd.f32 %v1684_v60, %v3539_v3  ;;  %v1293_v30 = vsel %vm1245_vm4, %v1291_v15, %v1292_v53  ;;  %v1341_v39 = vsel %vm1245_vm4, %v1292_v53, 0.0  ;;  %v1376_v8 = vmul.f32 %v3946_v48, %v1244_v18 }
 0x109   : > { %v1751_v25 = vadd.f32 %v3313_v9, %v1712_v26  ;;  %v1377_v31 = vmul.f32 %v3946_v48, %v1196_v11  ;;  %v1480_v56 = vmul.f32 %v3948_v19, %v1293_v30  ;;  %v1481_v0 = vmul.f32 %v3948_v19, %v1341_v39 }
 0x10a   : > { %v1752_v47 = vadd.f32 %v3313_v9, %v1713_v22  ;;  %v1444_v7 = vadd.f32 %v1412_v49, %v1376_v8  ;;  %v1700_v29 = vadd.f32 %v1671_v43, %v1635_v61  ;;  %v1701_v36 = vadd.f32 %v1672_v54, %v1636_v24  ;;  %v3988_v43 = vld [vmem:[#allocation16_spill] sm:$0xff] }
 0x10b   : > { %v1445_v3 = vadd.f32 %v1413_v44, %v1377_v31  ;;  %v1583_v63 = vmul.f32 %v3956_v51, %v3378_v27  ;;  %v1584_v35 = vmul.f32 %v3956_v51, %v3384_v37  ;;  %v1619_v59 = vmul.f32 %v3957_v6, %v1549_v38  ;;  %v3670_v31 = vld [vmem:[%s3858_s11] ss:$0 sm:$0xff] }
 0x10c   : > { %v1771_v57 = vpack.c.bf16 %v1752_v47, %v1751_v25  ;;  %v1512_v48 = vadd.f32 %v1480_v56, %v1444_v7  ;;  %v1739_v52 = vadd.f32 %v3313_v9, %v1700_v29  ;;  %v1740_v19 = vadd.f32 %v3313_v9, %v1701_v36  ;;  %v2296_v7 = vld [vmem:[%s2428_s14 + $0x10] sm:$0xff] }
 0x10d   : > { %v1513_v32 = vadd.f32 %v1481_v0, %v1445_v3  ;;  %v1620_v21 = vmul.f32 %v3957_v6, %v1550_v23  ;;  %v1651_v10 = vadd.f32 %v1619_v59, %v1583_v63  ;;  %v1687_v45 = vmul.f32 0.0, %v3959_v17  ;;  %v2031_v0 = vld [vmem:[%s3676_s25 + $0x10] sm:$0xff]  ;;  %v2029_v3 = vld [vmem:[%s3676_s25] sm:$0xff] }
 0x10e   : > { %2272 = vmatprep.mubr.msk.bf16.mxu1 %vm1783_vm5, %v1771_v57  ;;  %v1551_v27 = vadd.f32 %v3269_v5, %v1512_v48  ;;  %v1765_v14 = vpack.c.bf16 %v1740_v19, %v1739_v52  ;;  %v1569_v37 = vmul.f32 %v3956_v51, %v3401_v1  ;;  %v1570_v38 = vmul.f32 %v3956_v51, %v3404_v16  ;;  %v2297_v59 = vld [vmem:[%s2428_s14] sm:$0xff]  ;;  %v2032_v52 = vld [vmem:[%s3676_s25 + $0x18] sm:$0xff] }
 0x10f   : > { %v1552_v50 = vadd.f32 %v3269_v5, %v1513_v32  ;;  %v1652_v2 = vadd.f32 %v1620_v21, %v1584_v35  ;;  %v1716_v55 = vadd.f32 %v1687_v45, %v1651_v10  ;;  %v1605_v23 = vmul.f32 %v3957_v6, %v3194_v40  ;;  %v2298_v21 = vld [vmem:[%s2428_s14 + $0x18] sm:$0xff] }
 0x110   : > { %v1685_v61 = vmul.f32 %v3959_v17, %v1551_v27  ;;  %2260 = vmatprep.mubr.msk.bf16.mxu0 %vm1783_vm5, %v1765_v14  ;;  %v1606_v46 = vmul.f32 %v3957_v6, %v3197_v28  ;;  %v1673_v1 = vmul.f32 %v3959_v17, %v3988_v43  ;;  %v1674_v16 = vmul.f32 %v3959_v17, %v3989_v20  ;;  %v2045_v20 = vld [vmem:[%s3676_s25 + $0x80] sm:$0xff] }
 0x111   : > { %v1686_v5 = vmul.f32 %v3959_v17, %v1552_v50  ;;  %v1717_v54 = vadd.f32 %v1687_v45, %v1652_v2  ;;  %v1755_v42 = vadd.f32 %v3313_v9, %v1716_v55  ;;  %v1637_v12 = vadd.f32 %v1605_v23, %v1569_v37  ;;  %v2299_v37 = vld [vmem:[%s2428_s14 + $0x8] sm:$0xff]  ;;  %v2047_v23 = vld [vmem:[%s3676_s25 + $0x90] sm:$0xff] }
 0x112   : > { %v1714_v40 = vadd.f32 %v1685_v61, %v3588_v62  ;;  %v1638_v33 = vadd.f32 %v1606_v46, %v1570_v38  ;;  %v1585_v15 = vmul.f32 %v3956_v51, %v3512_v41  ;;  %v1586_v28 = vmul.f32 %v3956_v51, %v3519_v4  ;;  %v2300_v46 = vld [vmem:[%s2428_s14 + $0x90] sm:$0xff] }
 0x113   : > { %v1715_v60 = vadd.f32 %v1686_v5, %v3590_v13  ;;  %v1756_v53 = vadd.f32 %v3313_v9, %v1717_v54  ;;  %v1702_v49 = vadd.f32 %v1673_v1, %v1637_v12  ;;  %v1621_v17 = vmul.f32 %v3957_v6, %v1551_v27  ;;  %v2030_v27 = vld [vmem:[%s3676_s25 + $0x8] sm:$0xff]  ;;  %v2301_v54 = vld [vmem:[%s2428_s14 + $0x80] sm:$0xff] }
 0x114   : > { %v1753_v44 = vadd.f32 %v3313_v9, %v1714_v40  ;;  %v1703_v26 = vadd.f32 %v1674_v16, %v1638_v33  ;;  %v1622_v11 = vmul.f32 %v3957_v6, %v1552_v50  ;;  %v2048_v40 = vld [vmem:[%s3676_s25 + $0x98] sm:$0xff] }
 0x115   : > { %v1754_v62 = vadd.f32 %v3313_v9, %v1715_v60  ;;  %v1741_v18 = vadd.f32 %v3313_v9, %v1702_v49  ;;  %v1653_v41 = vadd.f32 %v1621_v17, %v1585_v15  ;;  %v1773_v24 = vpack.c.bf16 %v1756_v53, %v1755_v42  ;;  %v2046_v49 = vld [vmem:[%s3676_s25 + $0x88] sm:$0xff] }
 0x116   : > { %v1742_v51 = vadd.f32 %v3313_v9, %v1703_v26  ;;  %v1654_v4 = vadd.f32 %v1622_v11, %v1586_v28  ;;  %v2302_v28 = vld [vmem:[%s2428_s14 + $0x98] sm:$0xff] }
 0x117   : > { %v1772_v13 = vpack.c.bf16 %v1754_v62, %v1753_v44  ;;  %v1718_v22 = vadd.f32 %v1687_v45, %v1653_v41  ;;  %v2303_v44 = vld [vmem:[%s2428_s14 + $0x88] sm:$0xff]  ;;  %v2035_v41 = vld [vmem:[%s3676_s25 + $0x30] sm:$0xff] }
 0x118   : > { %v1766_v30 = vpack.c.bf16 %v1742_v51, %v1741_v18  ;;  %v1719_v39 = vadd.f32 %v1687_v45, %v1654_v4  ;;  %v2304_v51 = vld [vmem:[%s2428_s14 + $0x30] sm:$0xff] }
 0x119   : > { %2273 = vmatmul.mubr.msk.bf16.gmra.mxu1 %vm1783_vm5, %v1772_v13  ;;  %v1757_v6 = vadd.f32 %v3313_v9, %v1718_v22  ;;  %v2033_v22 = vld [vmem:[%s3676_s25 + $0x20] sm:$0xff] }
 0x11a   : > { %2276 = vmatprep.mubr.msk.bf16.mxu1 %vm1783_vm5, %v1773_v24  ;;  %2261 = vmatmul.mubr.msk.bf16.gmra.mxu0 %vm1783_vm5, %v1766_v30  ;;  %v1758_v8 = vadd.f32 %v3313_v9, %v1719_v39 }
 0x11c   : > { %v1774_v25 = vpack.c.bf16 %v1758_v8, %v1757_v6  ;;  %v2305_v6 = vld [vmem:[%s2428_s14 + $0x20] sm:$0xff] }
 0x121   : > { %2277 = vmatmul.mubr.msk.bf16.gmra.mxu1 %vm1783_vm5, %v1774_v25 }
 0x160   : > { %v2250_v56 = vpop.f32.mrf.mxu0 }
 0x161   : > { %v1879_v9 = vadd.f32 %v2250_v56, %v3670_v31  ;;  %v2036_v56 = vld [vmem:[%s3676_s25 + $0x38] sm:$0xff] }
 0x162   : > { %v1870_v47 = vpop.f32.mrf.mxu0 }
 0x163   : > { %v1999_v29 = vmul.f32 %v2296_v7, %v1879_v9  ;;  %v1871_v36 = vadd.f32 %v3670_v31, %v1870_v47  ;;  %v2306_v47 = vld [vmem:[%s2428_s14 + $0x38] sm:$0xff] }
 0x164   : > { %v2251_v63 = vpop.f32.mrf.mxu0 }
 0x165   : > { %v2063_v35 = vadd.f32 %v2031_v0, %v1999_v29  ;;  %v1997_v57 = vmul.f32 %v2297_v59, %v1871_v36  ;;  %v1882_v48 = vadd.f32 %v2251_v63, %v3670_v31  ;;  %v2034_v36 = vld [vmem:[%s3676_s25 + $0x28] sm:$0xff] }
 0x166   : > { %v1873_v19 = vpop.f32.mrf.mxu0  ;;  %v2307_v63 = vld [vmem:[%s2428_s14 + $0x28] sm:$0xff] }
 0x167   : > { %2095 = vst.msk [vmem:[%s3686_s28 + $0x10] sm:$0xff] %vm1783_vm5, %v2063_v35  ;;  %v2061_v32 = vadd.f32 %v2029_v3, %v1997_v57  ;;  %v2000_v10 = vmul.f32 %v2298_v21, %v1882_v48  ;;  %v1874_v45 = vadd.f32 %v3670_v31, %v1873_v19 }
 0x169   : > { %2093 = vst.msk [vmem:[%s3686_s28] sm:$0xff] %vm1783_vm5, %v2061_v32  ;;  %v2064_v14 = vadd.f32 %v2032_v52, %v2000_v10  ;;  %v1998_v38 = vmul.f32 %v2299_v37, %v1874_v45  ;;  %v2051_v52 = vld [vmem:[%s3676_s25 + $0xb0] sm:$0xff]  ;;  %v2049_v45 = vld [vmem:[%s3676_s25 + $0xa0] sm:$0xff] }
 0x16a   : > { %v2308_v32 = vld [vmem:[%s2428_s14 + $0xb0] sm:$0xff]  ;;  %v2309_v37 = vld [vmem:[%s2428_s14 + $0xa0] sm:$0xff] }
 0x16b   : > { %2096 = vst.msk [vmem:[%s3686_s28 + $0x18] sm:$0xff] %vm1783_vm5, %v2064_v14  ;;  %v2062_v50 = vadd.f32 %v2030_v27, %v1998_v38 }
 0x16d   : > { %2094 = vst.msk [vmem:[%s3686_s28 + $0x8] sm:$0xff] %vm1783_vm5, %v2062_v50 }
 0x17d   : > { %v2266_v2 = vpop.f32.mrf.mxu1 }
 0x17e   : > { %v1943_v55 = vadd.f32 %v2266_v2, %v3670_v31 }
 0x17f   : > { %v1934_v61 = vpop.f32.mrf.mxu1 }
 0x180   : > { %v2015_v43 = vmul.f32 %v2300_v46, %v1943_v55  ;;  %v1935_v1 = vadd.f32 %v3670_v31, %v1934_v61  ;;  %v2052_v55 = vld [vmem:[%s3676_s25 + $0xb8] sm:$0xff] }
 0x181   : > { %v2267_v16 = vpop.f32.mrf.mxu1 }
 0x182   : > { %v2079_v5 = vadd.f32 %v2047_v23, %v2015_v43  ;;  %v2013_v42 = vmul.f32 %v2301_v54, %v1935_v1  ;;  %v1946_v12 = vadd.f32 %v2267_v16, %v3670_v31  ;;  %v2310_v43 = vld [vmem:[%s2428_s14 + $0xb8] sm:$0xff]  ;;  %v2039_v16 = vld [vmem:[%s3676_s25 + $0x50] sm:$0xff]  ;;  %v2050_v54 = vld [vmem:[%s3676_s25 + $0xa8] sm:$0xff] }
 0x183   : > { %v1937_v33 = vpop.f32.mrf.mxu1 }
 0x184   : > { %2111 = vst.msk [vmem:[%s3686_s28 + $0x90] sm:$0xff] %vm1783_vm5, %v2079_v5  ;;  %v2077_v15 = vadd.f32 %v2045_v20, %v2013_v42  ;;  %v2016_v60 = vmul.f32 %v2302_v28, %v1946_v12  ;;  %v1938_v53 = vadd.f32 %v3670_v31, %v1937_v33  ;;  %v2311_v42 = vld [vmem:[%s2428_s14 + $0x50] sm:$0xff] }
 0x186   : > { %2109 = vst.msk [vmem:[%s3686_s28 + $0x80] sm:$0xff] %vm1783_vm5, %v2077_v15  ;;  %v2080_v17 = vadd.f32 %v2048_v40, %v2016_v60  ;;  %v2014_v26 = vmul.f32 %v2303_v44, %v1938_v53  ;;  %v2312_v15 = vld [vmem:[%s2428_s14 + $0xa8] sm:$0xff]  ;;  %v2037_v60 = vld [vmem:[%s3676_s25 + $0x40] sm:$0xff] }
 0x188   : > { %2112 = vst.msk [vmem:[%s3686_s28 + $0x98] sm:$0xff] %vm1783_vm5, %v2080_v17  ;;  %v2078_v11 = vadd.f32 %v2046_v49, %v2014_v26  ;;  %v2313_v17 = vld [vmem:[%s2428_s14 + $0x40] sm:$0xff] }
 0x18a   : > { %2110 = vst.msk [vmem:[%s3686_s28 + $0x88] sm:$0xff] %vm1783_vm5, %v2078_v11 }
 0x1a3   : > { %v2254_v62 = vpop.f32.mrf.mxu0 }
 0x1a4   : > { %v1895_v18 = vadd.f32 %v2254_v62, %v3670_v31  ;;  %v2040_v62 = vld [vmem:[%s3676_s25 + $0x58] sm:$0xff] }
 0x1a5   : > { %v1886_v24 = vpop.f32.mrf.mxu0 }
 0x1a6   : > { %v2003_v4 = vmul.f32 %v2304_v51, %v1895_v18  ;;  %v1887_v13 = vadd.f32 %v3670_v31, %v1886_v24  ;;  %v2314_v24 = vld [vmem:[%s2428_s14 + $0x58] sm:$0xff] }
 0x1a7   : > { %v2255_v30 = vpop.f32.mrf.mxu0 }
 0x1a8   : > { %v2067_v39 = vadd.f32 %v2035_v41, %v2003_v4  ;;  %v2001_v8 = vmul.f32 %v2305_v6, %v1887_v13  ;;  %v1898_v25 = vadd.f32 %v2255_v30, %v3670_v31  ;;  %v2038_v13 = vld [vmem:[%s3676_s25 + $0x48] sm:$0xff] }
 0x1a9   : > { %v1889_v9 = vpop.f32.mrf.mxu0  ;;  %v2315_v30 = vld [vmem:[%s2428_s14 + $0x48] sm:$0xff] }
 0x1aa   : > { %2099 = vst.msk [vmem:[%s3686_s28 + $0x30] sm:$0xff] %vm1783_vm5, %v2067_v39  ;;  %v2065_v0 = vadd.f32 %v2033_v22, %v2001_v8  ;;  %v2004_v7 = vmul.f32 %v2306_v47, %v1898_v25  ;;  %v1890_v29 = vadd.f32 %v3670_v31, %v1889_v9  ;;  %v2055_v9 = vld [vmem:[%s3676_s25 + $0xd0] sm:$0xff] }
 0x1ac   : > { %2097 = vst.msk [vmem:[%s3686_s28 + $0x20] sm:$0xff] %vm1783_vm5, %v2065_v0  ;;  %v2068_v3 = vadd.f32 %v2036_v56, %v2004_v7  ;;  %v2002_v35 = vmul.f32 %v2307_v63, %v1890_v29  ;;  %v2316_v7 = vld [vmem:[%s2428_s14 + $0xd0] sm:$0xff] }
 0x1ae   : > { %2100 = vst.msk [vmem:[%s3686_s28 + $0x38] sm:$0xff] %vm1783_vm5, %v2068_v3  ;;  %v2066_v59 = vadd.f32 %v2034_v36, %v2002_v35  ;;  %v2043_v3 = vld [vmem:[%s3676_s25 + $0x70] sm:$0xff]  ;;  %v2053_v35 = vld [vmem:[%s3676_s25 + $0xc0] sm:$0xff] }
 0x1b0   : > { %2098 = vst.msk [vmem:[%s3686_s28 + $0x28] sm:$0xff] %vm1783_vm5, %v2066_v59 }
 0x1bb   : > { %v2270_v57 = vpop.f32.mrf.mxu1 }
 0x1bc   : > { %v1959_v48 = vadd.f32 %v2270_v57, %v3670_v31  ;;  %v2317_v57 = vld [vmem:[%s2428_s14 + $0x70] sm:$0xff] }
 0x1bd   : > { %v1950_v19 = vpop.f32.mrf.mxu1 }
 0x1be   : > { %v2019_v21 = vmul.f32 %v2308_v32, %v1959_v48  ;;  %v1951_v10 = vadd.f32 %v3670_v31, %v1950_v19  ;;  %v2318_v32 = vld [vmem:[%s2428_s14 + $0xc0] sm:$0xff] }
 0x1bf   : > { %v2271_v27 = vpop.f32.mrf.mxu1 }
 0x1c0   : > { %v2083_v14 = vadd.f32 %v2051_v52, %v2019_v21  ;;  %v2017_v38 = vmul.f32 %v2309_v37, %v1951_v10  ;;  %v1962_v50 = vadd.f32 %v2271_v27, %v3670_v31  ;;  %v2258_v2 = vpop.f32.mrf.mxu0 }
 0x1c1   : > { %v1953_v23 = vpop.f32.mrf.mxu1  ;;  %v1911_v61 = vadd.f32 %v2258_v2, %v3670_v31 }
 0x1c2   : > { %2115 = vst.msk [vmem:[%s3686_s28 + $0xb0] sm:$0xff] %vm1783_vm5, %v2083_v14  ;;  %v2081_v46 = vadd.f32 %v2049_v45, %v2017_v38  ;;  %v2020_v1 = vmul.f32 %v2310_v43, %v1962_v50  ;;  %v1954_v20 = vadd.f32 %v3670_v31, %v1953_v23  ;;  %v1902_v5 = vpop.f32.mrf.mxu0  ;;  %v2041_v45 = vld [vmem:[%s3676_s25 + $0x60] sm:$0xff]  ;;  %v2056_v14 = vld [vmem:[%s3676_s25 + $0xd8] sm:$0xff] }
 0x1c3   : > { %v2007_v12 = vmul.f32 %v2311_v42, %v1911_v61  ;;  %v1903_v40 = vadd.f32 %v3670_v31, %v1902_v5  ;;  %v2319_v50 = vld [vmem:[%s2428_s14 + $0x60] sm:$0xff]  ;;  %v2320_v61 = vld [vmem:[%s2428_s14 + $0xd8] sm:$0xff] }
 0x1c4   : > { %2113 = vst.msk [vmem:[%s3686_s28 + $0xa0] sm:$0xff] %vm1783_vm5, %v2081_v46  ;;  %v2084_v33 = vadd.f32 %v2052_v55, %v2020_v1  ;;  %v2018_v28 = vmul.f32 %v2312_v15, %v1954_v20  ;;  %v2259_v53 = vpop.f32.mrf.mxu0  ;;  %v2044_v1 = vld [vmem:[%s3676_s25 + $0x78] sm:$0xff]  ;;  %v2322_v15 = vld [vmem:[%s2428_s14 + $0xc8] sm:$0xff] }
 0x1c5   : > { %v2071_v49 = vadd.f32 %v2039_v16, %v2007_v12  ;;  %v2005_v44 = vmul.f32 %v2313_v17, %v1903_v40  ;;  %v1914_v26 = vadd.f32 %v2259_v53, %v3670_v31  ;;  %v2054_v16 = vld [vmem:[%s3676_s25 + $0xc8] sm:$0xff]  ;;  %v2321_v42 = vld [vmem:[%s2428_s14 + $0x78] sm:$0xff] }
 0x1c6   : > { %2116 = vst.msk [vmem:[%s3686_s28 + $0xb8] sm:$0xff] %vm1783_vm5, %v2084_v33  ;;  %v2082_v11 = vadd.f32 %v2050_v54, %v2018_v28  ;;  %v1905_v18 = vpop.f32.mrf.mxu0  ;;  %v2042_v53 = vld [vmem:[%s3676_s25 + $0x68] sm:$0xff] }
 0x1c7   : > { %2103 = vst.msk [vmem:[%s3686_s28 + $0x50] sm:$0xff] %vm1783_vm5, %v2071_v49  ;;  %v2069_v41 = vadd.f32 %v2037_v60, %v2005_v44  ;;  %v2008_v51 = vmul.f32 %v2314_v24, %v1914_v26  ;;  %v1906_v4 = vadd.f32 %v3670_v31, %v1905_v18  ;;  %v2059_v49 = vld [vmem:[%s3676_s25 + $0xf0] sm:$0xff]  ;;  %v2323_v26 = vld [vmem:[%s2428_s14 + $0x68] sm:$0xff]  ;;  %v2057_v24 = vld [vmem:[%s3676_s25 + $0xe0] sm:$0xff] }
 0x1c8   : > { %2114 = vst.msk [vmem:[%s3686_s28 + $0xa8] sm:$0xff] %vm1783_vm5, %v2082_v11 }
 0x1c9   : > { %2101 = vst.msk [vmem:[%s3686_s28 + $0x40] sm:$0xff] %vm1783_vm5, %v2069_v41  ;;  %v2072_v22 = vadd.f32 %v2040_v62, %v2008_v51  ;;  %v2006_v39 = vmul.f32 %v2315_v30, %v1906_v4 }
 0x1cb   : > { %2104 = vst.msk [vmem:[%s3686_s28 + $0x58] sm:$0xff] %vm1783_vm5, %v2072_v22  ;;  %v2070_v6 = vadd.f32 %v2038_v13, %v2006_v39  ;;  %v3990_v22 = vld [vmem:[#allocation18_spill] sm:$0xff] }
 0x1cd   : > { %2102 = vst.msk [vmem:[%s3686_s28 + $0x48] sm:$0xff] %vm1783_vm5, %v2070_v6  ;;  %v2060_v6 = vld [vmem:[%s3676_s25 + $0xf8] sm:$0xff] }
 0x1d9   : > { %v2274_v8 = vpop.f32.mrf.mxu1 }
 0x1da   : > { %v1975_v25 = vadd.f32 %v2274_v8, %v3670_v31  ;;  %v2262_v56 = vpop.f32.mrf.mxu0 }
 0x1db   : > { %v1966_v0 = vpop.f32.mrf.mxu1  ;;  %v1927_v47 = vadd.f32 %v2262_v56, %v3670_v31 }
 0x1dc   : > { %v2023_v29 = vmul.f32 %v2316_v7, %v1975_v25  ;;  %v1967_v36 = vadd.f32 %v3670_v31, %v1966_v0  ;;  %v1918_v63 = vpop.f32.mrf.mxu0 }
 0x1dd   : > { %v2275_v59 = vpop.f32.mrf.mxu1  ;;  %v2011_v48 = vmul.f32 %v2317_v57, %v1927_v47  ;;  %v1919_v52 = vadd.f32 %v3670_v31, %v1918_v63  ;;  %v3991_v47 = vld [vmem:[#allocation5_spill] sm:$0xff] }
 0x1de   : > { %v2087_v19 = vadd.f32 %v2055_v9, %v2023_v29  ;;  %v2021_v21 = vmul.f32 %v2318_v32, %v1967_v36  ;;  %v1978_v10 = vadd.f32 %v2275_v59, %v3670_v31  ;;  %v2263_v27 = vpop.f32.mrf.mxu0  ;;  %v2058_v9 = vld [vmem:[%s3676_s25 + $0xe8] sm:$0xff] }
 0x1df   : > { %v1969_v37 = vpop.f32.mrf.mxu1  ;;  %v2075_v38 = vadd.f32 %v2043_v3, %v2011_v48  ;;  %v2009_v2 = vmul.f32 %v2319_v50, %v1919_v52  ;;  %v1930_v55 = vadd.f32 %v2263_v27, %v3670_v31 }
 0x1e0   : > { %2119 = vst.msk [vmem:[%s3686_s28 + $0xd0] sm:$0xff] %vm1783_vm5, %v2087_v19  ;;  %v2085_v23 = vadd.f32 %v2053_v35, %v2021_v21  ;;  %v2024_v46 = vmul.f32 %v2320_v61, %v1978_v10  ;;  %v1970_v43 = vadd.f32 %v3670_v31, %v1969_v37  ;;  %v1921_v20 = vpop.f32.mrf.mxu0 }
 0x1e1   : > { %2107 = vst.msk [vmem:[%s3686_s28 + $0x70] sm:$0xff] %vm1783_vm5, %v2075_v38  ;;  %v2278_v5 = vpop.f32.mrf.mxu1  ;;  %v2073_v54 = vadd.f32 %v2041_v45, %v2009_v2  ;;  %v2012_v12 = vmul.f32 %v2321_v42, %v1930_v55  ;;  %v1922_v40 = vadd.f32 %v3670_v31, %v1921_v20 }
 0x1e2   : > { %2117 = vst.msk [vmem:[%s3686_s28 + $0xc0] sm:$0xff] %vm1783_vm5, %v2085_v23  ;;  %v2088_v33 = vadd.f32 %v2056_v14, %v2024_v46  ;;  %v2022_v28 = vmul.f32 %v2322_v15, %v1970_v43  ;;  %v1991_v60 = vadd.f32 %v2278_v5, %v3670_v31 }
 0x1e3   : > { %2105 = vst.msk [vmem:[%s3686_s28 + $0x60] sm:$0xff] %vm1783_vm5, %v2073_v54  ;;  %v1982_v17 = vpop.f32.mrf.mxu1  ;;  %v2076_v44 = vadd.f32 %v2044_v1, %v2012_v12  ;;  %v2010_v11 = vmul.f32 %v2323_v26, %v1922_v40 }
 0x1e4   : > { %2120 = vst.msk [vmem:[%s3686_s28 + $0xd8] sm:$0xff] %vm1783_vm5, %v2088_v33  ;;  %v2086_v62 = vadd.f32 %v2054_v16, %v2022_v28  ;;  %v2027_v18 = vmul.f32 %v1991_v60, %v3452_v58  ;;  %v1983_v41 = vadd.f32 %v3670_v31, %v1982_v17 }
 0x1e5   : > { %2108 = vst.msk [vmem:[%s3686_s28 + $0x78] sm:$0xff] %vm1783_vm5, %v2076_v44  ;;  %v2279_v51 = vpop.f32.mrf.mxu1  ;;  %v2074_v4 = vadd.f32 %v2042_v53, %v2010_v11 }
 0x1e6   : > { %2118 = vst.msk [vmem:[%s3686_s28 + $0xc8] sm:$0xff] %vm1783_vm5, %v2086_v62  ;;  %v2091_v13 = vadd.f32 %v2059_v49, %v2027_v18  ;;  %v2025_v30 = vmul.f32 %v1983_v41, %v3990_v22  ;;  %v1994_v39 = vadd.f32 %v2279_v51, %v3670_v31 }
 0x1e7   : > { %2106 = vst.msk [vmem:[%s3686_s28 + $0x68] sm:$0xff] %vm1783_vm5, %v2074_v4  ;;  %v1985_v58 = vpop.f32.mrf.mxu1 }
 0x1e8   : > { %2123 = vst.msk [vmem:[%s3686_s28 + $0xf0] sm:$0xff] %vm1783_vm5, %v2091_v13  ;;  %v2089_v8 = vadd.f32 %v2057_v24, %v2025_v30  ;;  %v2028_v25 = vmul.f32 %v1994_v39, %v3455_v34  ;;  %v1986_v56 = vadd.f32 %v3670_v31, %v1985_v58 }
 0x1ea   : > { %2121 = vst.msk [vmem:[%s3686_s28 + $0xe0] sm:$0xff] %vm1783_vm5, %v2089_v8  ;;  %v2092_v0 = vadd.f32 %v2060_v6, %v2028_v25  ;;  %v2026_v7 = vmul.f32 %v1986_v56, %v3991_v47 }
 0x1ec   : > { %2124 = vst.msk [vmem:[%s3686_s28 + $0xf8] sm:$0xff] %vm1783_vm5, %v2092_v0  ;;  %v2090_v29 = vadd.f32 %v2058_v9, %v2026_v7 }
 0x1ee   : > { %2122 = vst.msk [vmem:[%s3686_s28 + $0xe8] sm:$0xff] %vm1783_vm5, %v2090_v29 }
 0x1ef PF: > { %s22_s21 = sadd.s32 1, %s2330_s21  }
 0x1f0   : > { %p19_p4 = scmp.ge.s32.totalorder %s22_s21, 4  }
 0x1f2   :  { %21 = sbr.rel (!%p19_p4) target bundleno = 1 (0x1), region = 101 }

</bundles_post_ra>
